<compile_context>
chip_gen: v7x
topology: tpu7x:2x2x1
jax: 0.10.0
libtpu: 0.0.40
codegen_flags: <defaults>
</compile_context>

<pallas_src>
import functools

import jax
import jax.numpy as jnp
from jax.experimental import pallas as pl
from jax.experimental.pallas import tpu as pltpu

INPUT_DIM = 208
HIDDEN_DIM = 100
OUTPUT_DIM = 98
NUM_LAYERS = 2

H_PAD = 128     # hidden padded to one 128-lane block per gate
OUT_PAD = 128   # output head padded 98 -> 128 (cropped in the wrapper)


def _sigmoid(v):
    # Single EUP op (tanh) instead of exp+divide.
    return 0.5 * jnp.tanh(0.5 * v) + 0.5


def _gru_kernel(x_ref,
                wih0_ref, whh0_ref, b0_ref, bhn0_ref,
                w1h0_ref, w1h1_ref, b1_ref,
                wout_ref, bout_ref,
                o_ref,
                *, seq_len):
    """One sequence: 2-layer GRU + linear head, everything register/VMEM resident."""
    HP = H_PAD
    bf16 = jnp.bfloat16

    # ---- Hoisted layer-0 input projection: one (S,208)x(208,384) bf16 matmul, kept in regs. ----
    gi0 = (jnp.dot(x_ref[...].astype(bf16), wih0_ref[...],
                   preferred_element_type=jnp.float32)
           + b0_ref[...])                                                # (S, 384) f32

    bhn0 = bhn0_ref[...]                                                 # (1, 128)
    b1 = b1_ref[...]                                                     # (1, 512)

    h0 = jnp.zeros((1, HP), jnp.float32)
    h1 = jnp.zeros((1, HP), jnp.float32)
    h1_rows = []

    # Static Python unroll (seq_len is a compile-time constant) -> static row slices and
    # full scheduler visibility for interleaving adjacent steps.
    for t in range(seq_len):
        # Layer-1 recurrent half: depends only on LAST step's h1, so issue it first — it
        # overlaps with this step's layer-0 matmul/EUP work instead of serializing after it.
        g1_h1 = jnp.dot(h1.astype(bf16), w1h1_ref[...],
                        preferred_element_type=jnp.float32)              # (1, 512)

        # ---------------- layer 0: only the recurrent matmul is on the serial path ----------
        gh0 = jnp.dot(h0.astype(bf16), whh0_ref[...],
                      preferred_element_type=jnp.float32)                # (1, 384)
        gi0_t = gi0[t:t + 1, :]                                          # static row slice
        r0 = _sigmoid(gi0_t[:, :HP] + gh0[:, :HP])
        z0 = _sigmoid(gi0_t[:, HP:2 * HP] + gh0[:, HP:2 * HP])
        n0 = jnp.tanh(gi0_t[:, 2 * HP:] + r0 * (gh0[:, 2 * HP:] + bhn0))
        h0 = n0 + z0 * (h0 - n0)

        # ---------------- layer 1: K=128 input half on the critical path, sum with g1_h1 ------
        g1 = (g1_h1
              + jnp.dot(h0.astype(bf16), w1h0_ref[...],
                        preferred_element_type=jnp.float32)
              + b1)                                                      # (1, 512)
        r1 = _sigmoid(g1[:, :HP])
        z1 = _sigmoid(g1[:, HP:2 * HP])
        n1 = jnp.tanh(g1[:, 2 * HP:3 * HP] + r1 * g1[:, 3 * HP:])
        h1 = n1 + z1 * (h1 - n1)
        h1_rows.append(h1)

    # ---- Deferred output head: one (S,128)x(128,128) matmul + one lane-dense store. ----
    h1_hist = jnp.concatenate(h1_rows, axis=0)                           # (S, 128), registers
    o_ref[...] = (jnp.dot(h1_hist.astype(bf16), wout_ref[...],
                          preferred_element_type=jnp.float32)
                  + bout_ref[...])


def pack_params(params):
    """One-time repack of raw (pre-transposed PyTorch-layout) params into 128-padded bf16 blocks.

    Call ONCE at model-setup time; the per-call forward only consumes the packed tuple.
    Padded lanes of every weight/bias block are zero, so n/h padded lanes stay exactly zero
    through the recurrence (r/z pad lanes become 0.5 but only ever multiply zeros).
    """
    H, HP = HIDDEN_DIM, H_PAD
    f32, bf16 = jnp.float32, jnp.bfloat16

    def gate_blocks_w(w, rows):
        """(Din, 3H) -> (rows, 3*HP): each gate in its own 128-lane block, zero padded."""
        din = w.shape[0]
        out = jnp.zeros((rows, 3 * HP), f32)
        for g in range(3):
            out = out.at[:din, g * HP:g * HP + H].set(w[:, g * H:(g + 1) * H])
        return out

    def gate_blocks_b(b):
        return [jnp.zeros((1, HP), f32).at[:, :H].set(b[:, g * H:(g + 1) * H])
                for g in range(3)]

    # ----- layer 0 (r/z biases folded; b_in folded into the hoisted projection) -----
    wih0_p = gate_blocks_w(params["wih0"], INPUT_DIM).astype(bf16)        # (208, 384)
    whh0_p = gate_blocks_w(params["whh0"], HP).astype(bf16)               # (128, 384)
    bi0 = gate_blocks_b(params["bih0"])
    bh0 = gate_blocks_b(params["bhh0"])
    b0_p = jnp.concatenate([bi0[0] + bh0[0], bi0[1] + bh0[1], bi0[2]], axis=1)   # (1, 384) f32
    bhn0_p = bh0[2]                                                              # (1, 128) f32

    # ----- layer 1: split into the two K=128 halves (input half / recurrent half) -----
    wih1_p = gate_blocks_w(params["wih1"], HP)                            # (128, 384) f32
    whh1_p = gate_blocks_w(params["whh1"], HP)                            # (128, 384) f32
    zeros_blk = jnp.zeros((HP, HP), f32)
    w1h0_p = jnp.concatenate([wih1_p, zeros_blk], axis=1).astype(bf16)    # [r z n 0] (128, 512)
    w1h1_p = jnp.concatenate([whh1_p[:, :2 * HP], zeros_blk, whh1_p[:, 2 * HP:]],
                             axis=1).astype(bf16)                         # [r z 0 n] (128, 512)
    bi1 = gate_blocks_b(params["bih1"])
    bh1 = gate_blocks_b(params["bhh1"])
    b1_p = jnp.concatenate([bi1[0] + bh1[0], bi1[1] + bh1[1], bi1[2], bh1[2]],
                           axis=1)                                        # (1, 512) f32

    # ----- output head -----
    wout_p = (jnp.zeros((HP, OUT_PAD), f32)
              .at[:H, :OUTPUT_DIM].set(params["wout"]).astype(bf16))      # (128, 128)
    bout_p = jnp.zeros((1, OUT_PAD), f32).at[:, :OUTPUT_DIM].set(params["bout"])

    return (wih0_p, whh0_p, b0_p, bhn0_p, w1h0_p, w1h1_p, b1_p, wout_p, bout_p)


def baseline_gru_forward(x, packed):
    """x: (B, S, INPUT_DIM) f32; each sequence runs independently from zero hidden.
    Returns (B, S, OUTPUT_DIM) f32. The PyTorch module fixes B=1."""
    batch, seq_len, input_dim = x.shape
    assert input_dim == INPUT_DIM

    kernel = functools.partial(_gru_kernel, seq_len=seq_len)

    def full_spec(a):
        ndim = a.ndim
        return pl.BlockSpec(a.shape, lambda b, _n=ndim: (0,) * _n)   # weights resident across grid

    out_pad = pl.pallas_call(
        kernel,
        out_shape=jax.ShapeDtypeStruct((batch, seq_len, OUT_PAD), jnp.float32),
        grid=(batch,),
        in_specs=[pl.BlockSpec((None, seq_len, INPUT_DIM), lambda b: (b, 0, 0))]
                 + [full_spec(p) for p in packed],
        out_specs=pl.BlockSpec((None, seq_len, OUT_PAD), lambda b: (b, 0, 0)),
        compiler_params=pltpu.CompilerParams(
            dimension_semantics=("parallel",),          # independent sequences -> 2nd TC on v7x
            vmem_limit_bytes=4 * 1024 * 1024),          # ~0.7 MB footprint, leave headroom
    )(x, *packed)

    # Crop the padded output lanes (98 real).
    return out_pad[:, :, :OUTPUT_DIM]


def init_params(key):
    """Deterministic synthetic parameters, PyTorch-style U(-1/sqrt(H), 1/sqrt(H))."""
    bound = 1.0 / jnp.sqrt(jnp.float32(HIDDEN_DIM))
    keys = jax.random.split(key, 11)

    def u(k, shape):
        return jax.random.uniform(k, shape, jnp.float32, -bound, bound)

    # Weights stored pre-transposed: (in_features, 3H) / (H, out_dim); gate order r,z,n.
    return {
        "wih0": u(keys[0], (INPUT_DIM, 3 * HIDDEN_DIM)),
        "whh0": u(keys[1], (HIDDEN_DIM, 3 * HIDDEN_DIM)),
        "bih0": u(keys[2], (1, 3 * HIDDEN_DIM)),
        "bhh0": u(keys[3], (1, 3 * HIDDEN_DIM)),
        "wih1": u(keys[4], (HIDDEN_DIM, 3 * HIDDEN_DIM)),
        "whh1": u(keys[5], (HIDDEN_DIM, 3 * HIDDEN_DIM)),
        "bih1": u(keys[6], (1, 3 * HIDDEN_DIM)),
        "bhh1": u(keys[7], (1, 3 * HIDDEN_DIM)),
        "wout": u(keys[8], (HIDDEN_DIM, OUTPUT_DIM)),
        "bout": u(keys[9], (1, OUTPUT_DIM)),
    }


def reference_forward(x, params):
    """Pure-JAX f32 reference of the same (unpadded) math."""
    batch, seq_len, _ = x.shape

    def cell(x_t, h, wih, whh, bih, bhh):
        gi = x_t @ wih + bih
        gh = h @ whh + bhh
        H = HIDDEN_DIM
        r = jax.nn.sigmoid(gi[:, :H] + gh[:, :H])
        z = jax.nn.sigmoid(gi[:, H:2 * H] + gh[:, H:2 * H])
        n = jnp.tanh(gi[:, 2 * H:] + r * gh[:, 2 * H:])
        return (1.0 - z) * n + z * h

    h0 = jnp.zeros((batch, HIDDEN_DIM), jnp.float32)
    h1 = jnp.zeros((batch, HIDDEN_DIM), jnp.float32)
    outs = []
    for t in range(seq_len):
        x_t = x[:, t, :]
        h0 = cell(x_t, h0, params["wih0"], params["whh0"], params["bih0"], params["bhh0"])
        h1 = cell(h0, h1, params["wih1"], params["whh1"], params["bih1"], params["bhh1"])
        outs.append(h1 @ params["wout"] + params["bout"])
    return jnp.stack(outs, axis=1)


if __name__ == "__main__":
    key = jax.random.PRNGKey(0)
    pkey, xkey = jax.random.split(key)

    params = init_params(pkey)

    # One-time packing (hoisted out of the per-call path).
    packed = jax.block_until_ready(pack_params(params))

    # Module fixes batch_size=1 (hidden state shape); small sequence length.
    batch, seq_len = 1, 8
    x = jax.random.normal(xkey, (batch, seq_len, INPUT_DIM), jnp.float32)

    fwd = jax.jit(baseline_gru_forward)
    out = jax.block_until_ready(fwd(x, packed))

    ref = reference_forward(x, params)
    assert out.shape == (batch, seq_len, OUTPUT_DIM)
    # bf16 weights/activations on the MXU (f32 accumulate) -> loosened tolerance vs f32 reference.
    assert jnp.allclose(out, ref, atol=3e-2, rtol=3e-2), "Pallas output mismatch vs reference"

    print("KERNEL_OK")
</pallas_src>

<mosaic_0001>
module attributes {stable_mosaic.version = 11 : i64} {
  func.func @_gru_kernel(%arg0: i32, %arg1: memref<1x8x208xf32, #tpu.memory_space<vmem>>, %arg2: memref<208x384xbf16, #tpu.memory_space<vmem>>, %arg3: memref<128x384xbf16, #tpu.memory_space<vmem>>, %arg4: memref<1x384xf32, #tpu.memory_space<vmem>>, %arg5: memref<1x128xf32, #tpu.memory_space<vmem>>, %arg6: memref<128x512xbf16, #tpu.memory_space<vmem>>, %arg7: memref<128x512xbf16, #tpu.memory_space<vmem>>, %arg8: memref<1x512xf32, #tpu.memory_space<vmem>>, %arg9: memref<128x128xbf16, #tpu.memory_space<vmem>>, %arg10: memref<1x128xf32, #tpu.memory_space<vmem>>, %arg11: memref<1x8x128xf32, #tpu.memory_space<vmem>>) attributes {dimension_semantics = [#tpu.dimension_semantics<parallel>], iteration_bounds = array<i64: 1>, scalar_prefetch = 0 : i64, scratch_operands = 0 : i64, tpu.core_type = #tpu.core_type<tc>, window_params = [{transform_indices = @transform_0, window_bounds = array<i64: 1, 8, 208>}, {pipeline_mode = #tpu.pipeline_mode<synchronous>, transform_indices = @transform_1, window_bounds = array<i64: 208, 384>}, {pipeline_mode = #tpu.pipeline_mode<synchronous>, transform_indices = @transform_2, window_bounds = array<i64: 128, 384>}, {pipeline_mode = #tpu.pipeline_mode<synchronous>, transform_indices = @transform_3, window_bounds = array<i64: 1, 384>}, {pipeline_mode = #tpu.pipeline_mode<synchronous>, transform_indices = @transform_4, window_bounds = array<i64: 1, 128>}, {pipeline_mode = #tpu.pipeline_mode<synchronous>, transform_indices = @transform_5, window_bounds = array<i64: 128, 512>}, {pipeline_mode = #tpu.pipeline_mode<synchronous>, transform_indices = @transform_6, window_bounds = array<i64: 128, 512>}, {pipeline_mode = #tpu.pipeline_mode<synchronous>, transform_indices = @transform_7, window_bounds = array<i64: 1, 512>}, {pipeline_mode = #tpu.pipeline_mode<synchronous>, transform_indices = @transform_8, window_bounds = array<i64: 128, 128>}, {pipeline_mode = #tpu.pipeline_mode<synchronous>, transform_indices = @transform_9, window_bounds = array<i64: 1, 128>}, {transform_indices = @transform_10, window_bounds = array<i64: 1, 8, 128>}]} {
    %c0 = arith.constant 0 : index
    %c0_0 = arith.constant 0 : index
    %c0_1 = arith.constant 0 : index
    %0 = vector.load %arg1[%c0, %c0_0, %c0_1] : memref<1x8x208xf32, #tpu.memory_space<vmem>>, vector<1x8x208xf32>
    %1 = vector.shape_cast %0 : vector<1x8x208xf32> to vector<8x208xf32>
    %2 = arith.truncf %1 : vector<8x208xf32> to vector<8x208xbf16>
    %c0_2 = arith.constant 0 : index
    %c0_3 = arith.constant 0 : index
    %3 = vector.load %arg2[%c0_2, %c0_3] : memref<208x384xbf16, #tpu.memory_space<vmem>>, vector<208x384xbf16>
    %cst = arith.constant dense<0.000000e+00> : vector<8x384xf32>
    %4 = tpu.matmul %2, %3, %cst {dimension_numbers = #tpu.dot_dimension_numbers<[1], [0], [0], [1], [0, 0, 1, 1], [], []>} : vector<8x208xbf16>, vector<208x384xbf16>, vector<8x384xf32> -> vector<8x384xf32>
    %c0_4 = arith.constant 0 : index
    %c0_5 = arith.constant 0 : index
    %5 = vector.load %arg4[%c0_4, %c0_5] : memref<1x384xf32, #tpu.memory_space<vmem>>, vector<1x384xf32>
    %6 = vector.broadcast %5 : vector<1x384xf32> to vector<8x384xf32>
    %7 = arith.addf %4, %6 : vector<8x384xf32>
    %c0_6 = arith.constant 0 : index
    %c0_7 = arith.constant 0 : index
    %8 = vector.load %arg5[%c0_6, %c0_7] : memref<1x128xf32, #tpu.memory_space<vmem>>, vector<1x128xf32>
    %c0_8 = arith.constant 0 : index
    %c0_9 = arith.constant 0 : index
    %9 = vector.load %arg8[%c0_8, %c0_9] : memref<1x512xf32, #tpu.memory_space<vmem>>, vector<1x512xf32>
    %cst_10 = arith.constant 0.000000e+00 : f32
    %10 = vector.broadcast %cst_10 : f32 to vector<1x128xf32>
    %cst_11 = arith.constant 0.000000e+00 : f32
    %11 = vector.broadcast %cst_11 : f32 to vector<1x128xf32>
    %12 = arith.truncf %11 : vector<1x128xf32> to vector<1x128xbf16>
    %c0_12 = arith.constant 0 : index
    %c0_13 = arith.constant 0 : index
    %13 = vector.load %arg7[%c0_12, %c0_13] : memref<128x512xbf16, #tpu.memory_space<vmem>>, vector<128x512xbf16>
    %cst_14 = arith.constant dense<0.000000e+00> : vector<1x512xf32>
    %14 = tpu.matmul %12, %13, %cst_14 {dimension_numbers = #tpu.dot_dimension_numbers<[1], [0], [0], [1], [0, 0, 1, 1], [], []>} : vector<1x128xbf16>, vector<128x512xbf16>, vector<1x512xf32> -> vector<1x512xf32>
    %15 = arith.truncf %10 : vector<1x128xf32> to vector<1x128xbf16>
    %c0_15 = arith.constant 0 : index
    %c0_16 = arith.constant 0 : index
    %16 = vector.load %arg3[%c0_15, %c0_16] : memref<128x384xbf16, #tpu.memory_space<vmem>>, vector<128x384xbf16>
    %cst_17 = arith.constant dense<0.000000e+00> : vector<1x384xf32>
    %17 = tpu.matmul %15, %16, %cst_17 {dimension_numbers = #tpu.dot_dimension_numbers<[1], [0], [0], [1], [0, 0, 1, 1], [], []>} : vector<1x128xbf16>, vector<128x384xbf16>, vector<1x384xf32> -> vector<1x384xf32>
    %18 = vector.extract_strided_slice %7 {offsets = [0, 0], sizes = [1, 384], strides = [1, 1]} : vector<8x384xf32> to vector<1x384xf32>
    %19 = vector.extract_strided_slice %18 {offsets = [0, 0], sizes = [1, 128], strides = [1, 1]} : vector<1x384xf32> to vector<1x128xf32>
    %20 = vector.extract_strided_slice %17 {offsets = [0, 0], sizes = [1, 128], strides = [1, 1]} : vector<1x384xf32> to vector<1x128xf32>
    %21 = arith.addf %19, %20 : vector<1x128xf32>
    %cst_18 = arith.constant 5.000000e-01 : f32
    %22 = vector.broadcast %cst_18 : f32 to vector<1x128xf32>
    %23 = arith.mulf %22, %21 : vector<1x128xf32>
    %24 = math.tanh %23 : vector<1x128xf32>
    %cst_19 = arith.constant 5.000000e-01 : f32
    %25 = vector.broadcast %cst_19 : f32 to vector<1x128xf32>
    %26 = arith.mulf %25, %24 : vector<1x128xf32>
    %cst_20 = arith.constant 5.000000e-01 : f32
    %27 = vector.broadcast %cst_20 : f32 to vector<1x128xf32>
    %28 = arith.addf %26, %27 : vector<1x128xf32>
    %29 = vector.extract_strided_slice %18 {offsets = [0, 128], sizes = [1, 128], strides = [1, 1]} : vector<1x384xf32> to vector<1x128xf32>
    %30 = vector.extract_strided_slice %17 {offsets = [0, 128], sizes = [1, 128], strides = [1, 1]} : vector<1x384xf32> to vector<1x128xf32>
    %31 = arith.addf %29, %30 : vector<1x128xf32>
    %cst_21 = arith.constant 5.000000e-01 : f32
    %32 = vector.broadcast %cst_21 : f32 to vector<1x128xf32>
    %33 = arith.mulf %32, %31 : vector<1x128xf32>
    %34 = math.tanh %33 : vector<1x128xf32>
    %cst_22 = arith.constant 5.000000e-01 : f32
    %35 = vector.broadcast %cst_22 : f32 to vector<1x128xf32>
    %36 = arith.mulf %35, %34 : vector<1x128xf32>
    %cst_23 = arith.constant 5.000000e-01 : f32
    %37 = vector.broadcast %cst_23 : f32 to vector<1x128xf32>
    %38 = arith.addf %36, %37 : vector<1x128xf32>
    %39 = vector.extract_strided_slice %18 {offsets = [0, 256], sizes = [1, 128], strides = [1, 1]} : vector<1x384xf32> to vector<1x128xf32>
    %40 = vector.extract_strided_slice %17 {offsets = [0, 256], sizes = [1, 128], strides = [1, 1]} : vector<1x384xf32> to vector<1x128xf32>
    %41 = arith.addf %40, %8 : vector<1x128xf32>
    %42 = arith.mulf %28, %41 : vector<1x128xf32>
    %43 = arith.addf %39, %42 : vector<1x128xf32>
    %44 = math.tanh %43 : vector<1x128xf32>
    %45 = arith.subf %10, %44 : vector<1x128xf32>
    %46 = arith.mulf %38, %45 : vector<1x128xf32>
    %47 = arith.addf %44, %46 : vector<1x128xf32>
    %48 = arith.truncf %47 : vector<1x128xf32> to vector<1x128xbf16>
    %c0_24 = arith.constant 0 : index
    %c0_25 = arith.constant 0 : index
    %49 = vector.load %arg6[%c0_24, %c0_25] : memref<128x512xbf16, #tpu.memory_space<vmem>>, vector<128x512xbf16>
    %cst_26 = arith.constant dense<0.000000e+00> : vector<1x512xf32>
    %50 = tpu.matmul %48, %49, %cst_26 {dimension_numbers = #tpu.dot_dimension_numbers<[1], [0], [0], [1], [0, 0, 1, 1], [], []>} : vector<1x128xbf16>, vector<128x512xbf16>, vector<1x512xf32> -> vector<1x512xf32>
    %51 = arith.addf %14, %50 : vector<1x512xf32>
    %52 = arith.addf %51, %9 : vector<1x512xf32>
    %53 = vector.extract_strided_slice %52 {offsets = [0, 0], sizes = [1, 128], strides = [1, 1]} : vector<1x512xf32> to vector<1x128xf32>
    %cst_27 = arith.constant 5.000000e-01 : f32
    %54 = vector.broadcast %cst_27 : f32 to vector<1x128xf32>
    %55 = arith.mulf %54, %53 : vector<1x128xf32>
    %56 = math.tanh %55 : vector<1x128xf32>
    %cst_28 = arith.constant 5.000000e-01 : f32
    %57 = vector.broadcast %cst_28 : f32 to vector<1x128xf32>
    %58 = arith.mulf %57, %56 : vector<1x128xf32>
    %cst_29 = arith.constant 5.000000e-01 : f32
    %59 = vector.broadcast %cst_29 : f32 to vector<1x128xf32>
    %60 = arith.addf %58, %59 : vector<1x128xf32>
    %61 = vector.extract_strided_slice %52 {offsets = [0, 128], sizes = [1, 128], strides = [1, 1]} : vector<1x512xf32> to vector<1x128xf32>
    %cst_30 = arith.constant 5.000000e-01 : f32
    %62 = vector.broadcast %cst_30 : f32 to vector<1x128xf32>
    %63 = arith.mulf %62, %61 : vector<1x128xf32>
    %64 = math.tanh %63 : vector<1x128xf32>
    %cst_31 = arith.constant 5.000000e-01 : f32
    %65 = vector.broadcast %cst_31 : f32 to vector<1x128xf32>
    %66 = arith.mulf %65, %64 : vector<1x128xf32>
    %cst_32 = arith.constant 5.000000e-01 : f32
    %67 = vector.broadcast %cst_32 : f32 to vector<1x128xf32>
    %68 = arith.addf %66, %67 : vector<1x128xf32>
    %69 = vector.extract_strided_slice %52 {offsets = [0, 256], sizes = [1, 128], strides = [1, 1]} : vector<1x512xf32> to vector<1x128xf32>
    %70 = vector.extract_strided_slice %52 {offsets = [0, 384], sizes = [1, 128], strides = [1, 1]} : vector<1x512xf32> to vector<1x128xf32>
    %71 = arith.mulf %60, %70 : vector<1x128xf32>
    %72 = arith.addf %69, %71 : vector<1x128xf32>
    %73 = math.tanh %72 : vector<1x128xf32>
    %74 = arith.subf %11, %73 : vector<1x128xf32>
    %75 = arith.mulf %68, %74 : vector<1x128xf32>
    %76 = arith.addf %73, %75 : vector<1x128xf32>
    %77 = arith.truncf %76 : vector<1x128xf32> to vector<1x128xbf16>
    %c0_33 = arith.constant 0 : index
    %c0_34 = arith.constant 0 : index
    %78 = vector.load %arg7[%c0_33, %c0_34] : memref<128x512xbf16, #tpu.memory_space<vmem>>, vector<128x512xbf16>
    %cst_35 = arith.constant dense<0.000000e+00> : vector<1x512xf32>
    %79 = tpu.matmul %77, %78, %cst_35 {dimension_numbers = #tpu.dot_dimension_numbers<[1], [0], [0], [1], [0, 0, 1, 1], [], []>} : vector<1x128xbf16>, vector<128x512xbf16>, vector<1x512xf32> -> vector<1x512xf32>
    %80 = arith.truncf %47 : vector<1x128xf32> to vector<1x128xbf16>
    %c0_36 = arith.constant 0 : index
    %c0_37 = arith.constant 0 : index
    %81 = vector.load %arg3[%c0_36, %c0_37] : memref<128x384xbf16, #tpu.memory_space<vmem>>, vector<128x384xbf16>
    %cst_38 = arith.constant dense<0.000000e+00> : vector<1x384xf32>
    %82 = tpu.matmul %80, %81, %cst_38 {dimension_numbers = #tpu.dot_dimension_numbers<[1], [0], [0], [1], [0, 0, 1, 1], [], []>} : vector<1x128xbf16>, vector<128x384xbf16>, vector<1x384xf32> -> vector<1x384xf32>
    %83 = vector.extract_strided_slice %7 {offsets = [1, 0], sizes = [1, 384], strides = [1, 1]} : vector<8x384xf32> to vector<1x384xf32>
    %84 = vector.extract_strided_slice %83 {offsets = [0, 0], sizes = [1, 128], strides = [1, 1]} : vector<1x384xf32> to vector<1x128xf32>
    %85 = vector.extract_strided_slice %82 {offsets = [0, 0], sizes = [1, 128], strides = [1, 1]} : vector<1x384xf32> to vector<1x128xf32>
    %86 = arith.addf %84, %85 : vector<1x128xf32>
    %cst_39 = arith.constant 5.000000e-01 : f32
    %87 = vector.broadcast %cst_39 : f32 to vector<1x128xf32>
    %88 = arith.mulf %87, %86 : vector<1x128xf32>
    %89 = math.tanh %88 : vector<1x128xf32>
    %cst_40 = arith.constant 5.000000e-01 : f32
    %90 = vector.broadcast %cst_40 : f32 to vector<1x128xf32>
    %91 = arith.mulf %90, %89 : vector<1x128xf32>
    %cst_41 = arith.constant 5.000000e-01 : f32
    %92 = vector.broadcast %cst_41 : f32 to vector<1x128xf32>
    %93 = arith.addf %91, %92 : vector<1x128xf32>
    %94 = vector.extract_strided_slice %83 {offsets = [0, 128], sizes = [1, 128], strides = [1, 1]} : vector<1x384xf32> to vector<1x128xf32>
    %95 = vector.extract_strided_slice %82 {offsets = [0, 128], sizes = [1, 128], strides = [1, 1]} : vector<1x384xf32> to vector<1x128xf32>
    %96 = arith.addf %94, %95 : vector<1x128xf32>
    %cst_42 = arith.constant 5.000000e-01 : f32
    %97 = vector.broadcast %cst_42 : f32 to vector<1x128xf32>
    %98 = arith.mulf %97, %96 : vector<1x128xf32>
    %99 = math.tanh %98 : vector<1x128xf32>
    %cst_43 = arith.constant 5.000000e-01 : f32
    %100 = vector.broadcast %cst_43 : f32 to vector<1x128xf32>
    %101 = arith.mulf %100, %99 : vector<1x128xf32>
    %cst_44 = arith.constant 5.000000e-01 : f32
    %102 = vector.broadcast %cst_44 : f32 to vector<1x128xf32>
    %103 = arith.addf %101, %102 : vector<1x128xf32>
    %104 = vector.extract_strided_slice %83 {offsets = [0, 256], sizes = [1, 128], strides = [1, 1]} : vector<1x384xf32> to vector<1x128xf32>
    %105 = vector.extract_strided_slice %82 {offsets = [0, 256], sizes = [1, 128], strides = [1, 1]} : vector<1x384xf32> to vector<1x128xf32>
    %106 = arith.addf %105, %8 : vector<1x128xf32>
    %107 = arith.mulf %93, %106 : vector<1x128xf32>
    %108 = arith.addf %104, %107 : vector<1x128xf32>
    %109 = math.tanh %108 : vector<1x128xf32>
    %110 = arith.subf %47, %109 : vector<1x128xf32>
    %111 = arith.mulf %103, %110 : vector<1x128xf32>
    %112 = arith.addf %109, %111 : vector<1x128xf32>
    %113 = arith.truncf %112 : vector<1x128xf32> to vector<1x128xbf16>
    %c0_45 = arith.constant 0 : index
    %c0_46 = arith.constant 0 : index
    %114 = vector.load %arg6[%c0_45, %c0_46] : memref<128x512xbf16, #tpu.memory_space<vmem>>, vector<128x512xbf16>
    %cst_47 = arith.constant dense<0.000000e+00> : vector<1x512xf32>
    %115 = tpu.matmul %113, %114, %cst_47 {dimension_numbers = #tpu.dot_dimension_numbers<[1], [0], [0], [1], [0, 0, 1, 1], [], []>} : vector<1x128xbf16>, vector<128x512xbf16>, vector<1x512xf32> -> vector<1x512xf32>
    %116 = arith.addf %79, %115 : vector<1x512xf32>
    %117 = arith.addf %116, %9 : vector<1x512xf32>
    %118 = vector.extract_strided_slice %117 {offsets = [0, 0], sizes = [1, 128], strides = [1, 1]} : vector<1x512xf32> to vector<1x128xf32>
    %cst_48 = arith.constant 5.000000e-01 : f32
    %119 = vector.broadcast %cst_48 : f32 to vector<1x128xf32>
    %120 = arith.mulf %119, %118 : vector<1x128xf32>
    %121 = math.tanh %120 : vector<1x128xf32>
    %cst_49 = arith.constant 5.000000e-01 : f32
    %122 = vector.broadcast %cst_49 : f32 to vector<1x128xf32>
    %123 = arith.mulf %122, %121 : vector<1x128xf32>
    %cst_50 = arith.constant 5.000000e-01 : f32
    %124 = vector.broadcast %cst_50 : f32 to vector<1x128xf32>
    %125 = arith.addf %123, %124 : vector<1x128xf32>
    %126 = vector.extract_strided_slice %117 {offsets = [0, 128], sizes = [1, 128], strides = [1, 1]} : vector<1x512xf32> to vector<1x128xf32>
    %cst_51 = arith.constant 5.000000e-01 : f32
    %127 = vector.broadcast %cst_51 : f32 to vector<1x128xf32>
    %128 = arith.mulf %127, %126 : vector<1x128xf32>
    %129 = math.tanh %128 : vector<1x128xf32>
    %cst_52 = arith.constant 5.000000e-01 : f32
    %130 = vector.broadcast %cst_52 : f32 to vector<1x128xf32>
    %131 = arith.mulf %130, %129 : vector<1x128xf32>
    %cst_53 = arith.constant 5.000000e-01 : f32
    %132 = vector.broadcast %cst_53 : f32 to vector<1x128xf32>
    %133 = arith.addf %131, %132 : vector<1x128xf32>
    %134 = vector.extract_strided_slice %117 {offsets = [0, 256], sizes = [1, 128], strides = [1, 1]} : vector<1x512xf32> to vector<1x128xf32>
    %135 = vector.extract_strided_slice %117 {offsets = [0, 384], sizes = [1, 128], strides = [1, 1]} : vector<1x512xf32> to vector<1x128xf32>
    %136 = arith.mulf %125, %135 : vector<1x128xf32>
    %137 = arith.addf %134, %136 : vector<1x128xf32>
    %138 = math.tanh %137 : vector<1x128xf32>
    %139 = arith.subf %76, %138 : vector<1x128xf32>
    %140 = arith.mulf %133, %139 : vector<1x128xf32>
    %141 = arith.addf %138, %140 : vector<1x128xf32>
    %142 = arith.truncf %141 : vector<1x128xf32> to vector<1x128xbf16>
    %c0_54 = arith.constant 0 : index
    %c0_55 = arith.constant 0 : index
    %143 = vector.load %arg7[%c0_54, %c0_55] : memref<128x512xbf16, #tpu.memory_space<vmem>>, vector<128x512xbf16>
    %cst_56 = arith.constant dense<0.000000e+00> : vector<1x512xf32>
    %144 = tpu.matmul %142, %143, %cst_56 {dimension_numbers = #tpu.dot_dimension_numbers<[1], [0], [0], [1], [0, 0, 1, 1], [], []>} : vector<1x128xbf16>, vector<128x512xbf16>, vector<1x512xf32> -> vector<1x512xf32>
    %145 = arith.truncf %112 : vector<1x128xf32> to vector<1x128xbf16>
    %c0_57 = arith.constant 0 : index
    %c0_58 = arith.constant 0 : index
    %146 = vector.load %arg3[%c0_57, %c0_58] : memref<128x384xbf16, #tpu.memory_space<vmem>>, vector<128x384xbf16>
    %cst_59 = arith.constant dense<0.000000e+00> : vector<1x384xf32>
    %147 = tpu.matmul %145, %146, %cst_59 {dimension_numbers = #tpu.dot_dimension_numbers<[1], [0], [0], [1], [0, 0, 1, 1], [], []>} : vector<1x128xbf16>, vector<128x384xbf16>, vector<1x384xf32> -> vector<1x384xf32>
    %148 = vector.extract_strided_slice %7 {offsets = [2, 0], sizes = [1, 384], strides = [1, 1]} : vector<8x384xf32> to vector<1x384xf32>
    %149 = vector.extract_strided_slice %148 {offsets = [0, 0], sizes = [1, 128], strides = [1, 1]} : vector<1x384xf32> to vector<1x128xf32>
    %150 = vector.extract_strided_slice %147 {offsets = [0, 0], sizes = [1, 128], strides = [1, 1]} : vector<1x384xf32> to vector<1x128xf32>
    %151 = arith.addf %149, %150 : vector<1x128xf32>
    %cst_60 = arith.constant 5.000000e-01 : f32
    %152 = vector.broadcast %cst_60 : f32 to vector<1x128xf32>
    %153 = arith.mulf %152, %151 : vector<1x128xf32>
    %154 = math.tanh %153 : vector<1x128xf32>
    %cst_61 = arith.constant 5.000000e-01 : f32
    %155 = vector.broadcast %cst_61 : f32 to vector<1x128xf32>
    %156 = arith.mulf %155, %154 : vector<1x128xf32>
    %cst_62 = arith.constant 5.000000e-01 : f32
    %157 = vector.broadcast %cst_62 : f32 to vector<1x128xf32>
    %158 = arith.addf %156, %157 : vector<1x128xf32>
    %159 = vector.extract_strided_slice %148 {offsets = [0, 128], sizes = [1, 128], strides = [1, 1]} : vector<1x384xf32> to vector<1x128xf32>
    %160 = vector.extract_strided_slice %147 {offsets = [0, 128], sizes = [1, 128], strides = [1, 1]} : vector<1x384xf32> to vector<1x128xf32>
    %161 = arith.addf %159, %160 : vector<1x128xf32>
    %cst_63 = arith.constant 5.000000e-01 : f32
    %162 = vector.broadcast %cst_63 : f32 to vector<1x128xf32>
    %163 = arith.mulf %162, %161 : vector<1x128xf32>
    %164 = math.tanh %163 : vector<1x128xf32>
    %cst_64 = arith.constant 5.000000e-01 : f32
    %165 = vector.broadcast %cst_64 : f32 to vector<1x128xf32>
    %166 = arith.mulf %165, %164 : vector<1x128xf32>
    %cst_65 = arith.constant 5.000000e-01 : f32
    %167 = vector.broadcast %cst_65 : f32 to vector<1x128xf32>
    %168 = arith.addf %166, %167 : vector<1x128xf32>
    %169 = vector.extract_strided_slice %148 {offsets = [0, 256], sizes = [1, 128], strides = [1, 1]} : vector<1x384xf32> to vector<1x128xf32>
    %170 = vector.extract_strided_slice %147 {offsets = [0, 256], sizes = [1, 128], strides = [1, 1]} : vector<1x384xf32> to vector<1x128xf32>
    %171 = arith.addf %170, %8 : vector<1x128xf32>
    %172 = arith.mulf %158, %171 : vector<1x128xf32>
    %173 = arith.addf %169, %172 : vector<1x128xf32>
    %174 = math.tanh %173 : vector<1x128xf32>
    %175 = arith.subf %112, %174 : vector<1x128xf32>
    %176 = arith.mulf %168, %175 : vector<1x128xf32>
    %177 = arith.addf %174, %176 : vector<1x128xf32>
    %178 = arith.truncf %177 : vector<1x128xf32> to vector<1x128xbf16>
    %c0_66 = arith.constant 0 : index
    %c0_67 = arith.constant 0 : index
    %179 = vector.load %arg6[%c0_66, %c0_67] : memref<128x512xbf16, #tpu.memory_space<vmem>>, vector<128x512xbf16>
    %cst_68 = arith.constant dense<0.000000e+00> : vector<1x512xf32>
    %180 = tpu.matmul %178, %179, %cst_68 {dimension_numbers = #tpu.dot_dimension_numbers<[1], [0], [0], [1], [0, 0, 1, 1], [], []>} : vector<1x128xbf16>, vector<128x512xbf16>, vector<1x512xf32> -> vector<1x512xf32>
    %181 = arith.addf %144, %180 : vector<1x512xf32>
    %182 = arith.addf %181, %9 : vector<1x512xf32>
    %183 = vector.extract_strided_slice %182 {offsets = [0, 0], sizes = [1, 128], strides = [1, 1]} : vector<1x512xf32> to vector<1x128xf32>
    %cst_69 = arith.constant 5.000000e-01 : f32
    %184 = vector.broadcast %cst_69 : f32 to vector<1x128xf32>
    %185 = arith.mulf %184, %183 : vector<1x128xf32>
    %186 = math.tanh %185 : vector<1x128xf32>
    %cst_70 = arith.constant 5.000000e-01 : f32
    %187 = vector.broadcast %cst_70 : f32 to vector<1x128xf32>
    %188 = arith.mulf %187, %186 : vector<1x128xf32>
    %cst_71 = arith.constant 5.000000e-01 : f32
    %189 = vector.broadcast %cst_71 : f32 to vector<1x128xf32>
    %190 = arith.addf %188, %189 : vector<1x128xf32>
    %191 = vector.extract_strided_slice %182 {offsets = [0, 128], sizes = [1, 128], strides = [1, 1]} : vector<1x512xf32> to vector<1x128xf32>
    %cst_72 = arith.constant 5.000000e-01 : f32
    %192 = vector.broadcast %cst_72 : f32 to vector<1x128xf32>
    %193 = arith.mulf %192, %191 : vector<1x128xf32>
    %194 = math.tanh %193 : vector<1x128xf32>
    %cst_73 = arith.constant 5.000000e-01 : f32
    %195 = vector.broadcast %cst_73 : f32 to vector<1x128xf32>
    %196 = arith.mulf %195, %194 : vector<1x128xf32>
    %cst_74 = arith.constant 5.000000e-01 : f32
    %197 = vector.broadcast %cst_74 : f32 to vector<1x128xf32>
    %198 = arith.addf %196, %197 : vector<1x128xf32>
    %199 = vector.extract_strided_slice %182 {offsets = [0, 256], sizes = [1, 128], strides = [1, 1]} : vector<1x512xf32> to vector<1x128xf32>
    %200 = vector.extract_strided_slice %182 {offsets = [0, 384], sizes = [1, 128], strides = [1, 1]} : vector<1x512xf32> to vector<1x128xf32>
    %201 = arith.mulf %190, %200 : vector<1x128xf32>
    %202 = arith.addf %199, %201 : vector<1x128xf32>
    %203 = math.tanh %202 : vector<1x128xf32>
    %204 = arith.subf %141, %203 : vector<1x128xf32>
    %205 = arith.mulf %198, %204 : vector<1x128xf32>
    %206 = arith.addf %203, %205 : vector<1x128xf32>
    %207 = arith.truncf %206 : vector<1x128xf32> to vector<1x128xbf16>
    %c0_75 = arith.constant 0 : index
    %c0_76 = arith.constant 0 : index
    %208 = vector.load %arg7[%c0_75, %c0_76] : memref<128x512xbf16, #tpu.memory_space<vmem>>, vector<128x512xbf16>
    %cst_77 = arith.constant dense<0.000000e+00> : vector<1x512xf32>
    %209 = tpu.matmul %207, %208, %cst_77 {dimension_numbers = #tpu.dot_dimension_numbers<[1], [0], [0], [1], [0, 0, 1, 1], [], []>} : vector<1x128xbf16>, vector<128x512xbf16>, vector<1x512xf32> -> vector<1x512xf32>
    %210 = arith.truncf %177 : vector<1x128xf32> to vector<1x128xbf16>
    %c0_78 = arith.constant 0 : index
    %c0_79 = arith.constant 0 : index
    %211 = vector.load %arg3[%c0_78, %c0_79] : memref<128x384xbf16, #tpu.memory_space<vmem>>, vector<128x384xbf16>
    %cst_80 = arith.constant dense<0.000000e+00> : vector<1x384xf32>
    %212 = tpu.matmul %210, %211, %cst_80 {dimension_numbers = #tpu.dot_dimension_numbers<[1], [0], [0], [1], [0, 0, 1, 1], [], []>} : vector<1x128xbf16>, vector<128x384xbf16>, vector<1x384xf32> -> vector<1x384xf32>
    %213 = vector.extract_strided_slice %7 {offsets = [3, 0], sizes = [1, 384], strides = [1, 1]} : vector<8x384xf32> to vector<1x384xf32>
    %214 = vector.extract_strided_slice %213 {offsets = [0, 0], sizes = [1, 128], strides = [1, 1]} : vector<1x384xf32> to vector<1x128xf32>
    %215 = vector.extract_strided_slice %212 {offsets = [0, 0], sizes = [1, 128], strides = [1, 1]} : vector<1x384xf32> to vector<1x128xf32>
    %216 = arith.addf %214, %215 : vector<1x128xf32>
    %cst_81 = arith.constant 5.000000e-01 : f32
    %217 = vector.broadcast %cst_81 : f32 to vector<1x128xf32>
    %218 = arith.mulf %217, %216 : vector<1x128xf32>
    %219 = math.tanh %218 : vector<1x128xf32>
    %cst_82 = arith.constant 5.000000e-01 : f32
    %220 = vector.broadcast %cst_82 : f32 to vector<1x128xf32>
    %221 = arith.mulf %220, %219 : vector<1x128xf32>
    %cst_83 = arith.constant 5.000000e-01 : f32
    %222 = vector.broadcast %cst_83 : f32 to vector<1x128xf32>
    %223 = arith.addf %221, %222 : vector<1x128xf32>
    %224 = vector.extract_strided_slice %213 {offsets = [0, 128], sizes = [1, 128], strides = [1, 1]} : vector<1x384xf32> to vector<1x128xf32>
    %225 = vector.extract_strided_slice %212 {offsets = [0, 128], sizes = [1, 128], strides = [1, 1]} : vector<1x384xf32> to vector<1x128xf32>
    %226 = arith.addf %224, %225 : vector<1x128xf32>
    %cst_84 = arith.constant 5.000000e-01 : f32
    %227 = vector.broadcast %cst_84 : f32 to vector<1x128xf32>
    %228 = arith.mulf %227, %226 : vector<1x128xf32>
    %229 = math.tanh %228 : vector<1x128xf32>
    %cst_85 = arith.constant 5.000000e-01 : f32
    %230 = vector.broadcast %cst_85 : f32 to vector<1x128xf32>
    %231 = arith.mulf %230, %229 : vector<1x128xf32>
    %cst_86 = arith.constant 5.000000e-01 : f32
    %232 = vector.broadcast %cst_86 : f32 to vector<1x128xf32>
    %233 = arith.addf %231, %232 : vector<1x128xf32>
    %234 = vector.extract_strided_slice %213 {offsets = [0, 256], sizes = [1, 128], strides = [1, 1]} : vector<1x384xf32> to vector<1x128xf32>
    %235 = vector.extract_strided_slice %212 {offsets = [0, 256], sizes = [1, 128], strides = [1, 1]} : vector<1x384xf32> to vector<1x128xf32>
    %236 = arith.addf %235, %8 : vector<1x128xf32>
    %237 = arith.mulf %223, %236 : vector<1x128xf32>
    %238 = arith.addf %234, %237 : vector<1x128xf32>
    %239 = math.tanh %238 : vector<1x128xf32>
    %240 = arith.subf %177, %239 : vector<1x128xf32>
    %241 = arith.mulf %233, %240 : vector<1x128xf32>
    %242 = arith.addf %239, %241 : vector<1x128xf32>
    %243 = arith.truncf %242 : vector<1x128xf32> to vector<1x128xbf16>
    %c0_87 = arith.constant 0 : index
    %c0_88 = arith.constant 0 : index
    %244 = vector.load %arg6[%c0_87, %c0_88] : memref<128x512xbf16, #tpu.memory_space<vmem>>, vector<128x512xbf16>
    %cst_89 = arith.constant dense<0.000000e+00> : vector<1x512xf32>
    %245 = tpu.matmul %243, %244, %cst_89 {dimension_numbers = #tpu.dot_dimension_numbers<[1], [0], [0], [1], [0, 0, 1, 1], [], []>} : vector<1x128xbf16>, vector<128x512xbf16>, vector<1x512xf32> -> vector<1x512xf32>
    %246 = arith.addf %209, %245 : vector<1x512xf32>
    %247 = arith.addf %246, %9 : vector<1x512xf32>
    %248 = vector.extract_strided_slice %247 {offsets = [0, 0], sizes = [1, 128], strides = [1, 1]} : vector<1x512xf32> to vector<1x128xf32>
    %cst_90 = arith.constant 5.000000e-01 : f32
    %249 = vector.broadcast %cst_90 : f32 to vector<1x128xf32>
    %250 = arith.mulf %249, %248 : vector<1x128xf32>
    %251 = math.tanh %250 : vector<1x128xf32>
    %cst_91 = arith.constant 5.000000e-01 : f32
    %252 = vector.broadcast %cst_91 : f32 to vector<1x128xf32>
    %253 = arith.mulf %252, %251 : vector<1x128xf32>
    %cst_92 = arith.constant 5.000000e-01 : f32
    %254 = vector.broadcast %cst_92 : f32 to vector<1x128xf32>
    %255 = arith.addf %253, %254 : vector<1x128xf32>
    %256 = vector.extract_strided_slice %247 {offsets = [0, 128], sizes = [1, 128], strides = [1, 1]} : vector<1x512xf32> to vector<1x128xf32>
    %cst_93 = arith.constant 5.000000e-01 : f32
    %257 = vector.broadcast %cst_93 : f32 to vector<1x128xf32>
    %258 = arith.mulf %257, %256 : vector<1x128xf32>
    %259 = math.tanh %258 : vector<1x128xf32>
    %cst_94 = arith.constant 5.000000e-01 : f32
    %260 = vector.broadcast %cst_94 : f32 to vector<1x128xf32>
    %261 = arith.mulf %260, %259 : vector<1x128xf32>
    %cst_95 = arith.constant 5.000000e-01 : f32
    %262 = vector.broadcast %cst_95 : f32 to vector<1x128xf32>
    %263 = arith.addf %261, %262 : vector<1x128xf32>
    %264 = vector.extract_strided_slice %247 {offsets = [0, 256], sizes = [1, 128], strides = [1, 1]} : vector<1x512xf32> to vector<1x128xf32>
    %265 = vector.extract_strided_slice %247 {offsets = [0, 384], sizes = [1, 128], strides = [1, 1]} : vector<1x512xf32> to vector<1x128xf32>
    %266 = arith.mulf %255, %265 : vector<1x128xf32>
    %267 = arith.addf %264, %266 : vector<1x128xf32>
    %268 = math.tanh %267 : vector<1x128xf32>
    %269 = arith.subf %206, %268 : vector<1x128xf32>
    %270 = arith.mulf %263, %269 : vector<1x128xf32>
    %271 = arith.addf %268, %270 : vector<1x128xf32>
    %272 = arith.truncf %271 : vector<1x128xf32> to vector<1x128xbf16>
    %c0_96 = arith.constant 0 : index
    %c0_97 = arith.constant 0 : index
    %273 = vector.load %arg7[%c0_96, %c0_97] : memref<128x512xbf16, #tpu.memory_space<vmem>>, vector<128x512xbf16>
    %cst_98 = arith.constant dense<0.000000e+00> : vector<1x512xf32>
    %274 = tpu.matmul %272, %273, %cst_98 {dimension_numbers = #tpu.dot_dimension_numbers<[1], [0], [0], [1], [0, 0, 1, 1], [], []>} : vector<1x128xbf16>, vector<128x512xbf16>, vector<1x512xf32> -> vector<1x512xf32>
    %275 = arith.truncf %242 : vector<1x128xf32> to vector<1x128xbf16>
    %c0_99 = arith.constant 0 : index
    %c0_100 = arith.constant 0 : index
    %276 = vector.load %arg3[%c0_99, %c0_100] : memref<128x384xbf16, #tpu.memory_space<vmem>>, vector<128x384xbf16>
    %cst_101 = arith.constant dense<0.000000e+00> : vector<1x384xf32>
    %277 = tpu.matmul %275, %276, %cst_101 {dimension_numbers = #tpu.dot_dimension_numbers<[1], [0], [0], [1], [0, 0, 1, 1], [], []>} : vector<1x128xbf16>, vector<128x384xbf16>, vector<1x384xf32> -> vector<1x384xf32>
    %278 = vector.extract_strided_slice %7 {offsets = [4, 0], sizes = [1, 384], strides = [1, 1]} : vector<8x384xf32> to vector<1x384xf32>
    %279 = vector.extract_strided_slice %278 {offsets = [0, 0], sizes = [1, 128], strides = [1, 1]} : vector<1x384xf32> to vector<1x128xf32>
    %280 = vector.extract_strided_slice %277 {offsets = [0, 0], sizes = [1, 128], strides = [1, 1]} : vector<1x384xf32> to vector<1x128xf32>
    %281 = arith.addf %279, %280 : vector<1x128xf32>
    %cst_102 = arith.constant 5.000000e-01 : f32
    %282 = vector.broadcast %cst_102 : f32 to vector<1x128xf32>
    %283 = arith.mulf %282, %281 : vector<1x128xf32>
    %284 = math.tanh %283 : vector<1x128xf32>
    %cst_103 = arith.constant 5.000000e-01 : f32
    %285 = vector.broadcast %cst_103 : f32 to vector<1x128xf32>
    %286 = arith.mulf %285, %284 : vector<1x128xf32>
    %cst_104 = arith.constant 5.000000e-01 : f32
    %287 = vector.broadcast %cst_104 : f32 to vector<1x128xf32>
    %288 = arith.addf %286, %287 : vector<1x128xf32>
    %289 = vector.extract_strided_slice %278 {offsets = [0, 128], sizes = [1, 128], strides = [1, 1]} : vector<1x384xf32> to vector<1x128xf32>
    %290 = vector.extract_strided_slice %277 {offsets = [0, 128], sizes = [1, 128], strides = [1, 1]} : vector<1x384xf32> to vector<1x128xf32>
    %291 = arith.addf %289, %290 : vector<1x128xf32>
    %cst_105 = arith.constant 5.000000e-01 : f32
    %292 = vector.broadcast %cst_105 : f32 to vector<1x128xf32>
    %293 = arith.mulf %292, %291 : vector<1x128xf32>
    %294 = math.tanh %293 : vector<1x128xf32>
    %cst_106 = arith.constant 5.000000e-01 : f32
    %295 = vector.broadcast %cst_106 : f32 to vector<1x128xf32>
    %296 = arith.mulf %295, %294 : vector<1x128xf32>
    %cst_107 = arith.constant 5.000000e-01 : f32
    %297 = vector.broadcast %cst_107 : f32 to vector<1x128xf32>
    %298 = arith.addf %296, %297 : vector<1x128xf32>
    %299 = vector.extract_strided_slice %278 {offsets = [0, 256], sizes = [1, 128], strides = [1, 1]} : vector<1x384xf32> to vector<1x128xf32>
    %300 = vector.extract_strided_slice %277 {offsets = [0, 256], sizes = [1, 128], strides = [1, 1]} : vector<1x384xf32> to vector<1x128xf32>
    %301 = arith.addf %300, %8 : vector<1x128xf32>
    %302 = arith.mulf %288, %301 : vector<1x128xf32>
    %303 = arith.addf %299, %302 : vector<1x128xf32>
    %304 = math.tanh %303 : vector<1x128xf32>
    %305 = arith.subf %242, %304 : vector<1x128xf32>
    %306 = arith.mulf %298, %305 : vector<1x128xf32>
    %307 = arith.addf %304, %306 : vector<1x128xf32>
    %308 = arith.truncf %307 : vector<1x128xf32> to vector<1x128xbf16>
    %c0_108 = arith.constant 0 : index
    %c0_109 = arith.constant 0 : index
    %309 = vector.load %arg6[%c0_108, %c0_109] : memref<128x512xbf16, #tpu.memory_space<vmem>>, vector<128x512xbf16>
    %cst_110 = arith.constant dense<0.000000e+00> : vector<1x512xf32>
    %310 = tpu.matmul %308, %309, %cst_110 {dimension_numbers = #tpu.dot_dimension_numbers<[1], [0], [0], [1], [0, 0, 1, 1], [], []>} : vector<1x128xbf16>, vector<128x512xbf16>, vector<1x512xf32> -> vector<1x512xf32>
    %311 = arith.addf %274, %310 : vector<1x512xf32>
    %312 = arith.addf %311, %9 : vector<1x512xf32>
    %313 = vector.extract_strided_slice %312 {offsets = [0, 0], sizes = [1, 128], strides = [1, 1]} : vector<1x512xf32> to vector<1x128xf32>
    %cst_111 = arith.constant 5.000000e-01 : f32
    %314 = vector.broadcast %cst_111 : f32 to vector<1x128xf32>
    %315 = arith.mulf %314, %313 : vector<1x128xf32>
    %316 = math.tanh %315 : vector<1x128xf32>
    %cst_112 = arith.constant 5.000000e-01 : f32
    %317 = vector.broadcast %cst_112 : f32 to vector<1x128xf32>
    %318 = arith.mulf %317, %316 : vector<1x128xf32>
    %cst_113 = arith.constant 5.000000e-01 : f32
    %319 = vector.broadcast %cst_113 : f32 to vector<1x128xf32>
    %320 = arith.addf %318, %319 : vector<1x128xf32>
    %321 = vector.extract_strided_slice %312 {offsets = [0, 128], sizes = [1, 128], strides = [1, 1]} : vector<1x512xf32> to vector<1x128xf32>
    %cst_114 = arith.constant 5.000000e-01 : f32
    %322 = vector.broadcast %cst_114 : f32 to vector<1x128xf32>
    %323 = arith.mulf %322, %321 : vector<1x128xf32>
    %324 = math.tanh %323 : vector<1x128xf32>
    %cst_115 = arith.constant 5.000000e-01 : f32
    %325 = vector.broadcast %cst_115 : f32 to vector<1x128xf32>
    %326 = arith.mulf %325, %324 : vector<1x128xf32>
    %cst_116 = arith.constant 5.000000e-01 : f32
    %327 = vector.broadcast %cst_116 : f32 to vector<1x128xf32>
    %328 = arith.addf %326, %327 : vector<1x128xf32>
    %329 = vector.extract_strided_slice %312 {offsets = [0, 256], sizes = [1, 128], strides = [1, 1]} : vector<1x512xf32> to vector<1x128xf32>
    %330 = vector.extract_strided_slice %312 {offsets = [0, 384], sizes = [1, 128], strides = [1, 1]} : vector<1x512xf32> to vector<1x128xf32>
    %331 = arith.mulf %320, %330 : vector<1x128xf32>
    %332 = arith.addf %329, %331 : vector<1x128xf32>
    %333 = math.tanh %332 : vector<1x128xf32>
    %334 = arith.subf %271, %333 : vector<1x128xf32>
    %335 = arith.mulf %328, %334 : vector<1x128xf32>
    %336 = arith.addf %333, %335 : vector<1x128xf32>
    %337 = arith.truncf %336 : vector<1x128xf32> to vector<1x128xbf16>
    %c0_117 = arith.constant 0 : index
    %c0_118 = arith.constant 0 : index
    %338 = vector.load %arg7[%c0_117, %c0_118] : memref<128x512xbf16, #tpu.memory_space<vmem>>, vector<128x512xbf16>
    %cst_119 = arith.constant dense<0.000000e+00> : vector<1x512xf32>
    %339 = tpu.matmul %337, %338, %cst_119 {dimension_numbers = #tpu.dot_dimension_numbers<[1], [0], [0], [1], [0, 0, 1, 1], [], []>} : vector<1x128xbf16>, vector<128x512xbf16>, vector<1x512xf32> -> vector<1x512xf32>
    %340 = arith.truncf %307 : vector<1x128xf32> to vector<1x128xbf16>
    %c0_120 = arith.constant 0 : index
    %c0_121 = arith.constant 0 : index
    %341 = vector.load %arg3[%c0_120, %c0_121] : memref<128x384xbf16, #tpu.memory_space<vmem>>, vector<128x384xbf16>
    %cst_122 = arith.constant dense<0.000000e+00> : vector<1x384xf32>
    %342 = tpu.matmul %340, %341, %cst_122 {dimension_numbers = #tpu.dot_dimension_numbers<[1], [0], [0], [1], [0, 0, 1, 1], [], []>} : vector<1x128xbf16>, vector<128x384xbf16>, vector<1x384xf32> -> vector<1x384xf32>
    %343 = vector.extract_strided_slice %7 {offsets = [5, 0], sizes = [1, 384], strides = [1, 1]} : vector<8x384xf32> to vector<1x384xf32>
    %344 = vector.extract_strided_slice %343 {offsets = [0, 0], sizes = [1, 128], strides = [1, 1]} : vector<1x384xf32> to vector<1x128xf32>
    %345 = vector.extract_strided_slice %342 {offsets = [0, 0], sizes = [1, 128], strides = [1, 1]} : vector<1x384xf32> to vector<1x128xf32>
    %346 = arith.addf %344, %345 : vector<1x128xf32>
    %cst_123 = arith.constant 5.000000e-01 : f32
    %347 = vector.broadcast %cst_123 : f32 to vector<1x128xf32>
    %348 = arith.mulf %347, %346 : vector<1x128xf32>
    %349 = math.tanh %348 : vector<1x128xf32>
    %cst_124 = arith.constant 5.000000e-01 : f32
    %350 = vector.broadcast %cst_124 : f32 to vector<1x128xf32>
    %351 = arith.mulf %350, %349 : vector<1x128xf32>
    %cst_125 = arith.constant 5.000000e-01 : f32
    %352 = vector.broadcast %cst_125 : f32 to vector<1x128xf32>
    %353 = arith.addf %351, %352 : vector<1x128xf32>
    %354 = vector.extract_strided_slice %343 {offsets = [0, 128], sizes = [1, 128], strides = [1, 1]} : vector<1x384xf32> to vector<1x128xf32>
    %355 = vector.extract_strided_slice %342 {offsets = [0, 128], sizes = [1, 128], strides = [1, 1]} : vector<1x384xf32> to vector<1x128xf32>
    %356 = arith.addf %354, %355 : vector<1x128xf32>
    %cst_126 = arith.constant 5.000000e-01 : f32
    %357 = vector.broadcast %cst_126 : f32 to vector<1x128xf32>
    %358 = arith.mulf %357, %356 : vector<1x128xf32>
    %359 = math.tanh %358 : vector<1x128xf32>
    %cst_127 = arith.constant 5.000000e-01 : f32
    %360 = vector.broadcast %cst_127 : f32 to vector<1x128xf32>
    %361 = arith.mulf %360, %359 : vector<1x128xf32>
    %cst_128 = arith.constant 5.000000e-01 : f32
    %362 = vector.broadcast %cst_128 : f32 to vector<1x128xf32>
    %363 = arith.addf %361, %362 : vector<1x128xf32>
    %364 = vector.extract_strided_slice %343 {offsets = [0, 256], sizes = [1, 128], strides = [1, 1]} : vector<1x384xf32> to vector<1x128xf32>
    %365 = vector.extract_strided_slice %342 {offsets = [0, 256], sizes = [1, 128], strides = [1, 1]} : vector<1x384xf32> to vector<1x128xf32>
    %366 = arith.addf %365, %8 : vector<1x128xf32>
    %367 = arith.mulf %353, %366 : vector<1x128xf32>
    %368 = arith.addf %364, %367 : vector<1x128xf32>
    %369 = math.tanh %368 : vector<1x128xf32>
    %370 = arith.subf %307, %369 : vector<1x128xf32>
    %371 = arith.mulf %363, %370 : vector<1x128xf32>
    %372 = arith.addf %369, %371 : vector<1x128xf32>
    %373 = arith.truncf %372 : vector<1x128xf32> to vector<1x128xbf16>
    %c0_129 = arith.constant 0 : index
    %c0_130 = arith.constant 0 : index
    %374 = vector.load %arg6[%c0_129, %c0_130] : memref<128x512xbf16, #tpu.memory_space<vmem>>, vector<128x512xbf16>
    %cst_131 = arith.constant dense<0.000000e+00> : vector<1x512xf32>
    %375 = tpu.matmul %373, %374, %cst_131 {dimension_numbers = #tpu.dot_dimension_numbers<[1], [0], [0], [1], [0, 0, 1, 1], [], []>} : vector<1x128xbf16>, vector<128x512xbf16>, vector<1x512xf32> -> vector<1x512xf32>
    %376 = arith.addf %339, %375 : vector<1x512xf32>
    %377 = arith.addf %376, %9 : vector<1x512xf32>
    %378 = vector.extract_strided_slice %377 {offsets = [0, 0], sizes = [1, 128], strides = [1, 1]} : vector<1x512xf32> to vector<1x128xf32>
    %cst_132 = arith.constant 5.000000e-01 : f32
    %379 = vector.broadcast %cst_132 : f32 to vector<1x128xf32>
    %380 = arith.mulf %379, %378 : vector<1x128xf32>
    %381 = math.tanh %380 : vector<1x128xf32>
    %cst_133 = arith.constant 5.000000e-01 : f32
    %382 = vector.broadcast %cst_133 : f32 to vector<1x128xf32>
    %383 = arith.mulf %382, %381 : vector<1x128xf32>
    %cst_134 = arith.constant 5.000000e-01 : f32
    %384 = vector.broadcast %cst_134 : f32 to vector<1x128xf32>
    %385 = arith.addf %383, %384 : vector<1x128xf32>
    %386 = vector.extract_strided_slice %377 {offsets = [0, 128], sizes = [1, 128], strides = [1, 1]} : vector<1x512xf32> to vector<1x128xf32>
    %cst_135 = arith.constant 5.000000e-01 : f32
    %387 = vector.broadcast %cst_135 : f32 to vector<1x128xf32>
    %388 = arith.mulf %387, %386 : vector<1x128xf32>
    %389 = math.tanh %388 : vector<1x128xf32>
    %cst_136 = arith.constant 5.000000e-01 : f32
    %390 = vector.broadcast %cst_136 : f32 to vector<1x128xf32>
    %391 = arith.mulf %390, %389 : vector<1x128xf32>
    %cst_137 = arith.constant 5.000000e-01 : f32
    %392 = vector.broadcast %cst_137 : f32 to vector<1x128xf32>
    %393 = arith.addf %391, %392 : vector<1x128xf32>
    %394 = vector.extract_strided_slice %377 {offsets = [0, 256], sizes = [1, 128], strides = [1, 1]} : vector<1x512xf32> to vector<1x128xf32>
    %395 = vector.extract_strided_slice %377 {offsets = [0, 384], sizes = [1, 128], strides = [1, 1]} : vector<1x512xf32> to vector<1x128xf32>
    %396 = arith.mulf %385, %395 : vector<1x128xf32>
    %397 = arith.addf %394, %396 : vector<1x128xf32>
    %398 = math.tanh %397 : vector<1x128xf32>
    %399 = arith.subf %336, %398 : vector<1x128xf32>
    %400 = arith.mulf %393, %399 : vector<1x128xf32>
    %401 = arith.addf %398, %400 : vector<1x128xf32>
    %402 = arith.truncf %401 : vector<1x128xf32> to vector<1x128xbf16>
    %c0_138 = arith.constant 0 : index
    %c0_139 = arith.constant 0 : index
    %403 = vector.load %arg7[%c0_138, %c0_139] : memref<128x512xbf16, #tpu.memory_space<vmem>>, vector<128x512xbf16>
    %cst_140 = arith.constant dense<0.000000e+00> : vector<1x512xf32>
    %404 = tpu.matmul %402, %403, %cst_140 {dimension_numbers = #tpu.dot_dimension_numbers<[1], [0], [0], [1], [0, 0, 1, 1], [], []>} : vector<1x128xbf16>, vector<128x512xbf16>, vector<1x512xf32> -> vector<1x512xf32>
    %405 = arith.truncf %372 : vector<1x128xf32> to vector<1x128xbf16>
    %c0_141 = arith.constant 0 : index
    %c0_142 = arith.constant 0 : index
    %406 = vector.load %arg3[%c0_141, %c0_142] : memref<128x384xbf16, #tpu.memory_space<vmem>>, vector<128x384xbf16>
    %cst_143 = arith.constant dense<0.000000e+00> : vector<1x384xf32>
    %407 = tpu.matmul %405, %406, %cst_143 {dimension_numbers = #tpu.dot_dimension_numbers<[1], [0], [0], [1], [0, 0, 1, 1], [], []>} : vector<1x128xbf16>, vector<128x384xbf16>, vector<1x384xf32> -> vector<1x384xf32>
    %408 = vector.extract_strided_slice %7 {offsets = [6, 0], sizes = [1, 384], strides = [1, 1]} : vector<8x384xf32> to vector<1x384xf32>
    %409 = vector.extract_strided_slice %408 {offsets = [0, 0], sizes = [1, 128], strides = [1, 1]} : vector<1x384xf32> to vector<1x128xf32>
    %410 = vector.extract_strided_slice %407 {offsets = [0, 0], sizes = [1, 128], strides = [1, 1]} : vector<1x384xf32> to vector<1x128xf32>
    %411 = arith.addf %409, %410 : vector<1x128xf32>
    %cst_144 = arith.constant 5.000000e-01 : f32
    %412 = vector.broadcast %cst_144 : f32 to vector<1x128xf32>
    %413 = arith.mulf %412, %411 : vector<1x128xf32>
    %414 = math.tanh %413 : vector<1x128xf32>
    %cst_145 = arith.constant 5.000000e-01 : f32
    %415 = vector.broadcast %cst_145 : f32 to vector<1x128xf32>
    %416 = arith.mulf %415, %414 : vector<1x128xf32>
    %cst_146 = arith.constant 5.000000e-01 : f32
    %417 = vector.broadcast %cst_146 : f32 to vector<1x128xf32>
    %418 = arith.addf %416, %417 : vector<1x128xf32>
    %419 = vector.extract_strided_slice %408 {offsets = [0, 128], sizes = [1, 128], strides = [1, 1]} : vector<1x384xf32> to vector<1x128xf32>
    %420 = vector.extract_strided_slice %407 {offsets = [0, 128], sizes = [1, 128], strides = [1, 1]} : vector<1x384xf32> to vector<1x128xf32>
    %421 = arith.addf %419, %420 : vector<1x128xf32>
    %cst_147 = arith.constant 5.000000e-01 : f32
    %422 = vector.broadcast %cst_147 : f32 to vector<1x128xf32>
    %423 = arith.mulf %422, %421 : vector<1x128xf32>
    %424 = math.tanh %423 : vector<1x128xf32>
    %cst_148 = arith.constant 5.000000e-01 : f32
    %425 = vector.broadcast %cst_148 : f32 to vector<1x128xf32>
    %426 = arith.mulf %425, %424 : vector<1x128xf32>
    %cst_149 = arith.constant 5.000000e-01 : f32
    %427 = vector.broadcast %cst_149 : f32 to vector<1x128xf32>
    %428 = arith.addf %426, %427 : vector<1x128xf32>
    %429 = vector.extract_strided_slice %408 {offsets = [0, 256], sizes = [1, 128], strides = [1, 1]} : vector<1x384xf32> to vector<1x128xf32>
    %430 = vector.extract_strided_slice %407 {offsets = [0, 256], sizes = [1, 128], strides = [1, 1]} : vector<1x384xf32> to vector<1x128xf32>
    %431 = arith.addf %430, %8 : vector<1x128xf32>
    %432 = arith.mulf %418, %431 : vector<1x128xf32>
    %433 = arith.addf %429, %432 : vector<1x128xf32>
    %434 = math.tanh %433 : vector<1x128xf32>
    %435 = arith.subf %372, %434 : vector<1x128xf32>
    %436 = arith.mulf %428, %435 : vector<1x128xf32>
    %437 = arith.addf %434, %436 : vector<1x128xf32>
    %438 = arith.truncf %437 : vector<1x128xf32> to vector<1x128xbf16>
    %c0_150 = arith.constant 0 : index
    %c0_151 = arith.constant 0 : index
    %439 = vector.load %arg6[%c0_150, %c0_151] : memref<128x512xbf16, #tpu.memory_space<vmem>>, vector<128x512xbf16>
    %cst_152 = arith.constant dense<0.000000e+00> : vector<1x512xf32>
    %440 = tpu.matmul %438, %439, %cst_152 {dimension_numbers = #tpu.dot_dimension_numbers<[1], [0], [0], [1], [0, 0, 1, 1], [], []>} : vector<1x128xbf16>, vector<128x512xbf16>, vector<1x512xf32> -> vector<1x512xf32>
    %441 = arith.addf %404, %440 : vector<1x512xf32>
    %442 = arith.addf %441, %9 : vector<1x512xf32>
    %443 = vector.extract_strided_slice %442 {offsets = [0, 0], sizes = [1, 128], strides = [1, 1]} : vector<1x512xf32> to vector<1x128xf32>
    %cst_153 = arith.constant 5.000000e-01 : f32
    %444 = vector.broadcast %cst_153 : f32 to vector<1x128xf32>
    %445 = arith.mulf %444, %443 : vector<1x128xf32>
    %446 = math.tanh %445 : vector<1x128xf32>
    %cst_154 = arith.constant 5.000000e-01 : f32
    %447 = vector.broadcast %cst_154 : f32 to vector<1x128xf32>
    %448 = arith.mulf %447, %446 : vector<1x128xf32>
    %cst_155 = arith.constant 5.000000e-01 : f32
    %449 = vector.broadcast %cst_155 : f32 to vector<1x128xf32>
    %450 = arith.addf %448, %449 : vector<1x128xf32>
    %451 = vector.extract_strided_slice %442 {offsets = [0, 128], sizes = [1, 128], strides = [1, 1]} : vector<1x512xf32> to vector<1x128xf32>
    %cst_156 = arith.constant 5.000000e-01 : f32
    %452 = vector.broadcast %cst_156 : f32 to vector<1x128xf32>
    %453 = arith.mulf %452, %451 : vector<1x128xf32>
    %454 = math.tanh %453 : vector<1x128xf32>
    %cst_157 = arith.constant 5.000000e-01 : f32
    %455 = vector.broadcast %cst_157 : f32 to vector<1x128xf32>
    %456 = arith.mulf %455, %454 : vector<1x128xf32>
    %cst_158 = arith.constant 5.000000e-01 : f32
    %457 = vector.broadcast %cst_158 : f32 to vector<1x128xf32>
    %458 = arith.addf %456, %457 : vector<1x128xf32>
    %459 = vector.extract_strided_slice %442 {offsets = [0, 256], sizes = [1, 128], strides = [1, 1]} : vector<1x512xf32> to vector<1x128xf32>
    %460 = vector.extract_strided_slice %442 {offsets = [0, 384], sizes = [1, 128], strides = [1, 1]} : vector<1x512xf32> to vector<1x128xf32>
    %461 = arith.mulf %450, %460 : vector<1x128xf32>
    %462 = arith.addf %459, %461 : vector<1x128xf32>
    %463 = math.tanh %462 : vector<1x128xf32>
    %464 = arith.subf %401, %463 : vector<1x128xf32>
    %465 = arith.mulf %458, %464 : vector<1x128xf32>
    %466 = arith.addf %463, %465 : vector<1x128xf32>
    %467 = arith.truncf %466 : vector<1x128xf32> to vector<1x128xbf16>
    %c0_159 = arith.constant 0 : index
    %c0_160 = arith.constant 0 : index
    %468 = vector.load %arg7[%c0_159, %c0_160] : memref<128x512xbf16, #tpu.memory_space<vmem>>, vector<128x512xbf16>
    %cst_161 = arith.constant dense<0.000000e+00> : vector<1x512xf32>
    %469 = tpu.matmul %467, %468, %cst_161 {dimension_numbers = #tpu.dot_dimension_numbers<[1], [0], [0], [1], [0, 0, 1, 1], [], []>} : vector<1x128xbf16>, vector<128x512xbf16>, vector<1x512xf32> -> vector<1x512xf32>
    %470 = arith.truncf %437 : vector<1x128xf32> to vector<1x128xbf16>
    %c0_162 = arith.constant 0 : index
    %c0_163 = arith.constant 0 : index
    %471 = vector.load %arg3[%c0_162, %c0_163] : memref<128x384xbf16, #tpu.memory_space<vmem>>, vector<128x384xbf16>
    %cst_164 = arith.constant dense<0.000000e+00> : vector<1x384xf32>
    %472 = tpu.matmul %470, %471, %cst_164 {dimension_numbers = #tpu.dot_dimension_numbers<[1], [0], [0], [1], [0, 0, 1, 1], [], []>} : vector<1x128xbf16>, vector<128x384xbf16>, vector<1x384xf32> -> vector<1x384xf32>
    %473 = vector.extract_strided_slice %7 {offsets = [7, 0], sizes = [1, 384], strides = [1, 1]} : vector<8x384xf32> to vector<1x384xf32>
    %474 = vector.extract_strided_slice %473 {offsets = [0, 0], sizes = [1, 128], strides = [1, 1]} : vector<1x384xf32> to vector<1x128xf32>
    %475 = vector.extract_strided_slice %472 {offsets = [0, 0], sizes = [1, 128], strides = [1, 1]} : vector<1x384xf32> to vector<1x128xf32>
    %476 = arith.addf %474, %475 : vector<1x128xf32>
    %cst_165 = arith.constant 5.000000e-01 : f32
    %477 = vector.broadcast %cst_165 : f32 to vector<1x128xf32>
    %478 = arith.mulf %477, %476 : vector<1x128xf32>
    %479 = math.tanh %478 : vector<1x128xf32>
    %cst_166 = arith.constant 5.000000e-01 : f32
    %480 = vector.broadcast %cst_166 : f32 to vector<1x128xf32>
    %481 = arith.mulf %480, %479 : vector<1x128xf32>
    %cst_167 = arith.constant 5.000000e-01 : f32
    %482 = vector.broadcast %cst_167 : f32 to vector<1x128xf32>
    %483 = arith.addf %481, %482 : vector<1x128xf32>
    %484 = vector.extract_strided_slice %473 {offsets = [0, 128], sizes = [1, 128], strides = [1, 1]} : vector<1x384xf32> to vector<1x128xf32>
    %485 = vector.extract_strided_slice %472 {offsets = [0, 128], sizes = [1, 128], strides = [1, 1]} : vector<1x384xf32> to vector<1x128xf32>
    %486 = arith.addf %484, %485 : vector<1x128xf32>
    %cst_168 = arith.constant 5.000000e-01 : f32
    %487 = vector.broadcast %cst_168 : f32 to vector<1x128xf32>
    %488 = arith.mulf %487, %486 : vector<1x128xf32>
    %489 = math.tanh %488 : vector<1x128xf32>
    %cst_169 = arith.constant 5.000000e-01 : f32
    %490 = vector.broadcast %cst_169 : f32 to vector<1x128xf32>
    %491 = arith.mulf %490, %489 : vector<1x128xf32>
    %cst_170 = arith.constant 5.000000e-01 : f32
    %492 = vector.broadcast %cst_170 : f32 to vector<1x128xf32>
    %493 = arith.addf %491, %492 : vector<1x128xf32>
    %494 = vector.extract_strided_slice %473 {offsets = [0, 256], sizes = [1, 128], strides = [1, 1]} : vector<1x384xf32> to vector<1x128xf32>
    %495 = vector.extract_strided_slice %472 {offsets = [0, 256], sizes = [1, 128], strides = [1, 1]} : vector<1x384xf32> to vector<1x128xf32>
    %496 = arith.addf %495, %8 : vector<1x128xf32>
    %497 = arith.mulf %483, %496 : vector<1x128xf32>
    %498 = arith.addf %494, %497 : vector<1x128xf32>
    %499 = math.tanh %498 : vector<1x128xf32>
    %500 = arith.subf %437, %499 : vector<1x128xf32>
    %501 = arith.mulf %493, %500 : vector<1x128xf32>
    %502 = arith.addf %499, %501 : vector<1x128xf32>
    %503 = arith.truncf %502 : vector<1x128xf32> to vector<1x128xbf16>
    %c0_171 = arith.constant 0 : index
    %c0_172 = arith.constant 0 : index
    %504 = vector.load %arg6[%c0_171, %c0_172] : memref<128x512xbf16, #tpu.memory_space<vmem>>, vector<128x512xbf16>
    %cst_173 = arith.constant dense<0.000000e+00> : vector<1x512xf32>
    %505 = tpu.matmul %503, %504, %cst_173 {dimension_numbers = #tpu.dot_dimension_numbers<[1], [0], [0], [1], [0, 0, 1, 1], [], []>} : vector<1x128xbf16>, vector<128x512xbf16>, vector<1x512xf32> -> vector<1x512xf32>
    %506 = arith.addf %469, %505 : vector<1x512xf32>
    %507 = arith.addf %506, %9 : vector<1x512xf32>
    %508 = vector.extract_strided_slice %507 {offsets = [0, 0], sizes = [1, 128], strides = [1, 1]} : vector<1x512xf32> to vector<1x128xf32>
    %cst_174 = arith.constant 5.000000e-01 : f32
    %509 = vector.broadcast %cst_174 : f32 to vector<1x128xf32>
    %510 = arith.mulf %509, %508 : vector<1x128xf32>
    %511 = math.tanh %510 : vector<1x128xf32>
    %cst_175 = arith.constant 5.000000e-01 : f32
    %512 = vector.broadcast %cst_175 : f32 to vector<1x128xf32>
    %513 = arith.mulf %512, %511 : vector<1x128xf32>
    %cst_176 = arith.constant 5.000000e-01 : f32
    %514 = vector.broadcast %cst_176 : f32 to vector<1x128xf32>
    %515 = arith.addf %513, %514 : vector<1x128xf32>
    %516 = vector.extract_strided_slice %507 {offsets = [0, 128], sizes = [1, 128], strides = [1, 1]} : vector<1x512xf32> to vector<1x128xf32>
    %cst_177 = arith.constant 5.000000e-01 : f32
    %517 = vector.broadcast %cst_177 : f32 to vector<1x128xf32>
    %518 = arith.mulf %517, %516 : vector<1x128xf32>
    %519 = math.tanh %518 : vector<1x128xf32>
    %cst_178 = arith.constant 5.000000e-01 : f32
    %520 = vector.broadcast %cst_178 : f32 to vector<1x128xf32>
    %521 = arith.mulf %520, %519 : vector<1x128xf32>
    %cst_179 = arith.constant 5.000000e-01 : f32
    %522 = vector.broadcast %cst_179 : f32 to vector<1x128xf32>
    %523 = arith.addf %521, %522 : vector<1x128xf32>
    %524 = vector.extract_strided_slice %507 {offsets = [0, 256], sizes = [1, 128], strides = [1, 1]} : vector<1x512xf32> to vector<1x128xf32>
    %525 = vector.extract_strided_slice %507 {offsets = [0, 384], sizes = [1, 128], strides = [1, 1]} : vector<1x512xf32> to vector<1x128xf32>
    %526 = arith.mulf %515, %525 : vector<1x128xf32>
    %527 = arith.addf %524, %526 : vector<1x128xf32>
    %528 = math.tanh %527 : vector<1x128xf32>
    %529 = arith.subf %466, %528 : vector<1x128xf32>
    %530 = arith.mulf %523, %529 : vector<1x128xf32>
    %531 = arith.addf %528, %530 : vector<1x128xf32>
    %532 = tpu.concatenate %76, %141, %206, %271, %336, %401, %466, %531 in 0 : vector<1x128xf32>, vector<1x128xf32>, vector<1x128xf32>, vector<1x128xf32>, vector<1x128xf32>, vector<1x128xf32>, vector<1x128xf32>, vector<1x128xf32> -> vector<8x128xf32>
    %533 = arith.truncf %532 : vector<8x128xf32> to vector<8x128xbf16>
    %c0_180 = arith.constant 0 : index
    %c0_181 = arith.constant 0 : index
    %534 = vector.load %arg9[%c0_180, %c0_181] : memref<128x128xbf16, #tpu.memory_space<vmem>>, vector<128x128xbf16>
    %cst_182 = arith.constant dense<0.000000e+00> : vector<8x128xf32>
    %535 = tpu.matmul %533, %534, %cst_182 {dimension_numbers = #tpu.dot_dimension_numbers<[1], [0], [0], [1], [0, 0, 1, 1], [], []>} : vector<8x128xbf16>, vector<128x128xbf16>, vector<8x128xf32> -> vector<8x128xf32>
    %c0_183 = arith.constant 0 : index
    %c0_184 = arith.constant 0 : index
    %536 = vector.load %arg10[%c0_183, %c0_184] : memref<1x128xf32, #tpu.memory_space<vmem>>, vector<1x128xf32>
    %537 = vector.broadcast %536 : vector<1x128xf32> to vector<8x128xf32>
    %538 = arith.addf %535, %537 : vector<8x128xf32>
    %c0_185 = arith.constant 0 : index
    %c0_186 = arith.constant 0 : index
    %c0_187 = arith.constant 0 : index
    %539 = vector.load %arg11[%c0_185, %c0_186, %c0_187] : memref<1x8x128xf32, #tpu.memory_space<vmem>>, vector<1x8x128xf32>
    %540 = vector.shape_cast %539 : vector<1x8x128xf32> to vector<8x128xf32>
    %541 = vector.shape_cast %538 : vector<8x128xf32> to vector<1x8x128xf32>
    tpu.vector_store %arg11[%c0_185, %c0_186, %c0_187], %541 {strides = array<i32>} : memref<1x8x128xf32, #tpu.memory_space<vmem>>, vector<1x8x128xf32>,
    return
  }
  func.func @transform_0(%arg0: i32) -> (i32, i32, i32) {
    %c0_i32 = arith.constant 0 : i32
    %c0_i32_0 = arith.constant 0 : i32
    %c0_i32_1 = arith.constant 0 : i32
    return %arg0, %c0_i32, %c0_i32_0 : i32, i32, i32
  }
  func.func @transform_1(%arg0: i32) -> (i32, i32) {
    %c0_i32 = arith.constant 0 : i32
    %c0_i32_0 = arith.constant 0 : i32
    %c0_i32_1 = arith.constant 0 : i32
    return %c0_i32, %c0_i32_0 : i32, i32
  }
  func.func @transform_2(%arg0: i32) -> (i32, i32) {
    %c0_i32 = arith.constant 0 : i32
    %c0_i32_0 = arith.constant 0 : i32
    %c0_i32_1 = arith.constant 0 : i32
    return %c0_i32, %c0_i32_0 : i32, i32
  }
  func.func @transform_3(%arg0: i32) -> (i32, i32) {
    %c0_i32 = arith.constant 0 : i32
    %c0_i32_0 = arith.constant 0 : i32
    %c0_i32_1 = arith.constant 0 : i32
    return %c0_i32, %c0_i32_0 : i32, i32
  }
  func.func @transform_4(%arg0: i32) -> (i32, i32) {
    %c0_i32 = arith.constant 0 : i32
    %c0_i32_0 = arith.constant 0 : i32
    %c0_i32_1 = arith.constant 0 : i32
    return %c0_i32, %c0_i32_0 : i32, i32
  }
  func.func @transform_5(%arg0: i32) -> (i32, i32) {
    %c0_i32 = arith.constant 0 : i32
    %c0_i32_0 = arith.constant 0 : i32
    %c0_i32_1 = arith.constant 0 : i32
    return %c0_i32, %c0_i32_0 : i32, i32
  }
  func.func @transform_6(%arg0: i32) -> (i32, i32) {
    %c0_i32 = arith.constant 0 : i32
    %c0_i32_0 = arith.constant 0 : i32
    %c0_i32_1 = arith.constant 0 : i32
    return %c0_i32, %c0_i32_0 : i32, i32
  }
  func.func @transform_7(%arg0: i32) -> (i32, i32) {
    %c0_i32 = arith.constant 0 : i32
    %c0_i32_0 = arith.constant 0 : i32
    %c0_i32_1 = arith.constant 0 : i32
    return %c0_i32, %c0_i32_0 : i32, i32
  }
  func.func @transform_8(%arg0: i32) -> (i32, i32) {
    %c0_i32 = arith.constant 0 : i32
    %c0_i32_0 = arith.constant 0 : i32
    %c0_i32_1 = arith.constant 0 : i32
    return %c0_i32, %c0_i32_0 : i32, i32
  }
  func.func @transform_9(%arg0: i32) -> (i32, i32) {
    %c0_i32 = arith.constant 0 : i32
    %c0_i32_0 = arith.constant 0 : i32
    %c0_i32_1 = arith.constant 0 : i32
    return %c0_i32, %c0_i32_0 : i32, i32
  }
  func.func @transform_10(%arg0: i32) -> (i32, i32, i32) {
    %c0_i32 = arith.constant 0 : i32
    %c0_i32_0 = arith.constant 0 : i32
    %c0_i32_1 = arith.constant 0 : i32
    return %arg0, %c0_i32, %c0_i32_0 : i32, i32, i32
  }
}

</mosaic_0001>

<bundles_post_ra>
// kernel: baseline_gru_forward.1
= control target key start
LH: loop header
LB: loop body
LE: loop exit
PB: predicated region body
PF: predicated region fallthrough
CT: control target
= control target key end

     0   :  { %15 = vsyncpa [#allocation3], 0  ;;  %s6444_s0 = inlined_call_operand.hbm [shape: f32[1,8,208], index: 0, kind: input, shape index: {}]   ;;  %s6445_s1 = inlined_call_operand.hbm [shape: bf16[208,384], index: 1, kind: input, shape index: {}]   ;;  %s6446_s2 = inlined_call_operand.hbm [shape: bf16[128,384], index: 2, kind: input, shape index: {}]   ;;  %s6447_s3 = inlined_call_operand.vmem [shape: f32[1,384], index: 3, kind: input, shape index: {}]   ;;  %s6448_s4 = inlined_call_operand.vmem [shape: f32[1,128], index: 4, kind: input, shape index: {}]   ;;  %s6449_s5 = inlined_call_operand.hbm [shape: bf16[128,512], index: 5, kind: input, shape index: {}]   ;;  %s6450_s6 = inlined_call_operand.hbm [shape: bf16[128,512], index: 6, kind: input, shape index: {}]   ;;  %s6451_s7 = inlined_call_operand.vmem [shape: f32[1,512], index: 7, kind: input, shape index: {}]   ;;  %s6452_s8 = inlined_call_operand.hbm [shape: bf16[128,128], index: 8, kind: input, shape index: {}]   ;;  %s6453_s9 = inlined_call_operand.vmem [shape: f32[1,128], index: 9, kind: input, shape index: {}]   ;;  %s6454_s10 = inlined_call_operand.hbm [shape: f32[1,8,128], index: 10, kind: output, shape index: {}]  }
   0x1   :  { %16 = vsyncpa [#allocation6], 0 }
   0x2   :  { %17 = vsyncpa [#allocation9], 0 }
   0x3   :  { %18 = vsyncpa [#allocation12], 0 }
   0x4   :  { %19 = vsyncpa [#allocation4], 0  ;;  %s4645_s13 = smov [#allocation5]   ;;  %s4481_s17 = scalar_lea.hbm %s6445_s1, 4992 }
   0x5   :  { %s35_s14 = sshll.u32 %s4645_s13, 4  ;;  %p4482_p0 = scmp.ne.s32.totalorder %s6445_s1, %s4481_s17  ;;  %s36_s14 = int_to_ptr.vmem [resolvable:$true] %s35_s14 }
   0x6   :  { %p4485_p1 = scmp.lt.u32.totalorder %s4481_s17, %s6445_s1 }
   0x8   :  { %p4487_p2 = pnand %p4485_p1, %p4482_p0 }
   0xa   :  { %4490 = shalt.err (!%p4487_p2)
}
   0xb   :  { %s4491_s22 = scalar_lea.vmem %s36_s14, 4992  ;;  %p4496_p4 = scmp.lt.s32.totalorder %s36_s14, %s36_s14 }
   0xc   :  { %p4492_p3 = scmp.ne.s32.totalorder %s36_s14, %s4491_s22  ;;  %p4497_p5 = scmp.lt.s32.totalorder %s4491_s22, %s4491_s22 }
   0xe   :  { %p4498_p6 = por %p4497_p5, %p4496_p4 }
  0x10   :  { %p4499_p7 = pnand %p4498_p6, %p4492_p3 }
  0x12   :  { %4502 = shalt.err (!%p4499_p7)
}
  0x13   :  { %s4646_s23 = smov 192   ;;  %s4647_s24 = smov 12  }
  0x14   :  { %41 = dma.hbm_to_vmem [thread:$0]  %s6445_s1, 4992, %s36_s14, [#allocation6], %s4646_s23, %s4646_s23, %s4647_s24  }
  0x15   :  { %s4648_s27 = smov [#allocation8]   ;;  %s4503_s11 = scalar_lea.hbm %s6449_s5, 4096 }
  0x16   :  { %s63_s28 = sshll.u32 %s4648_s27, 4  ;;  %p4504_p8 = scmp.ne.s32.totalorder %s6449_s5, %s4503_s11  ;;  %s64_s28 = int_to_ptr.vmem [resolvable:$true] %s63_s28 }
  0x17   :  { %p4507_p9 = scmp.lt.u32.totalorder %s4503_s11, %s6449_s5 }
  0x19   :  { %p4509_p10 = pnand %p4507_p9, %p4504_p8 }
  0x1b   :  { %4512 = shalt.err (!%p4509_p10)
}
  0x1c   :  { %s4513_s17 = scalar_lea.vmem %s64_s28, 4096  ;;  %p4518_p12 = scmp.lt.s32.totalorder %s64_s28, %s64_s28 }
  0x1d   :  { %p4514_p11 = scmp.ne.s32.totalorder %s64_s28, %s4513_s17  ;;  %p4519_p13 = scmp.lt.s32.totalorder %s4513_s17, %s4513_s17 }
  0x1f   :  { %p4520_p0 = por %p4519_p13, %p4518_p12 }
  0x21   :  { %p4521_p1 = pnand %p4520_p0, %p4514_p11 }
  0x23   :  { %4524 = shalt.err (!%p4521_p1)
}
  0x24   :  { %s4649_s1 = smov 256   ;;  %s4650_s14 = smov 16  }
  0x25   :  { %69 = dma.hbm_to_vmem [thread:$0]  %s6449_s5, 4096, %s64_s28, [#allocation9], %s4649_s1, %s4649_s1, %s4650_s14  }
  0x26   :  { %s4651_s20 = smov [#allocation2]   ;;  %s4652_s22 = smov [#allocation7]  }
  0x27   :  { %s26_s21 = sshll.u32 %s4651_s20, 4  ;;  %s47_s25 = sshll.u32 %s4652_s22, 4  ;;  %s27_s21 = int_to_ptr.vmem [resolvable:$true] %s26_s21  ;;  %s4746_s25 = int_to_ptr.vmem [resolvable:$true] %s47_s25 }
  0x28   :  { %s4525_s29 = scalar_lea.hbm %s6444_s0, 256 }
  0x29   :  { %p4526_p2 = scmp.ne.s32.totalorder %s6444_s0, %s4525_s29  ;;  %p4529_p3 = scmp.lt.u32.totalorder %s4525_s29, %s6444_s0 }
  0x2b   :  { %p4531_p4 = pnand %p4529_p3, %p4526_p2 }
  0x2d   :  { %4534 = shalt.err (!%p4531_p4)
}
  0x2e   :  { %s4535_s5 = scalar_lea.vmem %s27_s21, 256  ;;  %p4540_p6 = scmp.lt.s32.totalorder %s27_s21, %s27_s21 }
  0x2f   :  { %p4536_p5 = scmp.ne.s32.totalorder %s27_s21, %s4535_s5  ;;  %p4541_p7 = scmp.lt.s32.totalorder %s4535_s5, %s4535_s5 }
  0x31   :  { %p4542_p8 = por %p4541_p7, %p4540_p6 }
  0x33   :  { %p4543_p9 = pnand %p4542_p8, %p4536_p5 }
  0x35   :  { %4546 = shalt.err (!%p4543_p9)
}
  0x36   :  { %29 = dma.hbm_to_vmem [thread:$0]  %s6444_s0, 256, %s27_s21, [#allocation3]  }
  0x37   :  { %s4547_s18 = scalar_lea.hbm %s6446_s2, 3072 }
  0x38   :  { %p4548_p10 = scmp.ne.s32.totalorder %s6446_s2, %s4547_s18  ;;  %p4551_p11 = scmp.lt.u32.totalorder %s4547_s18, %s6446_s2 }
  0x3a   :  { %p4553_p12 = pnand %p4551_p11, %p4548_p10 }
  0x3c   :  { %4556 = shalt.err (!%p4553_p12)
}
  0x3d   :  { %s4557_s27 = scalar_lea.vmem %s4746_s25, 3072  ;;  %p4562_p0 = scmp.lt.s32.totalorder %s4746_s25, %s4746_s25 }
  0x3e   :  { %p4558_p13 = scmp.ne.s32.totalorder %s4746_s25, %s4557_s27  ;;  %p4563_p1 = scmp.lt.s32.totalorder %s4557_s27, %s4557_s27 }
  0x40   :  { %p4564_p2 = por %p4563_p1, %p4562_p0 }
  0x42   :  { %p4565_p3 = pnand %p4564_p2, %p4558_p13 }
  0x44   :  { %4568 = shalt.err (!%p4565_p3)
}
  0x45   :  { %53 = dma.hbm_to_vmem [thread:$0]  %s6446_s2, 3072, %s4746_s25, [#allocation6], %s4646_s23, %s4646_s23, %s4647_s24  }
  0x46   :  { %s4653_s29 = smov [#allocation10]   ;;  %s4654_s11 = smov [#allocation11]  }
  0x47   :  { %s75_s30 = sshll.u32 %s4653_s29, 4  ;;  %s89_s12 = sshll.u32 %s4654_s11, 4  ;;  %s76_s30 = int_to_ptr.vmem [resolvable:$true] %s75_s30  ;;  %s4780_s12 = int_to_ptr.vmem [resolvable:$true] %s89_s12 }
  0x48   :  { %s4569_s28 = scalar_lea.hbm %s6450_s6, 4096 }
  0x49   :  { %p4570_p4 = scmp.ne.s32.totalorder %s6450_s6, %s4569_s28  ;;  %p4573_p5 = scmp.lt.u32.totalorder %s4569_s28, %s6450_s6 }
  0x4b   :  { %p4575_p6 = pnand %p4573_p5, %p4570_p4 }
  0x4d   :  { %4578 = shalt.err (!%p4575_p6)
}
  0x4e   :  { %s4579_s2 = scalar_lea.vmem %s76_s30, 4096  ;;  %p4584_p8 = scmp.lt.s32.totalorder %s76_s30, %s76_s30 }
  0x4f   :  { %p4580_p7 = scmp.ne.s32.totalorder %s76_s30, %s4579_s2  ;;  %p4585_p9 = scmp.lt.s32.totalorder %s4579_s2, %s4579_s2 }
  0x51   :  { %p4586_p10 = por %p4585_p9, %p4584_p8 }
  0x53   :  { %p4587_p11 = pnand %p4586_p10, %p4580_p7 }
  0x55   :  { %4590 = shalt.err (!%p4587_p11)
}
  0x56   :  { %81 = dma.hbm_to_vmem [thread:$0]  %s6450_s6, 4096, %s76_s30, [#allocation9], %s4649_s1, %s4649_s1, %s4650_s14  }
  0x57   :  { %s4591_s20 = scalar_lea.hbm %s6452_s8, 1024 }
  0x58   :  { %p4592_p12 = scmp.ne.s32.totalorder %s6452_s8, %s4591_s20  ;;  %p4595_p13 = scmp.lt.u32.totalorder %s4591_s20, %s6452_s8 }
  0x5a   :  { %p4597_p0 = pnand %p4595_p13, %p4592_p12 }
  0x5c   :  { %4600 = shalt.err (!%p4597_p0)
}
  0x5d   :  { %s4601_s21 = scalar_lea.vmem %s4780_s12, 1024  ;;  %p4606_p2 = scmp.lt.s32.totalorder %s4780_s12, %s4780_s12 }
  0x5e   :  { %p4602_p1 = scmp.ne.s32.totalorder %s4780_s12, %s4601_s21  ;;  %p4607_p3 = scmp.lt.s32.totalorder %s4601_s21, %s4601_s21 }
  0x60   :  { %p4608_p4 = por %p4607_p3, %p4606_p2 }
  0x62   :  { %p4609_p5 = pnand %p4608_p4, %p4602_p1 }
  0x64   :  { %4612 = shalt.err (!%p4609_p5)
}
  0x65   :  { %s4655_s6 = smov 64   ;;  %s4656_s1 = smov 4  }
  0x66   :  { %95 = dma.hbm_to_vmem [thread:$0]  %s6452_s8, 1024, %s4780_s12, [#allocation12], %s4655_s6, %s4655_s6, %s4656_s1  }
  0x67   :  { %4635 = dma.done.wait [#allocation3], 256  }
  0x68   :  { %4636 = vsyncadd [#allocation3], 4294967040 }
  0x69   :  { %4637 = dma.done.wait [#allocation6], 8064  }
  0x6a   :  { %4638 = vsyncadd [#allocation6], 4294959232 }
  0x6b   :  { %4639 = dma.done.wait [#allocation9], 8192  }
  0x6c   :  { %4640 = vsyncadd [#allocation9], 4294959104 }
  0x6d   :  { %4641 = dma.done.wait [#allocation12], 1024  }
  0x6e   :  { %4642 = vsyncadd [#allocation12], 4294966272  ;;  %v6457_v0 = vmov 0   ;;  %v4019_v1 = vld [vmem:[#allocation5 + $0x4] ss:$12 sps:$4 sm:$0xff]   ;;  %v118_v22 = vld [vmem:[#allocation2 + $0x8] sm:$0xff] }
  0x6f   :  { %443 = vmatprep.subr.bf16.mxu1 %v6457_v0  ;;  %v4021_v2 = vld [vmem:[#allocation5] ss:$12 sps:$4 sm:$0xff]   ;;  %402 = vmatprep.subr.bf16.mxu0 %v4019_v1  ;;  %v4022_v3 = vld [vmem:[#allocation5 + $0x1c] ss:$12 sps:$4 sm:$0xff]   ;;  %v4024_v4 = vld [vmem:[#allocation5 + $0x18] ss:$12 sps:$4 sm:$0xff]   ;;  %v120_v25 = vpack.c.bf16 %v118_v22, %v118_v22 }
  0x70   :  { %403 = vmatpush1.bf16.msra.mxu0 %v4021_v2  ;;  %v4025_v5 = vld [vmem:[#allocation5 + $0x34] ss:$12 sps:$4 sm:$0xff]   ;;  %v4027_v7 = vld [vmem:[#allocation5 + $0x30] ss:$12 sps:$4 sm:$0xff]   ;;  %v4028_v8 = vld [vmem:[#allocation5 + $0x4c] ss:$12 sps:$4 sm:$0xff]  }
  0x71   :  { %404 = vmatprep.subr.bf16.mxu0 %v4022_v3  ;;  %v4031_v6 = vld [vmem:[#allocation5 + $0x8] ss:$12 sps:$4 sm:$0xff]   ;;  %v4035_v9 = vld [vmem:[#allocation5 + $0x20] ss:$12 sps:$4 sm:$0xff]   ;;  %v4032_v11 = vld [vmem:[#allocation5 + $0x64] ss:$12 sps:$4 sm:$0xff]  }
  0x72   :  { %444 = vmatpush1.bf16.msra.mxu1 %v4031_v6  ;;  %v4030_v10 = vld [vmem:[#allocation5 + $0x48] ss:$12 sps:$4 sm:$0xff]   ;;  %v4039_v12 = vld [vmem:[#allocation5 + $0x38] ss:$12 sps:$4 sm:$0xff]   ;;  %v4034_v13 = vld [vmem:[#allocation5 + $0x60] ss:$12 sps:$4 sm:$0xff]  }
  0x73   :  { %445 = vmatprep.subr.bf16.mxu1 %v6457_v0  ;;  %v4036_v14 = vld [vmem:[#allocation5 + $0x7c] ss:$12 sps:$4 sm:$0xff]   ;;  %v4038_v16 = vld [vmem:[#allocation5 + $0x78] ss:$12 sps:$4 sm:$0xff]   ;;  %v4040_v17 = vld [vmem:[#allocation5 + $0x94] ss:$12 sps:$4 sm:$0xff]  }
  0x74   :  { %405 = vmatpush1.bf16.msra.mxu0 %v4024_v4  ;;  %v4043_v15 = vld [vmem:[#allocation5 + $0x50] ss:$12 sps:$4 sm:$0xff]   ;;  %v4047_v18 = vld [vmem:[#allocation5 + $0x68] ss:$12 sps:$4 sm:$0xff]   ;;  %v4044_v20 = vld [vmem:[#allocation5 + $0xac] ss:$12 sps:$4 sm:$0xff]  }
  0x75   :  { %406 = vmatprep.subr.bf16.mxu0 %v4025_v5  ;;  %v4042_v19 = vld [vmem:[#allocation5 + $0x90] ss:$12 sps:$4 sm:$0xff]   ;;  %v4051_v21 = vld [vmem:[#allocation5 + $0x80] ss:$12 sps:$4 sm:$0xff]   ;;  %vm398_vm0 = vcmask 654336   ;;  %v6455_v51 = vmov 0.0  }
  0x76   :  { %446 = vmatpush1.bf16.msra.mxu1 %v4035_v9  ;;  %v4046_v23 = vld [vmem:[#allocation5 + $0xa8] ss:$12 sps:$4 sm:$0xff]   ;;  %v4048_v24 = vld [vmem:[#allocation5 + $0xc4] ss:$12 sps:$4 sm:$0xff]   ;;  %3643 = vmatprep.mubr.msk.bf16.mxu0 %vm398_vm0, %v120_v25  ;;  %v4050_v27 = vld [vmem:[#allocation5 + $0xc0] ss:$12 sps:$4 sm:$0xff]  }
  0x77   :  { %447 = vmatprep.subr.bf16.mxu1 %v6457_v0  ;;  %v4055_v26 = vld [vmem:[#allocation5 + $0x98] ss:$12 sps:$4 sm:$0xff]   ;;  %3644 = vmatprep.mubr.msk.bf16.mxu1 %vm398_vm0, %v120_v25  ;;  %v4052_v28 = vld [vmem:[#allocation5 + $0xdc] ss:$12 sps:$4 sm:$0xff]   ;;  %v4056_v31 = vld [vmem:[#allocation5 + $0xf4] ss:$12 sps:$4 sm:$0xff]  }
  0x78   :  { %407 = vmatpush1.bf16.msra.mxu0 %v4027_v7  ;;  %v4059_v29 = vld [vmem:[#allocation5 + $0xb0] ss:$12 sps:$4 sm:$0xff]   ;;  %v4054_v30 = vld [vmem:[#allocation5 + $0xd8] ss:$12 sps:$4 sm:$0xff]   ;;  %v4063_v32 = vld [vmem:[#allocation5 + $0xc8] ss:$12 sps:$4 sm:$0xff]  }
  0x79   :  { %408 = vmatprep.subr.bf16.mxu0 %v4028_v8  ;;  %v4058_v33 = vld [vmem:[#allocation5 + $0xf0] ss:$12 sps:$4 sm:$0xff]   ;;  %v4060_v34 = vld [vmem:[#allocation5 + $0x10c] ss:$12 sps:$4 sm:$0xff]   ;;  %v4062_v36 = vld [vmem:[#allocation5 + $0x108] ss:$12 sps:$4 sm:$0xff]  }
  0x7a   :  { %448 = vmatpush1.bf16.msra.mxu1 %v4039_v12  ;;  %v4067_v35 = vld [vmem:[#allocation5 + $0xe0] ss:$12 sps:$4 sm:$0xff]   ;;  %v4064_v37 = vld [vmem:[#allocation5 + $0x124] ss:$12 sps:$4 sm:$0xff]   ;;  %v4825_v41 = vld [vmem:[#allocation7 + $0x4] ss:$12 sps:$4 sm:$0xff]  }
  0x7b   :  { %449 = vmatprep.subr.bf16.mxu1 %v6457_v0  ;;  %v4071_v38 = vld [vmem:[#allocation5 + $0xf8] ss:$12 sps:$4 sm:$0xff]   ;;  %v4066_v39 = vld [vmem:[#allocation5 + $0x120] ss:$12 sps:$4 sm:$0xff]   ;;  %v117_v40 = vld [vmem:[#allocation2] sm:$0xff]  ;;  %vm4659_vm1 = vmmov 0  }
  0x7c   :  { %409 = vmatpush1.bf16.msra.mxu0 %v4030_v10  ;;  %v4075_v42 = vld [vmem:[#allocation5 + $0x110] ss:$12 sps:$4 sm:$0xff]   ;;  %v4827_v43 = vld [vmem:[#allocation7] ss:$12 sps:$4 sm:$0xff]   ;;  %v119_v44 = vpack.c.bf16 %v117_v40, %v117_v40  ;;  %v4830_v45 = vld [vmem:[#allocation7 + $0x1c] ss:$12 sps:$4 sm:$0xff]  }
  0x7d   :  { %410 = vmatprep.subr.bf16.mxu0 %v4032_v11  ;;  %v4079_v46 = vld [vmem:[#allocation5 + $0x128] ss:$12 sps:$4 sm:$0xff]   ;;  %v4833_v47 = vld [vmem:[#allocation7 + $0x18] ss:$12 sps:$4 sm:$0xff]   ;;  %v4836_v48 = vld [vmem:[#allocation7 + $0x34] ss:$12 sps:$4 sm:$0xff]  }
  0x7e   :  { %450 = vmatpush1.bf16.msra.mxu1 %v4043_v15  ;;  %v4838_v49 = vld [vmem:[#allocation7 + $0x8] ss:$12 sps:$4 sm:$0xff]   ;;  %v4843_v50 = vld [vmem:[#allocation7 + $0x30] ss:$12 sps:$4 sm:$0xff]   ;;  %v4846_v52 = vld [vmem:[#allocation7 + $0x4c] ss:$12 sps:$4 sm:$0xff]  }
  0x7f   :  { %451 = vmatprep.subr.bf16.mxu1 %v6457_v0  ;;  %v4848_v53 = vld [vmem:[#allocation7 + $0x20] ss:$12 sps:$4 sm:$0xff]   ;;  %v4853_v54 = vld [vmem:[#allocation7 + $0x48] ss:$12 sps:$4 sm:$0xff]   ;;  %v4858_v55 = vld [vmem:[#allocation7 + $0x64] ss:$12 sps:$4 sm:$0xff]  }
  0x80   :  { %411 = vmatpush1.bf16.msra.mxu0 %v4034_v13  ;;  %v4860_v56 = vld [vmem:[#allocation7 + $0x38] ss:$12 sps:$4 sm:$0xff]   ;;  %v4865_v57 = vld [vmem:[#allocation7 + $0x60] ss:$12 sps:$4 sm:$0xff]   ;;  %v4868_v58 = vld [vmem:[#allocation7 + $0x7c] ss:$12 sps:$4 sm:$0xff]  }
  0x81   :  { %412 = vmatprep.subr.bf16.mxu0 %v4036_v14  ;;  %v4870_v59 = vld [vmem:[#allocation7 + $0x50] ss:$12 sps:$4 sm:$0xff]   ;;  %v4875_v60 = vld [vmem:[#allocation7 + $0x78] ss:$12 sps:$4 sm:$0xff]   ;;  %v4878_v61 = vld [vmem:[#allocation7 + $0x94] ss:$12 sps:$4 sm:$0xff]  }
  0x82   :  { %452 = vmatpush1.bf16.msra.mxu1 %v4047_v18  ;;  %v4880_v62 = vld [vmem:[#allocation7 + $0x68] ss:$12 sps:$4 sm:$0xff]   ;;  %v4885_v63 = vld [vmem:[#allocation7 + $0x90] ss:$12 sps:$4 sm:$0xff]   ;;  %v4888_v1 = vld [vmem:[#allocation7 + $0xac] ss:$12 sps:$4 sm:$0xff]  }
  0x83   :  { %453 = vmatprep.subr.bf16.mxu1 %v6457_v0  ;;  %v4893_v2 = vld [vmem:[#allocation7 + $0x80] ss:$12 sps:$4 sm:$0xff]   ;;  %v4897_v3 = vld [vmem:[#allocation7 + $0xa8] ss:$12 sps:$4 sm:$0xff]   ;;  %v4901_v4 = vld [vmem:[#allocation7 + $0x98] ss:$12 sps:$4 sm:$0xff]  }
  0x84   :  { %413 = vmatpush1.bf16.msra.mxu0 %v4038_v16  ;;  %v4906_v5 = vld [vmem:[#allocation7 + $0xb0] ss:$12 sps:$4 sm:$0xff]   ;;  %v4914_v6 = vld [vmem:[#allocation8 + $0x4] ss:$16 sps:$4 sm:$0xff]   ;;  %v4920_v9 = vld [vmem:[#allocation8 + $0x8] ss:$16 sps:$4 sm:$0xff]  }
  0x85   :  { %414 = vmatprep.subr.bf16.mxu0 %v4040_v17  ;;  %v4916_v7 = vld [vmem:[#allocation8 + $0xc] ss:$16 sps:$4 sm:$0xff]   ;;  %v4918_v8 = vld [vmem:[#allocation8] ss:$16 sps:$4 sm:$0xff]   ;;  %6701 = vst [vmem:[#allocation21_spill] sm:$0xff] %v4920_v9  ;;  %vm3459_vm2 = vcmask 1040384  }
  0x86   :  { %454 = vmatpush1.bf16.msra.mxu1 %v4051_v21  ;;  %6699 = vst [vmem:[#allocation19_spill] sm:$0xff] %v4916_v7  ;;  %6700 = vst [vmem:[#allocation20_spill] sm:$0xff] %v4918_v8  ;;  %v4926_v10 = vld [vmem:[#allocation8 + $0x24] ss:$16 sps:$4 sm:$0xff]   ;;  %v4928_v11 = vld [vmem:[#allocation8 + $0x2c] ss:$16 sps:$4 sm:$0xff]  }
  0x87   :  { %455 = vmatprep.subr.bf16.mxu1 %v6457_v0  ;;  %6702 = vst [vmem:[#allocation22_spill] sm:$0xff] %v4926_v10  ;;  %6703 = vst [vmem:[#allocation23_spill] sm:$0xff] %v4928_v11  ;;  %v4930_v12 = vld [vmem:[#allocation8 + $0x20] ss:$16 sps:$4 sm:$0xff]   ;;  %v4932_v13 = vld [vmem:[#allocation8 + $0x28] ss:$16 sps:$4 sm:$0xff]  }
  0x88   :  { %415 = vmatpush1.bf16.msra.mxu0 %v4042_v19  ;;  %6704 = vst [vmem:[#allocation24_spill] sm:$0xff] %v4930_v12  ;;  %6705 = vst [vmem:[#allocation25_spill] sm:$0xff] %v4932_v13  ;;  %v4938_v14 = vld [vmem:[#allocation8 + $0x44] ss:$16 sps:$4 sm:$0xff]   ;;  %v4940_v15 = vld [vmem:[#allocation8 + $0x4c] ss:$16 sps:$4 sm:$0xff]  }
  0x89   :  { %416 = vmatprep.subr.bf16.mxu0 %v4044_v20  ;;  %6706 = vst [vmem:[#allocation26_spill] sm:$0xff] %v4938_v14  ;;  %6707 = vst [vmem:[#allocation27_spill] sm:$0xff] %v4940_v15  ;;  %v4942_v16 = vld [vmem:[#allocation8 + $0x40] ss:$16 sps:$4 sm:$0xff]   ;;  %v4944_v17 = vld [vmem:[#allocation8 + $0x48] ss:$16 sps:$4 sm:$0xff]  }
  0x8a   :  { %456 = vmatpush1.bf16.msra.mxu1 %v4055_v26  ;;  %6708 = vst [vmem:[#allocation28_spill] sm:$0xff] %v4942_v16  ;;  %6709 = vst [vmem:[#allocation29_spill] sm:$0xff] %v4944_v17  ;;  %v4950_v18 = vld [vmem:[#allocation8 + $0x64] ss:$16 sps:$4 sm:$0xff]   ;;  %v4952_v19 = vld [vmem:[#allocation8 + $0x6c] ss:$16 sps:$4 sm:$0xff]  }
  0x8b   :  { %457 = vmatprep.subr.bf16.mxu1 %v6457_v0  ;;  %6710 = vst [vmem:[#allocation30_spill] sm:$0xff] %v4950_v18  ;;  %6711 = vst [vmem:[#allocation31_spill] sm:$0xff] %v4952_v19  ;;  %v4954_v20 = vld [vmem:[#allocation8 + $0x60] ss:$16 sps:$4 sm:$0xff]   ;;  %v4956_v21 = vld [vmem:[#allocation8 + $0x68] ss:$16 sps:$4 sm:$0xff]  }
  0x8c   :  { %417 = vmatpush1.bf16.msra.mxu0 %v4046_v23  ;;  %6712 = vst [vmem:[#allocation32_spill] sm:$0xff] %v4954_v20  ;;  %6713 = vst [vmem:[#allocation33_spill] sm:$0xff] %v4956_v21  ;;  %v4962_v22 = vld [vmem:[#allocation8 + $0x84] ss:$16 sps:$4 sm:$0xff]   ;;  %v4964_v23 = vld [vmem:[#allocation8 + $0x8c] ss:$16 sps:$4 sm:$0xff]  }
  0x8d   :  { %418 = vmatprep.subr.bf16.mxu0 %v4048_v24  ;;  %6714 = vst [vmem:[#allocation34_spill] sm:$0xff] %v4962_v22  ;;  %6715 = vst [vmem:[#allocation35_spill] sm:$0xff] %v4964_v23  ;;  %v4966_v24 = vld [vmem:[#allocation8 + $0x80] ss:$16 sps:$4 sm:$0xff]   ;;  %v4968_v25 = vld [vmem:[#allocation8 + $0x88] ss:$16 sps:$4 sm:$0xff]  }
  0x8e   :  { %458 = vmatpush1.bf16.msra.mxu1 %v4059_v29  ;;  %6716 = vst [vmem:[#allocation36_spill] sm:$0xff] %v4966_v24  ;;  %6717 = vst [vmem:[#allocation37_spill] sm:$0xff] %v4968_v25  ;;  %v4970_v26 = vld [vmem:[#allocation8 + $0xa4] ss:$16 sps:$4 sm:$0xff]   ;;  %v4980_v29 = vld [vmem:[#allocation8 + $0xa8] ss:$16 sps:$4 sm:$0xff]  }
  0x8f   :  { %459 = vmatprep.subr.bf16.mxu1 %v6457_v0  ;;  %6718 = vst [vmem:[#allocation38_spill] sm:$0xff] %v4970_v26  ;;  %6721 = vst [vmem:[#allocation41_spill] sm:$0xff] %v4980_v29  ;;  %vm3461_vm3 = vcmask 1041408   ;;  %vm3463_vm4 = vcmask 1042432   ;;  %vm3465_vm5 = vcmask 1043456   ;;  %vm3467_vm6 = vcmask 1044480  }
  0x90   :  { %419 = vmatpush1.bf16.msra.mxu0 %v4050_v27  ;;  %v4972_v27 = vld [vmem:[#allocation8 + $0xac] ss:$16 sps:$4 sm:$0xff]   ;;  %vm3469_vm7 = vcmask 1045504   ;;  %vm3471_vm8 = vcmask 1046528   ;;  %s4660_s17 = smov [#allocation13]  }
  0x91   :  { %420 = vmatprep.subr.bf16.mxu0 %v4052_v28  ;;  %6719 = vst [vmem:[#allocation39_spill] sm:$0xff] %v4972_v27  ;;  %v4978_v28 = vld [vmem:[#allocation8 + $0xa0] ss:$16 sps:$4 sm:$0xff]   ;;  %s3592_s18 = sshll.u32 %s4660_s17, 4  ;;  %s3593_s18 = int_to_ptr.vmem [resolvable:$true] %s3592_s18 }
  0x92   :  { %460 = vmatpush1.bf16.msra.mxu1 %v4063_v32  ;;  %6720 = vst [vmem:[#allocation40_spill] sm:$0xff] %v4978_v28  ;;  %v4990_v32 = vld [vmem:[#allocation8 + $0xc0] ss:$16 sps:$4 sm:$0xff]   ;;  %s4613_s2 = scalar_lea.vmem %s3593_s18, 128  ;;  %p4618_p7 = scmp.lt.s32.totalorder %s3593_s18, %s3593_s18 }
  0x93   :  { %461 = vmatprep.subr.bf16.mxu1 %v6457_v0  ;;  %6724 = vst [vmem:[#allocation44_spill] sm:$0xff] %v4990_v32  ;;  %p4614_p6 = scmp.ne.s32.totalorder %s3593_s18, %s4613_s2  ;;  %p4619_p8 = scmp.lt.s32.totalorder %s4613_s2, %s4613_s2 }
  0x94   :  { %421 = vmatpush1.bf16.msra.mxu0 %v4054_v30  ;;  %v4984_v30 = vld [vmem:[#allocation8 + $0xc4] ss:$16 sps:$4 sm:$0xff]  }
  0x95   :  { %422 = vmatprep.subr.bf16.mxu0 %v4056_v31  ;;  %6722 = vst [vmem:[#allocation42_spill] sm:$0xff] %v4984_v30  ;;  %v4986_v31 = vld [vmem:[#allocation8 + $0xcc] ss:$16 sps:$4 sm:$0xff]   ;;  %p4620_p9 = por %p4619_p8, %p4618_p7 }
  0x96   :  { %462 = vmatpush1.bf16.msra.mxu1 %v4067_v35  ;;  %6723 = vst [vmem:[#allocation43_spill] sm:$0xff] %v4986_v31  ;;  %v4998_v35 = vld [vmem:[#allocation8 + $0xec] ss:$16 sps:$4 sm:$0xff]  }
  0x97   :  { %463 = vmatprep.subr.bf16.mxu1 %v6457_v0  ;;  %6727 = vst [vmem:[#allocation47_spill] sm:$0xff] %v4998_v35  ;;  %p4621_p10 = pnand %p4620_p9, %p4614_p6 }
  0x98   :  { %423 = vmatpush1.bf16.msra.mxu0 %v4058_v33  ;;  %v4992_v33 = vld [vmem:[#allocation8 + $0xc8] ss:$16 sps:$4 sm:$0xff]  }
  0x99   :  { %424 = vmatprep.subr.bf16.mxu0 %v4060_v34  ;;  %6725 = vst [vmem:[#allocation45_spill] sm:$0xff] %v4992_v33  ;;  %v4996_v34 = vld [vmem:[#allocation8 + $0xe4] ss:$16 sps:$4 sm:$0xff]  }
  0x9a   :  { %464 = vmatpush1.bf16.msra.mxu1 %v4071_v38  ;;  %6726 = vst [vmem:[#allocation46_spill] sm:$0xff] %v4996_v34  ;;  %v5008_v38 = vld [vmem:[#allocation10 + $0x4] ss:$16 sps:$4 sm:$0xff]  }
  0x9b   :  { %465 = vmatprep.subr.bf16.mxu1 %v6457_v0  ;;  %6730 = vst [vmem:[#allocation50_spill] sm:$0xff] %v5008_v38 }
  0x9c   :  { %425 = vmatpush1.bf16.msra.mxu0 %v4062_v36  ;;  %v5002_v36 = vld [vmem:[#allocation8 + $0xe0] ss:$16 sps:$4 sm:$0xff]  }
  0x9d   :  { %426 = vmatprep.subr.bf16.mxu0 %v4064_v37  ;;  %6728 = vst [vmem:[#allocation48_spill] sm:$0xff] %v5002_v36  ;;  %v5004_v37 = vld [vmem:[#allocation8 + $0xe8] ss:$16 sps:$4 sm:$0xff]  }
  0x9e   :  { %466 = vmatpush1.bf16.msra.mxu1 %v4075_v42  ;;  %6729 = vst [vmem:[#allocation49_spill] sm:$0xff] %v5004_v37 }
  0x9f   :  { %467 = vmatprep.subr.bf16.mxu1 %v6457_v0 }
  0xa0   :  { %427 = vmatpush1.bf16.msra.mxu0 %v4066_v39  ;;  %v5010_v39 = vld [vmem:[#allocation10 + $0xc] ss:$16 sps:$4 sm:$0xff]  }
  0xa1   :  { %677 = vmatprep.subr.bf16.mxu0 %v4825_v41  ;;  %6731 = vst [vmem:[#allocation51_spill] sm:$0xff] %v5010_v39 }
  0xa2   :  { %468 = vmatpush1.bf16.msra.mxu1 %v4079_v46 }
  0xa3   :  { %435 = vmatmul.mubr.bf16.vlgmr.msra.gmra.mrb[0].mxu0 %v119_v44  ;;  %3823 = vmatprep.subr.bf16.mxu1 %v6455_v51 }
  0xa4   :  { %678 = vmatpush1.bf16.msra.mxu0 %v4827_v43  ;;  %709 = vmatprep.mubr.bf16.mxu0 %v6457_v0 }
  0xa5   :  { %679 = vmatprep.subr.bf16.mxu0 %v4830_v45  ;;  %476 = vmatmul.mubr.bf16.vlgmr.msra.gmra.mrb[0].mxu1 %v119_v44 }
  0xa6   :  { %3824 = vmatpush3.bf16.msra.mxu1 %v4838_v49  ;;  %3839 = vmatprep.mubr.msk.bf16.mxu1 %vm4659_vm1, %v6455_v51 }
  0xa7   :  { %3825 = vmatprep.subr.bf16.mxu1 %v6455_v51 }
  0xa8   :  { %680 = vmatpush1.bf16.msra.mxu0 %v4833_v47 }
  0xa9   :  { %681 = vmatprep.subr.bf16.mxu0 %v4836_v48 }
  0xaa   :  { %3826 = vmatpush3.bf16.msra.mxu1 %v4848_v53 }
  0xab   :  { %3827 = vmatprep.subr.bf16.mxu1 %v6455_v51 }
  0xac   :  { %682 = vmatpush1.bf16.msra.mxu0 %v4843_v50 }
  0xad   :  { %683 = vmatprep.subr.bf16.mxu0 %v4846_v52 }
  0xae   :  { %3828 = vmatpush3.bf16.msra.mxu1 %v4860_v56 }
  0xaf   :  { %3829 = vmatprep.subr.bf16.mxu1 %v6455_v51 }
  0xb0   :  { %684 = vmatpush1.bf16.msra.mxu0 %v4853_v54 }
  0xb1   :  { %685 = vmatprep.subr.bf16.mxu0 %v4858_v55 }
  0xb2   :  { %3830 = vmatpush3.bf16.msra.mxu1 %v4870_v59 }
  0xb3   :  { %3831 = vmatprep.subr.bf16.mxu1 %v6455_v51 }
  0xb4   :  { %686 = vmatpush1.bf16.msra.mxu0 %v4865_v57 }
  0xb5   :  { %687 = vmatprep.subr.bf16.mxu0 %v4868_v58 }
  0xb6   :  { %3832 = vmatpush3.bf16.msra.mxu1 %v4880_v62 }
  0xb7   :  { %3833 = vmatprep.subr.bf16.mxu1 %v6455_v51 }
  0xb8   :  { %688 = vmatpush1.bf16.msra.mxu0 %v4875_v60 }
  0xb9   :  { %689 = vmatprep.subr.bf16.mxu0 %v4878_v61 }
  0xba   :  { %3834 = vmatpush3.bf16.msra.mxu1 %v4893_v2 }
  0xbb   :  { %3835 = vmatprep.subr.bf16.mxu1 %v6455_v51 }
  0xbc   :  { %690 = vmatpush1.bf16.msra.mxu0 %v4885_v63 }
  0xbd   :  { %691 = vmatprep.subr.bf16.mxu0 %v4888_v1 }
  0xbe   :  { %3836 = vmatpush3.bf16.msra.mxu1 %v4901_v4 }
  0xbf   :  { %3837 = vmatprep.subr.bf16.mxu1 %v6455_v51 }
  0xc0   :  { %692 = vmatpush1.bf16.msra.mxu0 %v4897_v3 }
  0xc1   :  { %968 = vmatprep.subr.bf16.mxu0 %v4914_v6 }
  0xc2   :  { %3838 = vmatpush3.bf16.msra.mxu1 %v4906_v5 }
  0xc3   :  { %710 = vmatmul.mubr.bf16.vlgmr.msra.gmra.mrb[4].mxu0 %v6457_v0  ;;  %1009 = vmatprep.subr.bf16.mxu1 %v4916_v7 }
  0xc4   :  { %1000 = vmatprep.mubr.bf16.mxu0 %v6457_v0  ;;  %969 = vmatpush1.bf16.msra.mxu0 %v4918_v8 }
  0xc5   :  { %3840 = vmatmul.mubr.bf16.vlgmr.msra.gmra.mrb[4].mxu1 %v6457_v0  ;;  %970 = vmatprep.subr.bf16.mxu0 %v4926_v10 }
  0xc6   :  { %1041 = vmatprep.mubr.bf16.mxu1 %v6457_v0  ;;  %1010 = vmatpush1.bf16.msra.mxu1 %v4920_v9 }
  0xc7   :  { %1011 = vmatprep.subr.bf16.mxu1 %v4928_v11 }
  0xc8   :  { %971 = vmatpush1.bf16.msra.mxu0 %v4930_v12 }
  0xc9   :  { %972 = vmatprep.subr.bf16.mxu0 %v4938_v14 }
  0xca   :  { %1012 = vmatpush1.bf16.msra.mxu1 %v4932_v13 }
  0xcb   :  { %1013 = vmatprep.subr.bf16.mxu1 %v4940_v15 }
  0xcc   :  { %973 = vmatpush1.bf16.msra.mxu0 %v4942_v16 }
  0xcd   :  { %974 = vmatprep.subr.bf16.mxu0 %v4950_v18 }
  0xce   :  { %1014 = vmatpush1.bf16.msra.mxu1 %v4944_v17 }
  0xcf   :  { %1015 = vmatprep.subr.bf16.mxu1 %v4952_v19 }
  0xd0   :  { %975 = vmatpush1.bf16.msra.mxu0 %v4954_v20 }
  0xd1   :  { %976 = vmatprep.subr.bf16.mxu0 %v4962_v22 }
  0xd2   :  { %1016 = vmatpush1.bf16.msra.mxu1 %v4956_v21 }
  0xd3   :  { %1017 = vmatprep.subr.bf16.mxu1 %v4964_v23 }
  0xd4   :  { %977 = vmatpush1.bf16.msra.mxu0 %v4966_v24 }
  0xd5   :  { %978 = vmatprep.subr.bf16.mxu0 %v4970_v26 }
  0xd6   :  { %1018 = vmatpush1.bf16.msra.mxu1 %v4968_v25 }
  0xd7   :  { %1019 = vmatprep.subr.bf16.mxu1 %v4972_v27 }
  0xd8   :  { %979 = vmatpush1.bf16.msra.mxu0 %v4978_v28 }
  0xd9   :  { %980 = vmatprep.subr.bf16.mxu0 %v4984_v30 }
  0xda   :  { %1020 = vmatpush1.bf16.msra.mxu1 %v4980_v29 }
  0xdb   :  { %1021 = vmatprep.subr.bf16.mxu1 %v4986_v31 }
  0xdc   :  { %981 = vmatpush1.bf16.msra.mxu0 %v4990_v32 }
  0xdd   :  { %982 = vmatprep.subr.bf16.mxu0 %v4996_v34 }
  0xde   :  { %1022 = vmatpush1.bf16.msra.mxu1 %v4992_v33  ;;  %v175_v33 = vlaneseq }
  0xdf   :  { %1023 = vmatprep.subr.bf16.mxu1 %v4998_v35 }
  0xe0   :  { %983 = vmatpush1.bf16.msra.mxu0 %v5002_v36  ;;  %v5016_v32 = vshrl.u32 %v175_v33, 7 }
  0xe1   :  { %1210 = vmatprep.subr.bf16.mxu0 %v5008_v38 }
  0xe2   :  { %1024 = vmatpush1.bf16.msra.mxu1 %v5004_v37  ;;  %v6487_v31 = vsub.s32 0, %v5016_v32  ;;  %v173_v37 = vld [vmem:[%s6447_s3] sm:$0x7] }
  0xe3   :  { %1251 = vmatprep.subr.bf16.mxu1 %v5010_v39 }
  0xe4   :  { %v178_v39 = vrot.slane %v173_v37, %v6487_v31  ;;  %v6497_v31 = vsub.s32 2, %v5016_v32 }
 0x176   :  { %v436_v40 = vpop.f32.mrb[0].mxu0 }
 0x177   :  { %v438_v42 = vpop.f32.mrb[1].mxu0  ;;  %v5024_v38 = vadd.f32 %v436_v40, %v178_v39 }
 0x178   :  { %v440_v44 = vpop.f32.mrb[2].mxu0  ;;  %v477_v51 = vpop.f32.mrb[0].mxu1 }
 0x179   :  { %v441_v46 = vpop.f32.mrb[3].mxu0  ;;  %v479_v0 = vpop.f32.mrb[1].mxu1  ;;  %6732 = vst [vmem:[#allocation52_spill] sm:$0xff] %v5024_v38  ;;  %v6488_v44 = vsub.s32 1, %v5016_v32 }
 0x17a   :  { %v480_v34 = vpop.f32.mrb[2].mxu1 }
 0x17b   :  { %v481_v35 = vpop.f32.mrb[3].mxu1  ;;  %v182_v30 = vrot.slane %v173_v37, %v6488_v44 }
 0x17d   :  { %v5030_v26 = vadd.f32 %v438_v42, %v182_v30 }
 0x17f   :  { %6733 = vst [vmem:[#allocation53_spill] sm:$0xff] %v5030_v26 }
 0x196   :  { %v711_v46 = vpop.f32.mrb[4].mxu0 }
 0x197   :  { %v758_v0 = vadd.f32 %v711_v46, %v5024_v38  ;;  %v713_v34 = vpop.f32.mrb[5].mxu0  ;;  %v5037_v46 = vld [vmem:[%s6448_s4] sm:$0x1] }
 0x198   :  { %v715_v35 = vpop.f32.mrb[6].mxu0  ;;  %v752_v29 = vpop.f32.mrb[4].mxu1  ;;  %v763_v40 = vadd.f32 %v713_v34, %v5030_v26 }
 0x199   :  { %v759_v33 = vmul.f32 0.5, %v758_v0  ;;  %v716_v36 = vpop.f32.mrb[7].mxu0  ;;  %v3841_v28 = vpop.f32.mrb[5].mxu1  ;;  %v186_v35 = vrot.slane %v173_v37, %v6497_v31  ;;  %v5047_v37 = vld [vmem:[#allocation10] ss:$16 sps:$4 sm:$0xff]  }
 0x19a   :  { %v755_v27 = vpop.f32.mrb[6].mxu1  ;;  %v764_v36 = vmul.f32 0.5, %v763_v40  ;;  %v5097_v31 = vld [vmem:[#allocation10 + $0x8c] ss:$16 sps:$4 sm:$0xff]  }
 0x19b   :  { %4207 = vtanh.f32 %v759_v33  ;;  %v3842_v39 = vpop.f32.mrb[7].mxu1  ;;  %v768_v27 = vadd.f32 %v752_v29, %v5037_v46  ;;  %v5042_v30 = vadd.f32 %v477_v51, %v186_v35  ;;  %v5055_v29 = vld [vmem:[#allocation10 + $0x24] ss:$16 sps:$4 sm:$0xff]   ;;  %v6735_v35 = vmov 0   ;;  %6743 = vst [vmem:[#allocation62_spill] sm:$0xff] %v5097_v31 }
 0x19c   :  { %4209 = vtanh.f32 %v764_v36  ;;  %v5057_v36 = vld [vmem:[#allocation10 + $0x2c] ss:$16 sps:$4 sm:$0xff]  }
 0x1a5   :  { %v4208_v0 = vpop.eup %4207 }
 0x1a6   :  { %v761_v33 = vmul.f32 0.5, %v4208_v0  ;;  %v4210_v39 = vpop.eup %4209  ;;  %v5049_v0 = vld [vmem:[#allocation10 + $0x8] ss:$16 sps:$4 sm:$0xff]  }
 0x1a7   :  { %v766_v44 = vmul.f32 0.5, %v4210_v39  ;;  %v5091_v39 = vld [vmem:[#allocation10 + $0x68] ss:$16 sps:$4 sm:$0xff]  }
 0x1a8   :  { %v762_v28 = vadd.f32 0.5, %v761_v33  ;;  %v5077_v33 = vld [vmem:[#allocation10 + $0x40] ss:$16 sps:$4 sm:$0xff]   ;;  %6741 = vst [vmem:[#allocation60_spill] sm:$0xff] %v5091_v39 }
 0x1a9   :  { %v767_v38 = vadd.f32 0.5, %v766_v44  ;;  %v5071_v44 = vld [vmem:[#allocation10 + $0x4c] ss:$16 sps:$4 sm:$0xff]   ;;  %6736 = vst [vmem:[#allocation55_spill] sm:$0xff] %v5077_v33 }
 0x1aa   :  { %v769_v42 = vmul.f32 %v768_v27, %v762_v28  ;;  %6734 = vst [vmem:[#allocation54_spill] sm:$0xff] %v5071_v44  ;;  %v5079_v27 = vld [vmem:[#allocation10 + $0x48] ss:$16 sps:$4 sm:$0xff]   ;;  %v5083_v28 = vld [vmem:[#allocation10 + $0x64] ss:$16 sps:$4 sm:$0xff]  }
 0x1ab   :  { %6737 = vst [vmem:[#allocation56_spill] sm:$0xff] %v5079_v27  ;;  %6738 = vst [vmem:[#allocation57_spill] sm:$0xff] %v5083_v28 }
 0x1ac   :  { %v770_v34 = vadd.f32 %v769_v42, %v5042_v30  ;;  %v5085_v42 = vld [vmem:[#allocation10 + $0x6c] ss:$16 sps:$4 sm:$0xff]  }
 0x1ad   :  { %6739 = vst [vmem:[#allocation58_spill] sm:$0xff] %v5085_v42 }
 0x1ae   :  { %4211 = vtanh.f32 %v770_v34  ;;  %v5089_v34 = vld [vmem:[#allocation10 + $0x60] ss:$16 sps:$4 sm:$0xff]  }
 0x1af   :  { %6740 = vst [vmem:[#allocation59_spill] sm:$0xff] %v5089_v34 }
 0x1b8   :  { %v4212_v26 = vpop.eup %4211 }
 0x1b9   :  { %v772_v40 = vsub.f32 0.0, %v4212_v26 }
 0x1bb   :  { %v773_v25 = vmul.f32 %v772_v40, %v767_v38  ;;  %v5069_v38 = vld [vmem:[#allocation10 + $0x44] ss:$16 sps:$4 sm:$0xff]  }
 0x1bc   :  { %v5095_v40 = vld [vmem:[#allocation10 + $0x84] ss:$16 sps:$4 sm:$0xff]  }
 0x1bd   :  { %v5045_v24 = vadd.f32 %v4212_v26, %v773_v25  ;;  %v5063_v25 = vld [vmem:[#allocation10 + $0x20] ss:$16 sps:$4 sm:$0xff]   ;;  %v5065_v26 = vld [vmem:[#allocation10 + $0x28] ss:$16 sps:$4 sm:$0xff]   ;;  %6742 = vst [vmem:[#allocation61_spill] sm:$0xff] %v5095_v40 }
 0x1bf   :  { %v5053_v51 = vpack.c.bf16 %v5045_v24, %v5045_v24 }
 0x1c1   :  { %1001 = vmatmul.mubr.bf16.vlgmr.msra.gmra.mrb[8].mxu0 %v5053_v51  ;;  %1042 = vmatmul.mubr.bf16.vlgmr.msra.gmra.mrb[8].mxu1 %v5053_v51 }
 0x1c2   :  { %1211 = vmatpush1.bf16.msra.mxu0 %v5047_v37  ;;  %1252 = vmatpush1.bf16.msra.mxu1 %v5049_v0 }
 0x1c3   :  { %1212 = vmatprep.subr.bf16.mxu0 %v5055_v29  ;;  %1253 = vmatprep.subr.bf16.mxu1 %v5057_v36 }
 0x1c4   :  { %1242 = vmatprep.mubr.bf16.mxu0 %v6735_v35  ;;  %1283 = vmatprep.mubr.bf16.mxu1 %v6735_v35 }
 0x1c6   :  { %1213 = vmatpush1.bf16.msra.mxu0 %v5063_v25  ;;  %1254 = vmatpush1.bf16.msra.mxu1 %v5065_v26 }
 0x1c7   :  { %1214 = vmatprep.subr.bf16.mxu0 %v5069_v38  ;;  %1255 = vmatprep.subr.bf16.mxu1 %v5071_v44  ;;  %v5101_v44 = vld [vmem:[#allocation10 + $0x80] ss:$16 sps:$4 sm:$0xff]  }
 0x1c8   :  { %6744 = vst [vmem:[#allocation63_spill] sm:$0xff] %v5101_v44 }
 0x1ca   :  { %1215 = vmatpush1.bf16.msra.mxu0 %v5077_v33  ;;  %1256 = vmatpush1.bf16.msra.mxu1 %v5079_v27  ;;  %v5103_v33 = vld [vmem:[#allocation10 + $0x88] ss:$16 sps:$4 sm:$0xff]   ;;  %v5107_v27 = vld [vmem:[#allocation10 + $0xa4] ss:$16 sps:$4 sm:$0xff]  }
 0x1cb   :  { %1216 = vmatprep.subr.bf16.mxu0 %v5083_v28  ;;  %1257 = vmatprep.subr.bf16.mxu1 %v5085_v42  ;;  %6745 = vst [vmem:[#allocation64_spill] sm:$0xff] %v5103_v33  ;;  %6746 = vst [vmem:[#allocation65_spill] sm:$0xff] %v5107_v27  ;;  %v5109_v28 = vld [vmem:[#allocation10 + $0xac] ss:$16 sps:$4 sm:$0xff]   ;;  %v5113_v42 = vld [vmem:[#allocation10 + $0xa0] ss:$16 sps:$4 sm:$0xff]  }
 0x1cc   :  { %6747 = vst [vmem:[#allocation66_spill] sm:$0xff] %v5109_v28  ;;  %6748 = vst [vmem:[#allocation67_spill] sm:$0xff] %v5113_v42 }
 0x1ce   :  { %1217 = vmatpush1.bf16.msra.mxu0 %v5089_v34  ;;  %1258 = vmatpush1.bf16.msra.mxu1 %v5091_v39  ;;  %v5115_v34 = vld [vmem:[#allocation10 + $0xa8] ss:$16 sps:$4 sm:$0xff]   ;;  %v5119_v39 = vld [vmem:[#allocation10 + $0xc4] ss:$16 sps:$4 sm:$0xff]  }
 0x1cf   :  { %1218 = vmatprep.subr.bf16.mxu0 %v5095_v40  ;;  %1259 = vmatprep.subr.bf16.mxu1 %v5097_v31  ;;  %v5121_v40 = vld [vmem:[#allocation10 + $0xcc] ss:$16 sps:$4 sm:$0xff]   ;;  %v5125_v31 = vld [vmem:[#allocation10 + $0xc0] ss:$16 sps:$4 sm:$0xff]  }
 0x1d0   :  { %6749 = vst [vmem:[#allocation68_spill] sm:$0xff] %v5121_v40 }
 0x1d2   :  { %1219 = vmatpush1.bf16.msra.mxu0 %v5101_v44  ;;  %1260 = vmatpush1.bf16.msra.mxu1 %v5103_v33  ;;  %v5127_v44 = vld [vmem:[#allocation10 + $0xc8] ss:$16 sps:$4 sm:$0xff]   ;;  %v5131_v33 = vld [vmem:[#allocation10 + $0xe4] ss:$16 sps:$4 sm:$0xff]  }
 0x1d3   :  { %1220 = vmatprep.subr.bf16.mxu0 %v5107_v27  ;;  %1261 = vmatprep.subr.bf16.mxu1 %v5109_v28  ;;  %v5133_v27 = vld [vmem:[#allocation10 + $0xec] ss:$16 sps:$4 sm:$0xff]   ;;  %v5137_v28 = vld [vmem:[#allocation10 + $0xe0] ss:$16 sps:$4 sm:$0xff]  }
 0x1d4   :  { %6750 = vst [vmem:[#allocation69_spill] sm:$0xff] %v5137_v28 }
 0x1d6   :  { %1221 = vmatpush1.bf16.msra.mxu0 %v5113_v42  ;;  %1262 = vmatpush1.bf16.msra.mxu1 %v5115_v34  ;;  %v5139_v42 = vld [vmem:[#allocation10 + $0xe8] ss:$16 sps:$4 sm:$0xff]  }
 0x1d7   :  { %1222 = vmatprep.subr.bf16.mxu0 %v5119_v39  ;;  %1263 = vmatprep.subr.bf16.mxu1 %v5121_v40  ;;  %v6751_v40 = vmov 0.0  }
 0x1da   :  { %1223 = vmatpush1.bf16.msra.mxu0 %v5125_v31  ;;  %1264 = vmatpush1.bf16.msra.mxu1 %v5127_v44 }
 0x1db   :  { %1224 = vmatprep.subr.bf16.mxu0 %v5131_v33  ;;  %1265 = vmatprep.subr.bf16.mxu1 %v5133_v27 }
 0x1de   :  { %1225 = vmatpush1.bf16.msra.mxu0 %v5137_v28  ;;  %1266 = vmatpush1.bf16.msra.mxu1 %v5139_v42 }
 0x1df   :  { %1332 = vmatprep.subr.bf16.mxu0 %v4825_v41  ;;  %3843 = vmatprep.subr.bf16.mxu1 %v6751_v40  ;;  %v6752_v41 = vld [vmem:[#allocation36_spill] sm:$0xff] }
 0x1e1   :  { %1243 = vmatmul.mubr.bf16.vlgmr.msra.gmra.mrb[12].mxu0 %v6735_v35  ;;  %1284 = vmatmul.mubr.bf16.vlgmr.msra.gmra.mrb[12].mxu1 %v6735_v35 }
 0x1e2   :  { %1333 = vmatpush1.bf16.msra.mxu0 %v4827_v43  ;;  %3844 = vmatpush3.bf16.msra.mxu1 %v4838_v49  ;;  %v6753_v43 = vld [vmem:[#allocation37_spill] sm:$0xff] }
 0x1e3   :  { %1334 = vmatprep.subr.bf16.mxu0 %v4830_v45  ;;  %3845 = vmatprep.subr.bf16.mxu1 %v6751_v40  ;;  %v6754_v45 = vld [vmem:[#allocation38_spill] sm:$0xff] }
 0x1e4   :  { %1364 = vmatprep.mubr.bf16.mxu0 %v6735_v35  ;;  %3859 = vmatprep.mubr.msk.bf16.mxu1 %vm4659_vm1, %v6751_v40 }
 0x1e6   :  { %1335 = vmatpush1.bf16.msra.mxu0 %v4833_v47  ;;  %3846 = vmatpush3.bf16.msra.mxu1 %v4848_v53  ;;  %v6755_v47 = vld [vmem:[#allocation39_spill] sm:$0xff] }
 0x1e7   :  { %1336 = vmatprep.subr.bf16.mxu0 %v4836_v48  ;;  %3847 = vmatprep.subr.bf16.mxu1 %v6751_v40  ;;  %v6756_v48 = vld [vmem:[#allocation40_spill] sm:$0xff] }
 0x1ea   :  { %1337 = vmatpush1.bf16.msra.mxu0 %v4843_v50  ;;  %3848 = vmatpush3.bf16.msra.mxu1 %v4860_v56 }
 0x1eb   :  { %1338 = vmatprep.subr.bf16.mxu0 %v4846_v52  ;;  %3849 = vmatprep.subr.bf16.mxu1 %v6751_v40 }
 0x1ee   :  { %1339 = vmatpush1.bf16.msra.mxu0 %v4853_v54  ;;  %3850 = vmatpush3.bf16.msra.mxu1 %v4870_v59 }
 0x1ef   :  { %1340 = vmatprep.subr.bf16.mxu0 %v4858_v55  ;;  %3851 = vmatprep.subr.bf16.mxu1 %v6751_v40 }
 0x1f2   :  { %1341 = vmatpush1.bf16.msra.mxu0 %v4865_v57  ;;  %3852 = vmatpush3.bf16.msra.mxu1 %v4880_v62 }
 0x1f3   :  { %1342 = vmatprep.subr.bf16.mxu0 %v4868_v58  ;;  %3853 = vmatprep.subr.bf16.mxu1 %v6751_v40 }
 0x1f6   :  { %1343 = vmatpush1.bf16.msra.mxu0 %v4875_v60  ;;  %3854 = vmatpush3.bf16.msra.mxu1 %v4893_v2 }
 0x1f7   :  { %1344 = vmatprep.subr.bf16.mxu0 %v4878_v61  ;;  %3855 = vmatprep.subr.bf16.mxu1 %v6751_v40 }
 0x1fa   :  { %1345 = vmatpush1.bf16.msra.mxu0 %v4885_v63  ;;  %3856 = vmatpush3.bf16.msra.mxu1 %v4901_v4 }
 0x1fb   :  { %1346 = vmatprep.subr.bf16.mxu0 %v4888_v1  ;;  %3857 = vmatprep.subr.bf16.mxu1 %v6751_v40 }
 0x1fe   :  { %1347 = vmatpush1.bf16.msra.mxu0 %v4897_v3  ;;  %3858 = vmatpush3.bf16.msra.mxu1 %v4906_v5 }
 0x1ff   :  { %1450 = vmatprep.subr.bf16.mxu0 %v4914_v6  ;;  %1491 = vmatprep.subr.bf16.mxu1 %v4916_v7  ;;  %v1307_v7 = vsub.s32 3, %v5016_v32 }
 0x201   :  { %1365 = vmatmul.mubr.bf16.vlgmr.msra.gmra.mrb[16].mxu0 %v5053_v51  ;;  %3860 = vmatmul.mubr.bf16.vlgmr.msra.gmra.mrb[16].mxu1 %v5053_v51  ;;  %v6757_v51 = vld [vmem:[#allocation41_spill] sm:$0xff] }
 0x202   :  { %1451 = vmatpush1.bf16.msra.mxu0 %v4918_v8  ;;  %1492 = vmatpush1.bf16.msra.mxu1 %v4920_v9  ;;  %v6769_v8 = vsub.s32 1, %v5016_v32 }
 0x203   :  { %1452 = vmatprep.subr.bf16.mxu0 %v4926_v10  ;;  %1493 = vmatprep.subr.bf16.mxu1 %v4928_v11 }
 0x204   :  { %1482 = vmatprep.mubr.bf16.mxu0 %v6735_v35  ;;  %1523 = vmatprep.mubr.bf16.mxu1 %v6735_v35 }
 0x206   :  { %1453 = vmatpush1.bf16.msra.mxu0 %v4930_v12  ;;  %1494 = vmatpush1.bf16.msra.mxu1 %v4932_v13 }
 0x207   :  { %1454 = vmatprep.subr.bf16.mxu0 %v4938_v14  ;;  %1495 = vmatprep.subr.bf16.mxu1 %v4940_v15 }
 0x20a   :  { %1455 = vmatpush1.bf16.msra.mxu0 %v4942_v16  ;;  %1496 = vmatpush1.bf16.msra.mxu1 %v4944_v17 }
 0x20b   :  { %1456 = vmatprep.subr.bf16.mxu0 %v4950_v18  ;;  %1497 = vmatprep.subr.bf16.mxu1 %v4952_v19  ;;  %v6758_v19 = vld [vmem:[#allocation42_spill] sm:$0xff] }
 0x20e   :  { %1457 = vmatpush1.bf16.msra.mxu0 %v4954_v20  ;;  %1498 = vmatpush1.bf16.msra.mxu1 %v4956_v21  ;;  %v6759_v20 = vld [vmem:[#allocation43_spill] sm:$0xff]  ;;  %v6760_v21 = vld [vmem:[#allocation44_spill] sm:$0xff] }
 0x20f   :  { %1458 = vmatprep.subr.bf16.mxu0 %v4962_v22  ;;  %1499 = vmatprep.subr.bf16.mxu1 %v4964_v23  ;;  %v6761_v22 = vld [vmem:[#allocation45_spill] sm:$0xff]  ;;  %v6762_v23 = vld [vmem:[#allocation46_spill] sm:$0xff] }
 0x212   :  { %1459 = vmatpush1.bf16.msra.mxu0 %v6752_v41  ;;  %1500 = vmatpush1.bf16.msra.mxu1 %v6753_v43  ;;  %v6763_v41 = vld [vmem:[#allocation47_spill] sm:$0xff]  ;;  %v6764_v43 = vld [vmem:[#allocation48_spill] sm:$0xff] }
 0x213   :  { %1460 = vmatprep.subr.bf16.mxu0 %v6754_v45  ;;  %1501 = vmatprep.subr.bf16.mxu1 %v6755_v47  ;;  %v6765_v45 = vld [vmem:[#allocation49_spill] sm:$0xff]  ;;  %v6766_v47 = vld [vmem:[#allocation50_spill] sm:$0xff] }
 0x216   :  { %1461 = vmatpush1.bf16.msra.mxu0 %v6756_v48  ;;  %1502 = vmatpush1.bf16.msra.mxu1 %v6757_v51  ;;  %v6767_v48 = vld [vmem:[#allocation51_spill] sm:$0xff] }
 0x217   :  { %1462 = vmatprep.subr.bf16.mxu0 %v6758_v19  ;;  %1503 = vmatprep.subr.bf16.mxu1 %v6759_v20 }
 0x21a   :  { %1463 = vmatpush1.bf16.msra.mxu0 %v6760_v21  ;;  %1504 = vmatpush1.bf16.msra.mxu1 %v6761_v22 }
 0x21b   :  { %1464 = vmatprep.subr.bf16.mxu0 %v6762_v23  ;;  %1505 = vmatprep.subr.bf16.mxu1 %v6763_v41  ;;  %v484_v41 = vld [vmem:[%s6451_s7] sm:$0xf] }
 0x21e   :  { %1465 = vmatpush1.bf16.msra.mxu0 %v6764_v43  ;;  %1506 = vmatpush1.bf16.msra.mxu1 %v6765_v45  ;;  %v6768_v43 = vsub.s32 0, %v5016_v32 }
 0x21f   :  { %1532 = vmatprep.subr.bf16.mxu0 %v6766_v47  ;;  %1573 = vmatprep.subr.bf16.mxu1 %v6767_v48 }
 0x220   :  { %v5225_v23 = vrot.slane %v484_v41, %v6768_v43  ;;  %v5230_v43 = vrot.slane %v484_v41, %v6769_v8 }
 0x222   :  { %6770 = vst [vmem:[#allocation70_spill] sm:$0xff] %v5230_v43 }
 0x294   :  { %v1002_v51 = vpop.f32.mrb[8].mxu0  ;;  %v1043_v19 = vpop.f32.mrb[8].mxu1 }
 0x295   :  { %v1004_v18 = vpop.f32.mrb[9].mxu0  ;;  %v1045_v20 = vpop.f32.mrb[9].mxu1 }
 0x296   :  { %v1006_v17 = vpop.f32.mrb[10].mxu0  ;;  %v1047_v21 = vpop.f32.mrb[10].mxu1 }
 0x297   :  { %v1007_v16 = vpop.f32.mrb[11].mxu0  ;;  %v1048_v22 = vpop.f32.mrb[11].mxu1 }
 0x2b4   :  { %v1244_v45 = vpop.f32.mrb[12].mxu0  ;;  %v1285_v47 = vpop.f32.mrb[12].mxu1 }
 0x2b5   :  { %v1245_v15 = vadd.f32 %v1244_v45, %v1002_v51  ;;  %v1286_v48 = vadd.f32 %v1285_v47, %v1043_v19  ;;  %v1246_v14 = vpop.f32.mrb[13].mxu0  ;;  %v1287_v13 = vpop.f32.mrb[13].mxu1  ;;  %v5234_v45 = vrot.slane %v484_v41, %v1307_v7 }
 0x2b6   :  { %v1247_v12 = vadd.f32 %v1246_v14, %v1004_v18  ;;  %v1288_v11 = vadd.f32 %v1287_v13, %v1045_v20  ;;  %v1248_v17 = vpop.f32.mrb[14].mxu0  ;;  %v1289_v21 = vpop.f32.mrb[14].mxu1  ;;  %v6772_v18 = vsub.s32 2, %v5016_v32 }
 0x2b7   :  { %v1313_v16 = vadd.f32 %v5225_v23, %v1245_v15  ;;  %v1249_v22 = vpop.f32.mrb[15].mxu0  ;;  %v1290_v10 = vpop.f32.mrb[15].mxu1  ;;  %6771 = vst [vmem:[#allocation71_spill] sm:$0xff] %v5234_v45 }
 0x2b8   :  { %v1314_v19 = vadd.f32 %v5230_v43, %v1247_v12  ;;  %v5238_v20 = vrot.slane %v484_v41, %v6772_v18  ;;  %v6773_v18 = vld [vmem:[#allocation52_spill] sm:$0xff] }
 0x2b9   :  { %v1317_v9 = vmul.f32 0.5, %v1313_v16 }
 0x2ba   :  { %v1321_v14 = vmul.f32 0.5, %v1314_v19  ;;  %v1315_v8 = vadd.f32 %v5238_v20, %v1286_v48 }
 0x2bb   :  { %4213 = vtanh.f32 %v1317_v9  ;;  %v1316_v9 = vadd.f32 %v5234_v45, %v1288_v11 }
 0x2bc   :  { %4215 = vtanh.f32 %v1321_v14 }
 0x2c5   :  { %v4214_v13 = vpop.eup %4213 }
 0x2c6   :  { %v1319_v15 = vmul.f32 0.5, %v4214_v13  ;;  %v4216_v17 = vpop.eup %4215 }
 0x2c7   :  { %v1323_v21 = vmul.f32 0.5, %v4216_v17 }
 0x2c8   :  { %v1320_v10 = vadd.f32 0.5, %v1319_v15 }
 0x2c9   :  { %v1324_v15 = vadd.f32 0.5, %v1323_v21 }
 0x2ca   :  { %v1325_v47 = vmul.f32 %v1320_v10, %v1316_v9 }
 0x2cc   :  { %v1326_v51 = vadd.f32 %v1325_v47, %v1315_v8 }
 0x2ce   :  { %4217 = vtanh.f32 %v1326_v51  ;;  %v6775_v51 = vld [vmem:[#allocation53_spill] sm:$0xff] }
 0x2d4   :  { %v1366_v12 = vpop.f32.mrb[16].mxu0  ;;  %v1407_v7 = vpop.f32.mrb[16].mxu1 }
 0x2d5   :  { %v1414_v16 = vrot.slane %v1366_v12, 7  ;;  %v1368_v22 = vpop.f32.mrb[17].mxu0  ;;  %v3861_v19 = vpop.f32.mrb[17].mxu1  ;;  %v1429_v47 = vadd.f32 %v1407_v7, %v5037_v46 }
 0x2d6   :  { %v1370_v32 = vpop.f32.mrb[18].mxu0  ;;  %v1410_v41 = vpop.f32.mrb[18].mxu1  ;;  %v1422_v8 = vrot.slane %v1368_v22, 7 }
 0x2d7   :  { %v1416_v13 = vadd.f32 %v1414_v16, %v6773_v18  ;;  %v1371_v14 = vpop.f32.mrb[19].mxu0  ;;  %v3862_v43 = vpop.f32.mrb[19].mxu1  ;;  %v1431_v41 = vrot.slane %v1429_v47, 7 }
 0x2d8   :  { %v4218_v11 = vpop.eup %4217  ;;  %v1424_v17 = vadd.f32 %v1422_v8, %v6775_v51 }
 0x2d9   :  { %v1417_v45 = vmul.f32 0.5, %v1416_v13  ;;  %v1328_v48 = vsub.f32 0.0, %v4218_v11 }
 0x2da   :  { %v1425_v16 = vmul.f32 0.5, %v1424_v17  ;;  %v6777_v17 = vld [vmem:[#allocation55_spill] sm:$0xff] }
 0x2db   :  { %4219 = vtanh.f32 %v1417_v45  ;;  %v1329_v9 = vmul.f32 %v1328_v48, %v1324_v15 }
 0x2dc   :  { %4221 = vtanh.f32 %v1425_v16  ;;  %v6782_v16 = vld [vmem:[#allocation60_spill] sm:$0xff] }
 0x2dd   :  { %v5243_v10 = vadd.f32 %v4218_v11, %v1329_v9 }
 0x2df   :  { %6774 = vst [vmem:[#allocation52_spill] sm:$0xff] %v5243_v10 }
 0x2e5   :  { %v4220_v12 = vpop.eup %4219 }
 0x2e6   :  { %v1419_v19 = vmul.f32 0.5, %v4220_v12  ;;  %v4222_v21 = vpop.eup %4221  ;;  %v6778_v12 = vld [vmem:[#allocation56_spill] sm:$0xff] }
 0x2e7   :  { %v1427_v13 = vmul.f32 0.5, %v4222_v21  ;;  %v6785_v21 = vld [vmem:[#allocation63_spill] sm:$0xff] }
 0x2e8   :  { %v1420_v32 = vadd.f32 0.5, %v1419_v19  ;;  %v6779_v19 = vld [vmem:[#allocation57_spill] sm:$0xff] }
 0x2e9   :  { %v1428_v15 = vadd.f32 0.5, %v1427_v13  ;;  %v6787_v13 = vld [vmem:[#allocation65_spill] sm:$0xff] }
 0x2ea   :  { %v1433_v14 = vmul.f32 %v1431_v41, %v1420_v32  ;;  %v6780_v32 = vld [vmem:[#allocation58_spill] sm:$0xff]  ;;  %v6781_v41 = vld [vmem:[#allocation59_spill] sm:$0xff] }
 0x2ec   :  { %v1434_v43 = vadd.f32 %v1433_v14, %v5042_v30  ;;  %v6783_v14 = vld [vmem:[#allocation61_spill] sm:$0xff] }
 0x2ee   :  { %4223 = vtanh.f32 %v1434_v43  ;;  %v6784_v43 = vld [vmem:[#allocation62_spill] sm:$0xff] }
 0x2f8   :  { %v4224_v45 = vpop.eup %4223 }
 0x2f9   :  { %v1437_v11 = vrot.slane %v4224_v45, 1 }
 0x2fb   :  { %v1439_v22 = vsub.f32 %v5045_v24, %v1437_v11  ;;  %v6776_v24 = vld [vmem:[#allocation54_spill] sm:$0xff] }
 0x2fc   :  { %v6788_v11 = vld [vmem:[#allocation66_spill] sm:$0xff] }
 0x2fd   :  { %v1441_v7 = vrot.slane %v1439_v22, 7  ;;  %v6789_v22 = vld [vmem:[#allocation67_spill] sm:$0xff] }
 0x2ff   :  { %v1443_v48 = vmul.f32 %v1441_v7, %v1428_v15  ;;  %v6790_v15 = vld [vmem:[#allocation68_spill] sm:$0xff]  ;;  %v1331_v7 = vpack.c.bf16 %v5243_v10, %v5243_v10 }
 0x301   :  { %v5249_v9 = vadd.f32 %v4224_v45, %v1443_v48  ;;  %v6786_v45 = vld [vmem:[#allocation64_spill] sm:$0xff] }
 0x302   :  { %v5291_v48 = vld [vmem:[#allocation7 + $0x4] ss:$12 sps:$4 sm:$0xff]  }
 0x303   :  { %v1445_v8 = vpack.c.bf16 %v5249_v9, %v5249_v9  ;;  %6791 = vst [vmem:[#allocation53_spill] sm:$0xff] %v5291_v48 }
 0x305   :  { %v5253_v47 = vshrl.u32 %v1445_v8, 16  ;;  %v5295_v8 = vld [vmem:[#allocation7] ss:$12 sps:$4 sm:$0xff]  }
 0x307   :  { %1483 = vmatmul.mubr.bf16.vlgmr.msra.gmra.mrb[20].mxu0 %v5253_v47  ;;  %1524 = vmatmul.mubr.bf16.vlgmr.msra.gmra.mrb[20].mxu1 %v5253_v47 }
 0x308   :  { %1533 = vmatpush1.bf16.msra.mxu0 %v5047_v37  ;;  %1574 = vmatpush1.bf16.msra.mxu1 %v5049_v0 }
 0x309   :  { %1534 = vmatprep.subr.bf16.mxu0 %v5055_v29  ;;  %1575 = vmatprep.subr.bf16.mxu1 %v5057_v36 }
 0x30a   :  { %1564 = vmatprep.mubr.bf16.mxu0 %v6735_v35  ;;  %1605 = vmatprep.mubr.bf16.mxu1 %v6735_v35 }
 0x30c   :  { %1535 = vmatpush1.bf16.msra.mxu0 %v5063_v25  ;;  %1576 = vmatpush1.bf16.msra.mxu1 %v5065_v26 }
 0x30d   :  { %1536 = vmatprep.subr.bf16.mxu0 %v5069_v38  ;;  %1577 = vmatprep.subr.bf16.mxu1 %v6776_v24 }
 0x310   :  { %1537 = vmatpush1.bf16.msra.mxu0 %v6777_v17  ;;  %1578 = vmatpush1.bf16.msra.mxu1 %v6778_v12 }
 0x311   :  { %1538 = vmatprep.subr.bf16.mxu0 %v6779_v19  ;;  %1579 = vmatprep.subr.bf16.mxu1 %v6780_v32 }
 0x314   :  { %1539 = vmatpush1.bf16.msra.mxu0 %v6781_v41  ;;  %1580 = vmatpush1.bf16.msra.mxu1 %v6782_v16 }
 0x315   :  { %1540 = vmatprep.subr.bf16.mxu0 %v6783_v14  ;;  %1581 = vmatprep.subr.bf16.mxu1 %v6784_v43 }
 0x318   :  { %1541 = vmatpush1.bf16.msra.mxu0 %v6785_v21  ;;  %1582 = vmatpush1.bf16.msra.mxu1 %v6786_v45 }
 0x319   :  { %1542 = vmatprep.subr.bf16.mxu0 %v6787_v13  ;;  %1583 = vmatprep.subr.bf16.mxu1 %v6788_v11 }
 0x31c   :  { %1543 = vmatpush1.bf16.msra.mxu0 %v6789_v22  ;;  %1584 = vmatpush1.bf16.msra.mxu1 %v5115_v34 }
 0x31d   :  { %1544 = vmatprep.subr.bf16.mxu0 %v5119_v39  ;;  %1585 = vmatprep.subr.bf16.mxu1 %v6790_v15 }
 0x320   :  { %1545 = vmatpush1.bf16.msra.mxu0 %v5125_v31  ;;  %1586 = vmatpush1.bf16.msra.mxu1 %v5127_v44 }
 0x321   :  { %1546 = vmatprep.subr.bf16.mxu0 %v5131_v33  ;;  %1587 = vmatprep.subr.bf16.mxu1 %v5133_v27 }
 0x324   :  { %1547 = vmatpush1.bf16.msra.mxu0 %v5137_v28  ;;  %1588 = vmatpush1.bf16.msra.mxu1 %v5139_v42  ;;  %v5299_v28 = vld [vmem:[#allocation7 + $0x1c] ss:$12 sps:$4 sm:$0xff]  }
 0x325   :  { %1633 = vmatprep.subr.bf16.mxu0 %v5291_v48  ;;  %3863 = vmatprep.subr.bf16.mxu1 %v6751_v40  ;;  %v5306_v48 = vld [vmem:[#allocation7 + $0x18] ss:$12 sps:$4 sm:$0xff]  }
 0x326   :  { %6792 = vst [vmem:[#allocation54_spill] sm:$0xff] %v5306_v48 }
 0x327   :  { %1565 = vmatmul.mubr.bf16.vlgmr.msra.gmra.mrb[24].mxu0 %v1331_v7  ;;  %1606 = vmatmul.mubr.bf16.vlgmr.msra.gmra.mrb[24].mxu1 %v1331_v7  ;;  %v5310_v7 = vld [vmem:[#allocation7 + $0x34] ss:$12 sps:$4 sm:$0xff]  }
 0x328   :  { %1634 = vmatpush1.bf16.msra.mxu0 %v5295_v8  ;;  %3864 = vmatpush3.bf16.msra.mxu1 %v4838_v49  ;;  %6793 = vst [vmem:[#allocation55_spill] sm:$0xff] %v5310_v7  ;;  %v6794_v49 = vld [vmem:[#allocation19_spill] sm:$0xff] }
 0x329   :  { %1635 = vmatprep.subr.bf16.mxu0 %v5299_v28  ;;  %3865 = vmatprep.subr.bf16.mxu1 %v6751_v40 }
 0x32a   :  { %1665 = vmatprep.mubr.bf16.mxu0 %v6735_v35  ;;  %3879 = vmatprep.mubr.msk.bf16.mxu1 %vm4659_vm1, %v6751_v40 }
 0x32c   :  { %1636 = vmatpush1.bf16.msra.mxu0 %v5306_v48  ;;  %3866 = vmatpush3.bf16.msra.mxu1 %v4848_v53  ;;  %v6797_v53 = vld [vmem:[#allocation22_spill] sm:$0xff] }
 0x32d   :  { %1637 = vmatprep.subr.bf16.mxu0 %v5310_v7  ;;  %3867 = vmatprep.subr.bf16.mxu1 %v6751_v40 }
 0x330   :  { %1638 = vmatpush1.bf16.msra.mxu0 %v4843_v50  ;;  %3868 = vmatpush3.bf16.msra.mxu1 %v4860_v56  ;;  %v6795_v50 = vld [vmem:[#allocation20_spill] sm:$0xff]  ;;  %v6800_v56 = vld [vmem:[#allocation25_spill] sm:$0xff] }
 0x331   :  { %1639 = vmatprep.subr.bf16.mxu0 %v4846_v52  ;;  %3869 = vmatprep.subr.bf16.mxu1 %v6751_v40  ;;  %v6796_v52 = vld [vmem:[#allocation21_spill] sm:$0xff] }
 0x334   :  { %1640 = vmatpush1.bf16.msra.mxu0 %v4853_v54  ;;  %3870 = vmatpush3.bf16.msra.mxu1 %v4870_v59  ;;  %v6798_v54 = vld [vmem:[#allocation23_spill] sm:$0xff]  ;;  %v6803_v59 = vld [vmem:[#allocation28_spill] sm:$0xff] }
 0x335   :  { %1641 = vmatprep.subr.bf16.mxu0 %v4858_v55  ;;  %3871 = vmatprep.subr.bf16.mxu1 %v6751_v40  ;;  %v6799_v55 = vld [vmem:[#allocation24_spill] sm:$0xff] }
 0x338   :  { %1642 = vmatpush1.bf16.msra.mxu0 %v4865_v57  ;;  %3872 = vmatpush3.bf16.msra.mxu1 %v4880_v62  ;;  %v6801_v57 = vld [vmem:[#allocation26_spill] sm:$0xff]  ;;  %v6806_v62 = vld [vmem:[#allocation31_spill] sm:$0xff] }
 0x339   :  { %1643 = vmatprep.subr.bf16.mxu0 %v4868_v58  ;;  %3873 = vmatprep.subr.bf16.mxu1 %v6751_v40  ;;  %v6802_v58 = vld [vmem:[#allocation27_spill] sm:$0xff] }
 0x33c   :  { %1644 = vmatpush1.bf16.msra.mxu0 %v4875_v60  ;;  %3874 = vmatpush3.bf16.msra.mxu1 %v4893_v2  ;;  %v6804_v60 = vld [vmem:[#allocation29_spill] sm:$0xff]  ;;  %v6809_v2 = vld [vmem:[#allocation34_spill] sm:$0xff] }
 0x33d   :  { %1645 = vmatprep.subr.bf16.mxu0 %v4878_v61  ;;  %3875 = vmatprep.subr.bf16.mxu1 %v6751_v40  ;;  %v6805_v61 = vld [vmem:[#allocation30_spill] sm:$0xff] }
 0x340   :  { %1646 = vmatpush1.bf16.msra.mxu0 %v4885_v63  ;;  %3876 = vmatpush3.bf16.msra.mxu1 %v4901_v4  ;;  %v6807_v63 = vld [vmem:[#allocation32_spill] sm:$0xff] }
 0x341   :  { %1647 = vmatprep.subr.bf16.mxu0 %v4888_v1  ;;  %3877 = vmatprep.subr.bf16.mxu1 %v6751_v40  ;;  %v6808_v1 = vld [vmem:[#allocation33_spill] sm:$0xff]  ;;  %v6811_v4 = vld [vmem:[#allocation36_spill] sm:$0xff] }
 0x344   :  { %1648 = vmatpush1.bf16.msra.mxu0 %v4897_v3  ;;  %3878 = vmatpush3.bf16.msra.mxu1 %v4906_v5  ;;  %v6810_v3 = vld [vmem:[#allocation35_spill] sm:$0xff]  ;;  %v6812_v5 = vld [vmem:[#allocation37_spill] sm:$0xff] }
 0x345   :  { %1750 = vmatprep.subr.bf16.mxu0 %v4914_v6  ;;  %1791 = vmatprep.subr.bf16.mxu1 %v6794_v49  ;;  %v6813_v6 = vld [vmem:[#allocation38_spill] sm:$0xff]  ;;  %v6815_v49 = vld [vmem:[#allocation40_spill] sm:$0xff] }
 0x347   :  { %1666 = vmatmul.mubr.bf16.vlgmr.msra.gmra.mrb[28].mxu0 %v5253_v47  ;;  %3880 = vmatmul.mubr.bf16.vlgmr.msra.gmra.mrb[28].mxu1 %v5253_v47  ;;  %v6814_v47 = vld [vmem:[#allocation39_spill] sm:$0xff] }
 0x348   :  { %1751 = vmatpush1.bf16.msra.mxu0 %v6795_v50  ;;  %1792 = vmatpush1.bf16.msra.mxu1 %v6796_v52  ;;  %v6816_v50 = vld [vmem:[#allocation41_spill] sm:$0xff]  ;;  %v6817_v52 = vld [vmem:[#allocation42_spill] sm:$0xff] }
 0x349   :  { %1752 = vmatprep.subr.bf16.mxu0 %v6797_v53  ;;  %1793 = vmatprep.subr.bf16.mxu1 %v6798_v54  ;;  %v6818_v53 = vld [vmem:[#allocation43_spill] sm:$0xff]  ;;  %v6819_v54 = vld [vmem:[#allocation44_spill] sm:$0xff] }
 0x34a   :  { %1782 = vmatprep.mubr.bf16.mxu0 %v6735_v35  ;;  %1823 = vmatprep.mubr.bf16.mxu1 %v6735_v35 }
 0x34c   :  { %1753 = vmatpush1.bf16.msra.mxu0 %v6799_v55  ;;  %1794 = vmatpush1.bf16.msra.mxu1 %v6800_v56  ;;  %v6820_v55 = vld [vmem:[#allocation45_spill] sm:$0xff]  ;;  %v6821_v56 = vld [vmem:[#allocation46_spill] sm:$0xff] }
 0x34d   :  { %1754 = vmatprep.subr.bf16.mxu0 %v6801_v57  ;;  %1795 = vmatprep.subr.bf16.mxu1 %v6802_v58  ;;  %v6822_v57 = vld [vmem:[#allocation47_spill] sm:$0xff]  ;;  %v6823_v58 = vld [vmem:[#allocation48_spill] sm:$0xff] }
 0x350   :  { %1755 = vmatpush1.bf16.msra.mxu0 %v6803_v59  ;;  %1796 = vmatpush1.bf16.msra.mxu1 %v6804_v60  ;;  %v6824_v59 = vld [vmem:[#allocation49_spill] sm:$0xff]  ;;  %v6825_v60 = vld [vmem:[#allocation50_spill] sm:$0xff] }
 0x351   :  { %1756 = vmatprep.subr.bf16.mxu0 %v6805_v61  ;;  %1797 = vmatprep.subr.bf16.mxu1 %v6806_v62  ;;  %v6826_v61 = vld [vmem:[#allocation51_spill] sm:$0xff] }
 0x354   :  { %1757 = vmatpush1.bf16.msra.mxu0 %v6807_v63  ;;  %1798 = vmatpush1.bf16.msra.mxu1 %v6808_v1 }
 0x355   :  { %1758 = vmatprep.subr.bf16.mxu0 %v6809_v2  ;;  %1799 = vmatprep.subr.bf16.mxu1 %v6810_v3 }
 0x358   :  { %1759 = vmatpush1.bf16.msra.mxu0 %v6811_v4  ;;  %1800 = vmatpush1.bf16.msra.mxu1 %v6812_v5 }
 0x359   :  { %1760 = vmatprep.subr.bf16.mxu0 %v6813_v6  ;;  %1801 = vmatprep.subr.bf16.mxu1 %v6814_v47 }
 0x35c   :  { %1761 = vmatpush1.bf16.msra.mxu0 %v6815_v49  ;;  %1802 = vmatpush1.bf16.msra.mxu1 %v6816_v50 }
 0x35d   :  { %1762 = vmatprep.subr.bf16.mxu0 %v6817_v52  ;;  %1803 = vmatprep.subr.bf16.mxu1 %v6818_v53 }
 0x360   :  { %1763 = vmatpush1.bf16.msra.mxu0 %v6819_v54  ;;  %1804 = vmatpush1.bf16.msra.mxu1 %v6820_v55 }
 0x361   :  { %1764 = vmatprep.subr.bf16.mxu0 %v6821_v56  ;;  %1805 = vmatprep.subr.bf16.mxu1 %v6822_v57 }
 0x364   :  { %1765 = vmatpush1.bf16.msra.mxu0 %v6823_v58  ;;  %1806 = vmatpush1.bf16.msra.mxu1 %v6824_v59 }
 0x365   :  { %1832 = vmatprep.subr.bf16.mxu0 %v6825_v60  ;;  %1873 = vmatprep.subr.bf16.mxu1 %v6826_v61 }
 0x3da   :  { %v1484_v62 = vpop.f32.mrb[20].mxu0  ;;  %v1525_v63 = vpop.f32.mrb[20].mxu1 }
 0x3db   :  { %v1486_v1 = vpop.f32.mrb[21].mxu0  ;;  %v1527_v2 = vpop.f32.mrb[21].mxu1 }
 0x3dc   :  { %v1488_v3 = vpop.f32.mrb[22].mxu0  ;;  %v1529_v4 = vpop.f32.mrb[22].mxu1 }
 0x3dd   :  { %v1489_v5 = vpop.f32.mrb[23].mxu0  ;;  %v1530_v6 = vpop.f32.mrb[23].mxu1  ;;  %v6827_v3 = vld [vmem:[#allocation70_spill] sm:$0xff] }
 0x3fa   :  { %v1566_v47 = vpop.f32.mrb[24].mxu0  ;;  %v1607_v49 = vpop.f32.mrb[24].mxu1 }
 0x3fb   :  { %v1567_v50 = vadd.f32 %v1566_v47, %v1484_v62  ;;  %v1608_v52 = vadd.f32 %v1607_v49, %v1525_v63  ;;  %v1568_v53 = vpop.f32.mrb[25].mxu0  ;;  %v1609_v54 = vpop.f32.mrb[25].mxu1  ;;  %v6828_v62 = vld [vmem:[#allocation71_spill] sm:$0xff] }
 0x3fc   :  { %v1569_v55 = vadd.f32 %v1568_v53, %v1486_v1  ;;  %v1610_v56 = vadd.f32 %v1609_v54, %v1527_v2  ;;  %v1570_v57 = vpop.f32.mrb[26].mxu0  ;;  %v1611_v58 = vpop.f32.mrb[26].mxu1 }
 0x3fd   :  { %v1614_v59 = vadd.f32 %v1567_v50, %v5225_v23  ;;  %v1571_v60 = vpop.f32.mrb[27].mxu0  ;;  %v1612_v61 = vpop.f32.mrb[27].mxu1  ;;  %v1616_v1 = vadd.f32 %v1608_v52, %v5238_v20 }
 0x3fe   :  { %v1615_v4 = vadd.f32 %v1569_v55, %v6827_v3  ;;  %v1617_v63 = vadd.f32 %v1610_v56, %v6828_v62 }
 0x3ff   :  { %v1618_v7 = vmul.f32 0.5, %v1614_v59 }
 0x400   :  { %v1622_v5 = vmul.f32 0.5, %v1615_v4 }
 0x401   :  { %4225 = vtanh.f32 %v1618_v7 }
 0x402   :  { %4227 = vtanh.f32 %v1622_v5 }
 0x40b   :  { %v4226_v6 = vpop.eup %4225 }
 0x40c   :  { %v1620_v48 = vmul.f32 0.5, %v4226_v6  ;;  %v4228_v53 = vpop.eup %4227 }
 0x40d   :  { %v1624_v57 = vmul.f32 0.5, %v4228_v53 }
 0x40e   :  { %v1621_v47 = vadd.f32 0.5, %v1620_v48 }
 0x40f   :  { %v1625_v48 = vadd.f32 0.5, %v1624_v57 }
 0x410   :  { %v1626_v2 = vmul.f32 %v1621_v47, %v1617_v63 }
 0x412   :  { %v1627_v49 = vadd.f32 %v1626_v2, %v1616_v1 }
 0x414   :  { %4229 = vtanh.f32 %v1627_v49 }
 0x41a   :  { %v1667_v50 = vpop.f32.mrb[28].mxu0  ;;  %v1708_v54 = vpop.f32.mrb[28].mxu1 }
 0x41b   :  { %v1715_v58 = vrot.slane %v1667_v50, 6  ;;  %v1669_v7 = vpop.f32.mrb[29].mxu0  ;;  %v3881_v59 = vpop.f32.mrb[29].mxu1  ;;  %v1730_v2 = vadd.f32 %v1708_v54, %v5037_v46 }
 0x41c   :  { %v1671_v55 = vpop.f32.mrb[30].mxu0  ;;  %v1711_v60 = vpop.f32.mrb[30].mxu1  ;;  %v1723_v1 = vrot.slane %v1669_v7, 6 }
 0x41d   :  { %v1717_v61 = vadd.f32 %v1715_v58, %v6773_v18  ;;  %v1672_v4 = vpop.f32.mrb[31].mxu0  ;;  %v3882_v5 = vpop.f32.mrb[31].mxu1  ;;  %v1732_v58 = vrot.slane %v1730_v2, 6  ;;  %v5526_v2 = vld [vmem:[#allocation8 + $0x28] ss:$16 sps:$4 sm:$0xff]  }
 0x41e   :  { %v4230_v56 = vpop.eup %4229  ;;  %v1725_v49 = vadd.f32 %v1723_v1, %v6775_v51  ;;  %v5523_v1 = vld [vmem:[#allocation8 + $0x20] ss:$16 sps:$4 sm:$0xff]   ;;  %6849 = vst [vmem:[#allocation22_spill] sm:$0xff] %v5526_v2 }
 0x41f   :  { %v1718_v6 = vmul.f32 0.5, %v1717_v61  ;;  %v1629_v52 = vsub.f32 %v5243_v10, %v4230_v56  ;;  %6848 = vst [vmem:[#allocation21_spill] sm:$0xff] %v5523_v1  ;;  %v5589_v10 = vld [vmem:[#allocation8 + $0xe4] ss:$16 sps:$4 sm:$0xff]  }
 0x420   :  { %v1726_v55 = vmul.f32 0.5, %v1725_v49  ;;  %v5529_v49 = vld [vmem:[#allocation8 + $0x44] ss:$16 sps:$4 sm:$0xff]   ;;  %6870 = vst [vmem:[#allocation43_spill] sm:$0xff] %v5589_v10 }
 0x421   :  { %4231 = vtanh.f32 %v1718_v6  ;;  %v1630_v63 = vmul.f32 %v1629_v52, %v1625_v48  ;;  %6850 = vst [vmem:[#allocation23_spill] sm:$0xff] %v5529_v49 }
 0x422   :  { %4233 = vtanh.f32 %v1726_v55  ;;  %v5544_v55 = vld [vmem:[#allocation8 + $0x6c] ss:$16 sps:$4 sm:$0xff]  }
 0x423   :  { %v5380_v47 = vadd.f32 %v4230_v56, %v1630_v63  ;;  %6855 = vst [vmem:[#allocation28_spill] sm:$0xff] %v5544_v55 }
 0x425   :  { %6829 = vst [vmem:[#allocation56_spill] sm:$0xff] %v5380_v47 }
 0x42b   :  { %v4232_v53 = vpop.eup %4231 }
 0x42c   :  { %v1720_v50 = vmul.f32 0.5, %v4232_v53  ;;  %v4234_v61 = vpop.eup %4233  ;;  %v5532_v53 = vld [vmem:[#allocation8 + $0x4c] ss:$16 sps:$4 sm:$0xff]  }
 0x42d   :  { %v1728_v5 = vmul.f32 0.5, %v4234_v61  ;;  %6851 = vst [vmem:[#allocation24_spill] sm:$0xff] %v5532_v53  ;;  %v5553_v61 = vld [vmem:[#allocation8 + $0x84] ss:$16 sps:$4 sm:$0xff]  }
 0x42e   :  { %v1721_v59 = vadd.f32 0.5, %v1720_v50  ;;  %v5535_v50 = vld [vmem:[#allocation8 + $0x40] ss:$16 sps:$4 sm:$0xff]   ;;  %6858 = vst [vmem:[#allocation31_spill] sm:$0xff] %v5553_v61 }
 0x42f   :  { %v1729_v48 = vadd.f32 0.5, %v1728_v5  ;;  %6852 = vst [vmem:[#allocation25_spill] sm:$0xff] %v5535_v50  ;;  %v5559_v5 = vld [vmem:[#allocation8 + $0x80] ss:$16 sps:$4 sm:$0xff]  }
 0x430   :  { %v1734_v60 = vmul.f32 %v1732_v58, %v1721_v59  ;;  %v5538_v59 = vld [vmem:[#allocation8 + $0x48] ss:$16 sps:$4 sm:$0xff]   ;;  %v5541_v58 = vld [vmem:[#allocation8 + $0x64] ss:$16 sps:$4 sm:$0xff]   ;;  %6860 = vst [vmem:[#allocation33_spill] sm:$0xff] %v5559_v5 }
 0x431   :  { %6853 = vst [vmem:[#allocation26_spill] sm:$0xff] %v5538_v59  ;;  %6854 = vst [vmem:[#allocation27_spill] sm:$0xff] %v5541_v58 }
 0x432   :  { %v1735_v57 = vadd.f32 %v1734_v60, %v5042_v30  ;;  %v5547_v60 = vld [vmem:[#allocation8 + $0x60] ss:$16 sps:$4 sm:$0xff]  }
 0x433   :  { %6856 = vst [vmem:[#allocation29_spill] sm:$0xff] %v5547_v60 }
 0x434   :  { %4235 = vtanh.f32 %v1735_v57  ;;  %v5550_v57 = vld [vmem:[#allocation8 + $0x68] ss:$16 sps:$4 sm:$0xff]  }
 0x435   :  { %6857 = vst [vmem:[#allocation30_spill] sm:$0xff] %v5550_v57 }
 0x43e   :  { %v4236_v4 = vpop.eup %4235 }
 0x43f   :  { %v1738_v56 = vrot.slane %v4236_v4, 1 }
 0x441   :  { %v1740_v7 = vsub.f32 %v5249_v9, %v1738_v56  ;;  %v5468_v9 = vld [vmem:[#allocation7 + $0x68] ss:$12 sps:$4 sm:$0xff]  }
 0x442   :  { %v5562_v56 = vld [vmem:[#allocation8 + $0x88] ss:$16 sps:$4 sm:$0xff]  }
 0x443   :  { %v1742_v46 = vrot.slane %v1740_v7, 7  ;;  %6861 = vst [vmem:[#allocation34_spill] sm:$0xff] %v5562_v56  ;;  %v5565_v7 = vld [vmem:[#allocation8 + $0xa4] ss:$16 sps:$4 sm:$0xff]  }
 0x444   :  { %6862 = vst [vmem:[#allocation35_spill] sm:$0xff] %v5565_v7 }
 0x445   :  { %v1744_v54 = vmul.f32 %v1742_v46, %v1729_v48  ;;  %v5568_v48 = vld [vmem:[#allocation8 + $0xac] ss:$16 sps:$4 sm:$0xff]   ;;  %v5571_v46 = vld [vmem:[#allocation8 + $0xa0] ss:$16 sps:$4 sm:$0xff]  }
 0x446   :  { %6863 = vst [vmem:[#allocation36_spill] sm:$0xff] %v5568_v48  ;;  %6864 = vst [vmem:[#allocation37_spill] sm:$0xff] %v5571_v46 }
 0x447   :  { %v5386_v6 = vadd.f32 %v4236_v4, %v1744_v54  ;;  %v5556_v4 = vld [vmem:[#allocation8 + $0x8c] ss:$16 sps:$4 sm:$0xff]   ;;  %v5574_v54 = vld [vmem:[#allocation8 + $0xa8] ss:$16 sps:$4 sm:$0xff]  }
 0x448   :  { %6859 = vst [vmem:[#allocation32_spill] sm:$0xff] %v5556_v4  ;;  %6865 = vst [vmem:[#allocation38_spill] sm:$0xff] %v5574_v54 }
 0x449   :  { %v1746_v52 = vpack.c.bf16 %v5386_v6, %v5386_v6 }
 0x44b   :  { %v5390_v63 = vrot.slane %v1746_v52, 1  ;;  %v5577_v52 = vld [vmem:[#allocation8 + $0xc4] ss:$16 sps:$4 sm:$0xff]  }
 0x44c   :  { %6866 = vst [vmem:[#allocation39_spill] sm:$0xff] %v5577_v52 }
 0x44d   :  { %1783 = vmatmul.mubr.bf16.vlgmr.msra.gmra.mrb[32].mxu0 %v5390_v63  ;;  %1824 = vmatmul.mubr.bf16.vlgmr.msra.gmra.mrb[32].mxu1 %v5390_v63 }
 0x44e   :  { %1833 = vmatpush1.bf16.msra.mxu0 %v5047_v37  ;;  %1874 = vmatpush1.bf16.msra.mxu1 %v5049_v0  ;;  %v6830_v37 = vld [vmem:[#allocation69_spill] sm:$0xff]  ;;  %v1632_v0 = vpack.c.bf16 %v5380_v47, %v5380_v47 }
 0x44f   :  { %1834 = vmatprep.subr.bf16.mxu0 %v5055_v29  ;;  %1875 = vmatprep.subr.bf16.mxu1 %v5057_v36  ;;  %v6831_v29 = vld [vmem:[#allocation53_spill] sm:$0xff]  ;;  %v6832_v36 = vld [vmem:[#allocation54_spill] sm:$0xff] }
 0x450   :  { %1864 = vmatprep.mubr.bf16.mxu0 %v6735_v35  ;;  %1905 = vmatprep.mubr.bf16.mxu1 %v6735_v35 }
 0x452   :  { %1835 = vmatpush1.bf16.msra.mxu0 %v5063_v25  ;;  %1876 = vmatpush1.bf16.msra.mxu1 %v5065_v26  ;;  %v5440_v25 = vld [vmem:[#allocation7 + $0x20] ss:$12 sps:$4 sm:$0xff]  }
 0x453   :  { %1836 = vmatprep.subr.bf16.mxu0 %v5069_v38  ;;  %1877 = vmatprep.subr.bf16.mxu1 %v6776_v24  ;;  %v6833_v26 = vld [vmem:[#allocation55_spill] sm:$0xff]  ;;  %v5445_v38 = vld [vmem:[#allocation7 + $0x30] ss:$12 sps:$4 sm:$0xff]  }
 0x454   :  { %v5471_v24 = vld [vmem:[#allocation7 + $0x7c] ss:$12 sps:$4 sm:$0xff]  }
 0x456   :  { %1837 = vmatpush1.bf16.msra.mxu0 %v6777_v17  ;;  %1878 = vmatpush1.bf16.msra.mxu1 %v6778_v12  ;;  %v5475_v17 = vld [vmem:[#allocation7 + $0x78] ss:$12 sps:$4 sm:$0xff]   ;;  %v5478_v12 = vld [vmem:[#allocation7 + $0x80] ss:$12 sps:$4 sm:$0xff]  }
 0x457   :  { %1838 = vmatprep.subr.bf16.mxu0 %v6779_v19  ;;  %1879 = vmatprep.subr.bf16.mxu1 %v6780_v32  ;;  %6834 = vst [vmem:[#allocation57_spill] sm:$0xff] %v5475_v17  ;;  %6835 = vst [vmem:[#allocation58_spill] sm:$0xff] %v5478_v12  ;;  %v5481_v19 = vld [vmem:[#allocation7 + $0x94] ss:$12 sps:$4 sm:$0xff]   ;;  %v5485_v32 = vld [vmem:[#allocation7 + $0x90] ss:$12 sps:$4 sm:$0xff]  }
 0x458   :  { %6836 = vst [vmem:[#allocation59_spill] sm:$0xff] %v5481_v19  ;;  %6837 = vst [vmem:[#allocation60_spill] sm:$0xff] %v5485_v32 }
 0x45a   :  { %1839 = vmatpush1.bf16.msra.mxu0 %v6781_v41  ;;  %1880 = vmatpush1.bf16.msra.mxu1 %v6782_v16  ;;  %v5488_v41 = vld [vmem:[#allocation7 + $0x98] ss:$12 sps:$4 sm:$0xff]  }
 0x45b   :  { %1840 = vmatprep.subr.bf16.mxu0 %v6783_v14  ;;  %1881 = vmatprep.subr.bf16.mxu1 %v6784_v43  ;;  %6838 = vst [vmem:[#allocation61_spill] sm:$0xff] %v5488_v41  ;;  %v5491_v16 = vld [vmem:[#allocation7 + $0xac] ss:$12 sps:$4 sm:$0xff]   ;;  %v5495_v14 = vld [vmem:[#allocation7 + $0xa8] ss:$12 sps:$4 sm:$0xff]  }
 0x45c   :  { %6839 = vst [vmem:[#allocation62_spill] sm:$0xff] %v5491_v16  ;;  %6840 = vst [vmem:[#allocation63_spill] sm:$0xff] %v5495_v14  ;;  %v5498_v43 = vld [vmem:[#allocation7 + $0xb0] ss:$12 sps:$4 sm:$0xff]  }
 0x45d   :  { %6841 = vst [vmem:[#allocation64_spill] sm:$0xff] %v5498_v43 }
 0x45e   :  { %1841 = vmatpush1.bf16.msra.mxu0 %v6785_v21  ;;  %1882 = vmatpush1.bf16.msra.mxu1 %v6786_v45  ;;  %v5501_v21 = vld [vmem:[#allocation8 + $0x4] ss:$16 sps:$4 sm:$0xff]   ;;  %v5504_v45 = vld [vmem:[#allocation8 + $0xc] ss:$16 sps:$4 sm:$0xff]  }
 0x45f   :  { %1842 = vmatprep.subr.bf16.mxu0 %v6787_v13  ;;  %1883 = vmatprep.subr.bf16.mxu1 %v6788_v11  ;;  %6842 = vst [vmem:[#allocation65_spill] sm:$0xff] %v5501_v21  ;;  %6843 = vst [vmem:[#allocation66_spill] sm:$0xff] %v5504_v45  ;;  %v5509_v13 = vld [vmem:[#allocation8] ss:$16 sps:$4 sm:$0xff]   ;;  %v5512_v11 = vld [vmem:[#allocation8 + $0x8] ss:$16 sps:$4 sm:$0xff]  }
 0x460   :  { %6844 = vst [vmem:[#allocation67_spill] sm:$0xff] %v5509_v13  ;;  %6845 = vst [vmem:[#allocation68_spill] sm:$0xff] %v5512_v11 }
 0x462   :  { %1843 = vmatpush1.bf16.msra.mxu0 %v6789_v22  ;;  %1884 = vmatpush1.bf16.msra.mxu1 %v5115_v34  ;;  %v5461_v34 = vld [vmem:[#allocation7 + $0x64] ss:$12 sps:$4 sm:$0xff]  }
 0x463   :  { %1844 = vmatprep.subr.bf16.mxu0 %v5119_v39  ;;  %1885 = vmatprep.subr.bf16.mxu1 %v6790_v15  ;;  %v5465_v39 = vld [vmem:[#allocation7 + $0x60] ss:$12 sps:$4 sm:$0xff]   ;;  %v5515_v22 = vld [vmem:[#allocation8 + $0x24] ss:$16 sps:$4 sm:$0xff]  }
 0x464   :  { %6846 = vst [vmem:[#allocation19_spill] sm:$0xff] %v5515_v22  ;;  %v5518_v15 = vld [vmem:[#allocation8 + $0x2c] ss:$16 sps:$4 sm:$0xff]  }
 0x465   :  { %6847 = vst [vmem:[#allocation20_spill] sm:$0xff] %v5518_v15 }
 0x466   :  { %1845 = vmatpush1.bf16.msra.mxu0 %v5125_v31  ;;  %1886 = vmatpush1.bf16.msra.mxu1 %v5127_v44  ;;  %v5431_v31 = vld [vmem:[#allocation7 + $0x8] ss:$12 sps:$4 sm:$0xff]   ;;  %v5448_v44 = vld [vmem:[#allocation7 + $0x38] ss:$12 sps:$4 sm:$0xff]  }
 0x467   :  { %1846 = vmatprep.subr.bf16.mxu0 %v5131_v33  ;;  %1887 = vmatprep.subr.bf16.mxu1 %v5133_v27  ;;  %v5451_v33 = vld [vmem:[#allocation7 + $0x4c] ss:$12 sps:$4 sm:$0xff]   ;;  %v5455_v27 = vld [vmem:[#allocation7 + $0x48] ss:$12 sps:$4 sm:$0xff]  }
 0x46a   :  { %1847 = vmatpush1.bf16.msra.mxu0 %v6830_v37  ;;  %1888 = vmatpush1.bf16.msra.mxu1 %v5139_v42  ;;  %v5458_v42 = vld [vmem:[#allocation7 + $0x50] ss:$12 sps:$4 sm:$0xff]  }
 0x46b   :  { %1933 = vmatprep.subr.bf16.mxu0 %v6831_v29  ;;  %3883 = vmatprep.subr.bf16.mxu1 %v6751_v40  ;;  %v5583_v37 = vld [vmem:[#allocation8 + $0xc0] ss:$16 sps:$4 sm:$0xff]  }
 0x46c   :  { %6868 = vst [vmem:[#allocation41_spill] sm:$0xff] %v5583_v37 }
 0x46d   :  { %1865 = vmatmul.mubr.bf16.vlgmr.msra.gmra.mrb[36].mxu0 %v1632_v0  ;;  %1906 = vmatmul.mubr.bf16.vlgmr.msra.gmra.mrb[36].mxu1 %v1632_v0  ;;  %v5586_v0 = vld [vmem:[#allocation8 + $0xc8] ss:$16 sps:$4 sm:$0xff]  }
 0x46e   :  { %1934 = vmatpush1.bf16.msra.mxu0 %v5295_v8  ;;  %3884 = vmatpush3.bf16.msra.mxu1 %v5431_v31  ;;  %6869 = vst [vmem:[#allocation42_spill] sm:$0xff] %v5586_v0 }
 0x46f   :  { %1935 = vmatprep.subr.bf16.mxu0 %v5299_v28  ;;  %3885 = vmatprep.subr.bf16.mxu1 %v6751_v40 }
 0x470   :  { %1965 = vmatprep.mubr.bf16.mxu0 %v6735_v35  ;;  %3899 = vmatprep.mubr.msk.bf16.mxu1 %vm4659_vm1, %v6751_v40 }
 0x472   :  { %1936 = vmatpush1.bf16.msra.mxu0 %v6832_v36  ;;  %3886 = vmatpush3.bf16.msra.mxu1 %v5440_v25 }
 0x473   :  { %1937 = vmatprep.subr.bf16.mxu0 %v6833_v26  ;;  %3887 = vmatprep.subr.bf16.mxu1 %v6751_v40 }
 0x476   :  { %1938 = vmatpush1.bf16.msra.mxu0 %v5445_v38  ;;  %3888 = vmatpush3.bf16.msra.mxu1 %v5448_v44 }
 0x477   :  { %1939 = vmatprep.subr.bf16.mxu0 %v5451_v33  ;;  %3889 = vmatprep.subr.bf16.mxu1 %v6751_v40 }
 0x47a   :  { %1940 = vmatpush1.bf16.msra.mxu0 %v5455_v27  ;;  %3890 = vmatpush3.bf16.msra.mxu1 %v5458_v42 }
 0x47b   :  { %1941 = vmatprep.subr.bf16.mxu0 %v5461_v34  ;;  %3891 = vmatprep.subr.bf16.mxu1 %v6751_v40 }
 0x47e   :  { %1942 = vmatpush1.bf16.msra.mxu0 %v5465_v39  ;;  %3892 = vmatpush3.bf16.msra.mxu1 %v5468_v9 }
 0x47f   :  { %1943 = vmatprep.subr.bf16.mxu0 %v5471_v24  ;;  %3893 = vmatprep.subr.bf16.mxu1 %v6751_v40 }
 0x482   :  { %1944 = vmatpush1.bf16.msra.mxu0 %v5475_v17  ;;  %3894 = vmatpush3.bf16.msra.mxu1 %v5478_v12 }
 0x483   :  { %1945 = vmatprep.subr.bf16.mxu0 %v5481_v19  ;;  %3895 = vmatprep.subr.bf16.mxu1 %v6751_v40 }
 0x486   :  { %1946 = vmatpush1.bf16.msra.mxu0 %v5485_v32  ;;  %3896 = vmatpush3.bf16.msra.mxu1 %v5488_v41 }
 0x487   :  { %1947 = vmatprep.subr.bf16.mxu0 %v5491_v16  ;;  %3897 = vmatprep.subr.bf16.mxu1 %v6751_v40 }
 0x48a   :  { %1948 = vmatpush1.bf16.msra.mxu0 %v5495_v14  ;;  %3898 = vmatpush3.bf16.msra.mxu1 %v5498_v43 }
 0x48b   :  { %2052 = vmatprep.subr.bf16.mxu0 %v5501_v21  ;;  %2093 = vmatprep.subr.bf16.mxu1 %v5504_v45 }
 0x48d   :  { %1966 = vmatmul.mubr.bf16.vlgmr.msra.gmra.mrb[40].mxu0 %v5390_v63  ;;  %3900 = vmatmul.mubr.bf16.vlgmr.msra.gmra.mrb[40].mxu1 %v5390_v63  ;;  %v5580_v63 = vld [vmem:[#allocation8 + $0xcc] ss:$16 sps:$4 sm:$0xff]  }
 0x48e   :  { %2053 = vmatpush1.bf16.msra.mxu0 %v5509_v13  ;;  %2094 = vmatpush1.bf16.msra.mxu1 %v5512_v11  ;;  %6867 = vst [vmem:[#allocation40_spill] sm:$0xff] %v5580_v63 }
 0x48f   :  { %2054 = vmatprep.subr.bf16.mxu0 %v5515_v22  ;;  %2095 = vmatprep.subr.bf16.mxu1 %v5518_v15 }
 0x490   :  { %2084 = vmatprep.mubr.bf16.mxu0 %v6735_v35  ;;  %2125 = vmatprep.mubr.bf16.mxu1 %v6735_v35 }
 0x492   :  { %2055 = vmatpush1.bf16.msra.mxu0 %v5523_v1  ;;  %2096 = vmatpush1.bf16.msra.mxu1 %v5526_v2 }
 0x493   :  { %2056 = vmatprep.subr.bf16.mxu0 %v5529_v49  ;;  %2097 = vmatprep.subr.bf16.mxu1 %v5532_v53 }
 0x496   :  { %2057 = vmatpush1.bf16.msra.mxu0 %v5535_v50  ;;  %2098 = vmatpush1.bf16.msra.mxu1 %v5538_v59 }
 0x497   :  { %2058 = vmatprep.subr.bf16.mxu0 %v5541_v58  ;;  %2099 = vmatprep.subr.bf16.mxu1 %v5544_v55 }
 0x49a   :  { %2059 = vmatpush1.bf16.msra.mxu0 %v5547_v60  ;;  %2100 = vmatpush1.bf16.msra.mxu1 %v5550_v57 }
 0x49b   :  { %2060 = vmatprep.subr.bf16.mxu0 %v5553_v61  ;;  %2101 = vmatprep.subr.bf16.mxu1 %v5556_v4 }
 0x49e   :  { %2061 = vmatpush1.bf16.msra.mxu0 %v5559_v5  ;;  %2102 = vmatpush1.bf16.msra.mxu1 %v5562_v56 }
 0x49f   :  { %2062 = vmatprep.subr.bf16.mxu0 %v5565_v7  ;;  %2103 = vmatprep.subr.bf16.mxu1 %v5568_v48 }
 0x4a2   :  { %2063 = vmatpush1.bf16.msra.mxu0 %v5571_v46  ;;  %2104 = vmatpush1.bf16.msra.mxu1 %v5574_v54  ;;  %v5592_v54 = vld [vmem:[#allocation8 + $0xec] ss:$16 sps:$4 sm:$0xff]  }
 0x4a3   :  { %2064 = vmatprep.subr.bf16.mxu0 %v5577_v52  ;;  %2105 = vmatprep.subr.bf16.mxu1 %v5580_v63  ;;  %6871 = vst [vmem:[#allocation44_spill] sm:$0xff] %v5592_v54  ;;  %v5595_v52 = vld [vmem:[#allocation8 + $0xe0] ss:$16 sps:$4 sm:$0xff]   ;;  %v5598_v63 = vld [vmem:[#allocation8 + $0xe8] ss:$16 sps:$4 sm:$0xff]  }
 0x4a4   :  { %6872 = vst [vmem:[#allocation45_spill] sm:$0xff] %v5595_v52  ;;  %6873 = vst [vmem:[#allocation46_spill] sm:$0xff] %v5598_v63 }
 0x4a6   :  { %2065 = vmatpush1.bf16.msra.mxu0 %v5583_v37  ;;  %2106 = vmatpush1.bf16.msra.mxu1 %v5586_v0  ;;  %v5601_v37 = vld [vmem:[#allocation10 + $0x4] ss:$16 sps:$4 sm:$0xff]   ;;  %v5604_v0 = vld [vmem:[#allocation10 + $0xc] ss:$16 sps:$4 sm:$0xff]  }
 0x4a7   :  { %2066 = vmatprep.subr.bf16.mxu0 %v5589_v10  ;;  %2107 = vmatprep.subr.bf16.mxu1 %v5592_v54  ;;  %6874 = vst [vmem:[#allocation47_spill] sm:$0xff] %v5601_v37  ;;  %6875 = vst [vmem:[#allocation48_spill] sm:$0xff] %v5604_v0 }
 0x4aa   :  { %2067 = vmatpush1.bf16.msra.mxu0 %v5595_v52  ;;  %2108 = vmatpush1.bf16.msra.mxu1 %v5598_v63 }
 0x4ab   :  { %2134 = vmatprep.subr.bf16.mxu0 %v5601_v37  ;;  %2175 = vmatprep.subr.bf16.mxu1 %v5604_v0 }
 0x520   :  { %v1784_v10 = vpop.f32.mrb[32].mxu0  ;;  %v1825_v46 = vpop.f32.mrb[32].mxu1 }
 0x521   :  { %v1786_v48 = vpop.f32.mrb[33].mxu0  ;;  %v1827_v54 = vpop.f32.mrb[33].mxu1 }
 0x522   :  { %v1788_v7 = vpop.f32.mrb[34].mxu0  ;;  %v1829_v56 = vpop.f32.mrb[34].mxu1 }
 0x523   :  { %v1789_v5 = vpop.f32.mrb[35].mxu0  ;;  %v1830_v52 = vpop.f32.mrb[35].mxu1 }
 0x540   :  { %v1866_v4 = vpop.f32.mrb[36].mxu0  ;;  %v1907_v61 = vpop.f32.mrb[36].mxu1 }
 0x541   :  { %v1867_v57 = vadd.f32 %v1866_v4, %v1784_v10  ;;  %v1908_v63 = vadd.f32 %v1907_v61, %v1825_v46  ;;  %v1868_v60 = vpop.f32.mrb[37].mxu0  ;;  %v1909_v55 = vpop.f32.mrb[37].mxu1 }
 0x542   :  { %v1869_v58 = vadd.f32 %v1868_v60, %v1786_v48  ;;  %v1910_v37 = vadd.f32 %v1909_v55, %v1827_v54  ;;  %v1870_v59 = vpop.f32.mrb[38].mxu0  ;;  %v1911_v50 = vpop.f32.mrb[38].mxu1 }
 0x543   :  { %v1914_v0 = vadd.f32 %v1867_v57, %v5225_v23  ;;  %v1871_v53 = vpop.f32.mrb[39].mxu0  ;;  %v1912_v49 = vpop.f32.mrb[39].mxu1  ;;  %v1916_v60 = vadd.f32 %v1908_v63, %v5238_v20 }
 0x544   :  { %v1915_v56 = vadd.f32 %v1869_v58, %v6827_v3  ;;  %v1917_v10 = vadd.f32 %v1910_v37, %v6828_v62 }
 0x545   :  { %v1918_v2 = vmul.f32 0.5, %v1914_v0 }
 0x546   :  { %v1922_v5 = vmul.f32 0.5, %v1915_v56 }
 0x547   :  { %4237 = vtanh.f32 %v1918_v2 }
 0x548   :  { %4239 = vtanh.f32 %v1922_v5 }
 0x551   :  { %v4238_v7 = vpop.eup %4237 }
 0x552   :  { %v1920_v52 = vmul.f32 0.5, %v4238_v7  ;;  %v4240_v50 = vpop.eup %4239 }
 0x553   :  { %v1924_v49 = vmul.f32 0.5, %v4240_v50 }
 0x554   :  { %v1921_v61 = vadd.f32 0.5, %v1920_v52 }
 0x555   :  { %v1925_v5 = vadd.f32 0.5, %v1924_v49 }
 0x556   :  { %v1926_v55 = vmul.f32 %v1921_v61, %v1917_v10 }
 0x558   :  { %v1927_v59 = vadd.f32 %v1926_v55, %v1916_v60  ;;  %v5618_v60 = vld [vmem:[%s6448_s4] sm:$0x1] }
 0x55a   :  { %4241 = vtanh.f32 %v1927_v59 }
 0x560   :  { %v1967_v57 = vpop.f32.mrb[40].mxu0  ;;  %v2008_v53 = vpop.f32.mrb[40].mxu1 }
 0x561   :  { %v2015_v4 = vrot.slane %v1967_v57, 5  ;;  %v1969_v2 = vpop.f32.mrb[41].mxu0  ;;  %v3901_v48 = vpop.f32.mrb[41].mxu1  ;;  %v2030_v55 = vadd.f32 %v5618_v60, %v2008_v53 }
 0x562   :  { %v1971_v58 = vpop.f32.mrb[42].mxu0  ;;  %v2011_v46 = vpop.f32.mrb[42].mxu1  ;;  %v2023_v61 = vrot.slane %v1969_v2, 5 }
 0x563   :  { %v2017_v54 = vadd.f32 %v2015_v4, %v6773_v18  ;;  %v1972_v0 = vpop.f32.mrb[43].mxu0  ;;  %v3902_v56 = vpop.f32.mrb[43].mxu1  ;;  %v2032_v4 = vrot.slane %v2030_v55, 5 }
 0x564   :  { %v4242_v37 = vpop.eup %4241  ;;  %v2025_v59 = vadd.f32 %v2023_v61, %v6775_v51 }
 0x565   :  { %v2018_v7 = vmul.f32 0.5, %v2017_v54  ;;  %v1929_v63 = vsub.f32 %v5380_v47, %v4242_v37  ;;  %v5691_v47 = vld [vmem:[#allocation10 + $0xac] ss:$16 sps:$4 sm:$0xff]  }
 0x566   :  { %v2026_v48 = vmul.f32 0.5, %v2025_v59  ;;  %v5632_v59 = vld [vmem:[#allocation10] ss:$16 sps:$4 sm:$0xff]   ;;  %6882 = vst [vmem:[#allocation53_spill] sm:$0xff] %v5691_v47 }
 0x567   :  { %4243 = vtanh.f32 %v2018_v7  ;;  %v1930_v52 = vmul.f32 %v1929_v63, %v1925_v5 }
 0x568   :  { %4245 = vtanh.f32 %v2026_v48  ;;  %v5652_v48 = vld [vmem:[#allocation10 + $0x44] ss:$16 sps:$4 sm:$0xff]  }
 0x569   :  { %v5613_v10 = vadd.f32 %v4242_v37, %v1930_v52 }
 0x56b   :  { %6876 = vst [vmem:[#allocation49_spill] sm:$0xff] %v5613_v10 }
 0x571   :  { %v4244_v50 = vpop.eup %4243 }
 0x572   :  { %v2020_v57 = vmul.f32 0.5, %v4244_v50  ;;  %v4246_v2 = vpop.eup %4245  ;;  %v5638_v50 = vld [vmem:[#allocation10 + $0x24] ss:$16 sps:$4 sm:$0xff]  }
 0x573   :  { %v2028_v0 = vmul.f32 0.5, %v4246_v2  ;;  %v5661_v2 = vld [vmem:[#allocation10 + $0x48] ss:$16 sps:$4 sm:$0xff]  }
 0x574   :  { %v2021_v49 = vadd.f32 0.5, %v2020_v57  ;;  %v5641_v57 = vld [vmem:[#allocation10 + $0x2c] ss:$16 sps:$4 sm:$0xff]  }
 0x575   :  { %v2029_v5 = vadd.f32 0.5, %v2028_v0  ;;  %v5667_v0 = vld [vmem:[#allocation10 + $0x6c] ss:$16 sps:$4 sm:$0xff]  }
 0x576   :  { %v2034_v58 = vmul.f32 %v2032_v4, %v2021_v49  ;;  %v5646_v49 = vld [vmem:[#allocation10 + $0x20] ss:$16 sps:$4 sm:$0xff]   ;;  %v5649_v4 = vld [vmem:[#allocation10 + $0x28] ss:$16 sps:$4 sm:$0xff]  }
 0x578   :  { %v2035_v46 = vadd.f32 %v2034_v58, %v5042_v30  ;;  %v5655_v58 = vld [vmem:[#allocation10 + $0x4c] ss:$16 sps:$4 sm:$0xff]  }
 0x57a   :  { %4247 = vtanh.f32 %v2035_v46  ;;  %v5658_v46 = vld [vmem:[#allocation10 + $0x40] ss:$16 sps:$4 sm:$0xff]  }
 0x584   :  { %v4248_v54 = vpop.eup %4247 }
 0x585   :  { %v2038_v56 = vrot.slane %v4248_v54, 1 }
 0x587   :  { %v2040_v37 = vsub.f32 %v5386_v6, %v2038_v56  ;;  %v5635_v6 = vld [vmem:[#allocation10 + $0x8] ss:$16 sps:$4 sm:$0xff]   ;;  %v5670_v56 = vld [vmem:[#allocation10 + $0x60] ss:$16 sps:$4 sm:$0xff]  }
 0x589   :  { %v2042_v53 = vrot.slane %v2040_v37, 7  ;;  %v5673_v37 = vld [vmem:[#allocation10 + $0x68] ss:$16 sps:$4 sm:$0xff]  }
 0x58b   :  { %v2044_v7 = vmul.f32 %v2042_v53, %v2029_v5  ;;  %v5676_v5 = vld [vmem:[#allocation10 + $0x84] ss:$16 sps:$4 sm:$0xff]   ;;  %v5679_v53 = vld [vmem:[#allocation10 + $0x8c] ss:$16 sps:$4 sm:$0xff]  }
 0x58c   :  { %6877 = vst [vmem:[#allocation50_spill] sm:$0xff] %v5676_v5  ;;  %6878 = vst [vmem:[#allocation51_spill] sm:$0xff] %v5679_v53 }
 0x58d   :  { %v5624_v63 = vadd.f32 %v4248_v54, %v2044_v7  ;;  %v5664_v54 = vld [vmem:[#allocation10 + $0x64] ss:$16 sps:$4 sm:$0xff]   ;;  %v5682_v7 = vld [vmem:[#allocation10 + $0x80] ss:$16 sps:$4 sm:$0xff]  }
 0x58e   :  { %6879 = vst [vmem:[#allocation70_spill] sm:$0xff] %v5682_v7 }
 0x58f   :  { %v2046_v52 = vpack.c.bf16 %v5624_v63, %v5624_v63 }
 0x591   :  { %v2048_v61 = vshrl.u32 %v2046_v52, 16  ;;  %v5685_v52 = vld [vmem:[#allocation10 + $0x88] ss:$16 sps:$4 sm:$0xff]  }
 0x592   :  { %6880 = vst [vmem:[#allocation71_spill] sm:$0xff] %v5685_v52 }
 0x593   :  { %v5628_v55 = vrot.slane %v2048_v61, 1  ;;  %v5688_v61 = vld [vmem:[#allocation10 + $0xa4] ss:$16 sps:$4 sm:$0xff]  }
 0x594   :  { %6881 = vst [vmem:[#allocation69_spill] sm:$0xff] %v5688_v61 }
 0x595   :  { %2085 = vmatmul.mubr.bf16.vlgmr.msra.gmra.mrb[44].mxu0 %v5628_v55  ;;  %2126 = vmatmul.mubr.bf16.vlgmr.msra.gmra.mrb[44].mxu1 %v5628_v55 }
 0x596   :  { %2135 = vmatpush1.bf16.msra.mxu0 %v5632_v59  ;;  %2176 = vmatpush1.bf16.msra.mxu1 %v5635_v6 }
 0x597   :  { %2136 = vmatprep.subr.bf16.mxu0 %v5638_v50  ;;  %2177 = vmatprep.subr.bf16.mxu1 %v5641_v57 }
 0x598   :  { %2166 = vmatprep.mubr.bf16.mxu0 %v6735_v35  ;;  %2207 = vmatprep.mubr.bf16.mxu1 %v6735_v35 }
 0x59a   :  { %2137 = vmatpush1.bf16.msra.mxu0 %v5646_v49  ;;  %2178 = vmatpush1.bf16.msra.mxu1 %v5649_v4 }
 0x59b   :  { %2138 = vmatprep.subr.bf16.mxu0 %v5652_v48  ;;  %2179 = vmatprep.subr.bf16.mxu1 %v5655_v58 }
 0x59e   :  { %2139 = vmatpush1.bf16.msra.mxu0 %v5658_v46  ;;  %2180 = vmatpush1.bf16.msra.mxu1 %v5661_v2 }
 0x59f   :  { %2140 = vmatprep.subr.bf16.mxu0 %v5664_v54  ;;  %2181 = vmatprep.subr.bf16.mxu1 %v5667_v0 }
 0x5a2   :  { %2141 = vmatpush1.bf16.msra.mxu0 %v5670_v56  ;;  %2182 = vmatpush1.bf16.msra.mxu1 %v5673_v37 }
 0x5a3   :  { %2142 = vmatprep.subr.bf16.mxu0 %v5676_v5  ;;  %2183 = vmatprep.subr.bf16.mxu1 %v5679_v53  ;;  %v5694_v5 = vld [vmem:[#allocation10 + $0xa0] ss:$16 sps:$4 sm:$0xff]   ;;  %v5697_v53 = vld [vmem:[#allocation10 + $0xa8] ss:$16 sps:$4 sm:$0xff]  }
 0x5a4   :  { %6883 = vst [vmem:[#allocation54_spill] sm:$0xff] %v5694_v5  ;;  %6884 = vst [vmem:[#allocation55_spill] sm:$0xff] %v5697_v53 }
 0x5a6   :  { %2143 = vmatpush1.bf16.msra.mxu0 %v5682_v7  ;;  %2184 = vmatpush1.bf16.msra.mxu1 %v5685_v52  ;;  %v5700_v7 = vld [vmem:[#allocation10 + $0xc4] ss:$16 sps:$4 sm:$0xff]   ;;  %v5703_v52 = vld [vmem:[#allocation10 + $0xcc] ss:$16 sps:$4 sm:$0xff]  }
 0x5a7   :  { %2144 = vmatprep.subr.bf16.mxu0 %v5688_v61  ;;  %2185 = vmatprep.subr.bf16.mxu1 %v5691_v47  ;;  %6885 = vst [vmem:[#allocation72_spill] sm:$0xff] %v5700_v7  ;;  %6886 = vst [vmem:[#allocation73_spill] sm:$0xff] %v5703_v52  ;;  %v5706_v61 = vld [vmem:[#allocation10 + $0xc0] ss:$16 sps:$4 sm:$0xff]   ;;  %v5709_v47 = vld [vmem:[#allocation10 + $0xc8] ss:$16 sps:$4 sm:$0xff]  }
 0x5a8   :  { %6887 = vst [vmem:[#allocation74_spill] sm:$0xff] %v5706_v61 }
 0x5aa   :  { %2145 = vmatpush1.bf16.msra.mxu0 %v5694_v5  ;;  %2186 = vmatpush1.bf16.msra.mxu1 %v5697_v53  ;;  %v5712_v5 = vld [vmem:[#allocation10 + $0xe4] ss:$16 sps:$4 sm:$0xff]   ;;  %v5715_v53 = vld [vmem:[#allocation10 + $0xec] ss:$16 sps:$4 sm:$0xff]  }
 0x5ab   :  { %2146 = vmatprep.subr.bf16.mxu0 %v5700_v7  ;;  %2187 = vmatprep.subr.bf16.mxu1 %v5703_v52  ;;  %v5718_v7 = vld [vmem:[#allocation10 + $0xe0] ss:$16 sps:$4 sm:$0xff]   ;;  %v5721_v52 = vld [vmem:[#allocation10 + $0xe8] ss:$16 sps:$4 sm:$0xff]  }
 0x5ae   :  { %2147 = vmatpush1.bf16.msra.mxu0 %v5706_v61  ;;  %2188 = vmatpush1.bf16.msra.mxu1 %v5709_v47  ;;  %v1932_v61 = vpack.c.bf16 %v5613_v10, %v5613_v10 }
 0x5af   :  { %2148 = vmatprep.subr.bf16.mxu0 %v5712_v5  ;;  %2189 = vmatprep.subr.bf16.mxu1 %v5715_v53 }
 0x5b2   :  { %2149 = vmatpush1.bf16.msra.mxu0 %v5718_v7  ;;  %2190 = vmatpush1.bf16.msra.mxu1 %v5721_v52 }
 0x5b3   :  { %2235 = vmatprep.subr.bf16.mxu0 %v6831_v29  ;;  %3903 = vmatprep.subr.bf16.mxu1 %v6751_v40  ;;  %v6890_v29 = vld [vmem:[#allocation24_spill] sm:$0xff] }
 0x5b5   :  { %2167 = vmatmul.mubr.bf16.vlgmr.msra.gmra.mrb[48].mxu0 %v1932_v61  ;;  %2208 = vmatmul.mubr.bf16.vlgmr.msra.gmra.mrb[48].mxu1 %v1932_v61  ;;  %v6894_v61 = vld [vmem:[#allocation28_spill] sm:$0xff] }
 0x5b6   :  { %2236 = vmatpush1.bf16.msra.mxu0 %v5295_v8  ;;  %3904 = vmatpush3.bf16.msra.mxu1 %v5431_v31  ;;  %v6889_v8 = vld [vmem:[#allocation23_spill] sm:$0xff] }
 0x5b7   :  { %2237 = vmatprep.subr.bf16.mxu0 %v5299_v28  ;;  %3905 = vmatprep.subr.bf16.mxu1 %v6751_v40  ;;  %v6888_v28 = vld [vmem:[#allocation22_spill] sm:$0xff] }
 0x5b8   :  { %2267 = vmatprep.mubr.bf16.mxu0 %v6735_v35  ;;  %3919 = vmatprep.mubr.msk.bf16.mxu1 %vm4659_vm1, %v6751_v40 }
 0x5ba   :  { %2238 = vmatpush1.bf16.msra.mxu0 %v6832_v36  ;;  %3906 = vmatpush3.bf16.msra.mxu1 %v5440_v25  ;;  %v6891_v36 = vld [vmem:[#allocation25_spill] sm:$0xff] }
 0x5bb   :  { %2239 = vmatprep.subr.bf16.mxu0 %v6833_v26  ;;  %3907 = vmatprep.subr.bf16.mxu1 %v6751_v40  ;;  %v6892_v26 = vld [vmem:[#allocation26_spill] sm:$0xff] }
 0x5be   :  { %2240 = vmatpush1.bf16.msra.mxu0 %v5445_v38  ;;  %3908 = vmatpush3.bf16.msra.mxu1 %v5448_v44 }
 0x5bf   :  { %2241 = vmatprep.subr.bf16.mxu0 %v5451_v33  ;;  %3909 = vmatprep.subr.bf16.mxu1 %v6751_v40 }
 0x5c2   :  { %2242 = vmatpush1.bf16.msra.mxu0 %v5455_v27  ;;  %3910 = vmatpush3.bf16.msra.mxu1 %v5458_v42 }
 0x5c3   :  { %2243 = vmatprep.subr.bf16.mxu0 %v5461_v34  ;;  %3911 = vmatprep.subr.bf16.mxu1 %v6751_v40 }
 0x5c6   :  { %2244 = vmatpush1.bf16.msra.mxu0 %v5465_v39  ;;  %3912 = vmatpush3.bf16.msra.mxu1 %v5468_v9 }
 0x5c7   :  { %2245 = vmatprep.subr.bf16.mxu0 %v5471_v24  ;;  %3913 = vmatprep.subr.bf16.mxu1 %v6751_v40 }
 0x5ca   :  { %2246 = vmatpush1.bf16.msra.mxu0 %v5475_v17  ;;  %3914 = vmatpush3.bf16.msra.mxu1 %v5478_v12 }
 0x5cb   :  { %2247 = vmatprep.subr.bf16.mxu0 %v5481_v19  ;;  %3915 = vmatprep.subr.bf16.mxu1 %v6751_v40 }
 0x5ce   :  { %2248 = vmatpush1.bf16.msra.mxu0 %v5485_v32  ;;  %3916 = vmatpush3.bf16.msra.mxu1 %v5488_v41 }
 0x5cf   :  { %2249 = vmatprep.subr.bf16.mxu0 %v5491_v16  ;;  %3917 = vmatprep.subr.bf16.mxu1 %v6751_v40 }
 0x5d2   :  { %2250 = vmatpush1.bf16.msra.mxu0 %v5495_v14  ;;  %3918 = vmatpush3.bf16.msra.mxu1 %v5498_v43 }
 0x5d3   :  { %2352 = vmatprep.subr.bf16.mxu0 %v5501_v21  ;;  %2393 = vmatprep.subr.bf16.mxu1 %v5504_v45 }
 0x5d5   :  { %2268 = vmatmul.mubr.bf16.vlgmr.msra.gmra.mrb[52].mxu0 %v5628_v55  ;;  %3920 = vmatmul.mubr.bf16.vlgmr.msra.gmra.mrb[52].mxu1 %v5628_v55  ;;  %v6893_v55 = vld [vmem:[#allocation27_spill] sm:$0xff] }
 0x5d6   :  { %2353 = vmatpush1.bf16.msra.mxu0 %v5509_v13  ;;  %2394 = vmatpush1.bf16.msra.mxu1 %v5512_v11  ;;  %v6897_v11 = vld [vmem:[#allocation31_spill] sm:$0xff] }
 0x5d7   :  { %2354 = vmatprep.subr.bf16.mxu0 %v5515_v22  ;;  %2395 = vmatprep.subr.bf16.mxu1 %v5518_v15  ;;  %v6895_v15 = vld [vmem:[#allocation29_spill] sm:$0xff]  ;;  %v6896_v22 = vld [vmem:[#allocation30_spill] sm:$0xff] }
 0x5d8   :  { %2384 = vmatprep.mubr.bf16.mxu0 %v6735_v35  ;;  %2425 = vmatprep.mubr.bf16.mxu1 %v6735_v35 }
 0x5da   :  { %2355 = vmatpush1.bf16.msra.mxu0 %v5523_v1  ;;  %2396 = vmatpush1.bf16.msra.mxu1 %v6888_v28  ;;  %v6898_v1 = vld [vmem:[#allocation32_spill] sm:$0xff]  ;;  %v6899_v28 = vld [vmem:[#allocation33_spill] sm:$0xff] }
 0x5db   :  { %2356 = vmatprep.subr.bf16.mxu0 %v6889_v8  ;;  %2397 = vmatprep.subr.bf16.mxu1 %v6890_v29  ;;  %v6900_v8 = vld [vmem:[#allocation34_spill] sm:$0xff]  ;;  %v6901_v29 = vld [vmem:[#allocation35_spill] sm:$0xff] }
 0x5de   :  { %2357 = vmatpush1.bf16.msra.mxu0 %v6891_v36  ;;  %2398 = vmatpush1.bf16.msra.mxu1 %v6892_v26  ;;  %v6902_v36 = vld [vmem:[#allocation36_spill] sm:$0xff]  ;;  %v6903_v26 = vld [vmem:[#allocation37_spill] sm:$0xff] }
 0x5df   :  { %2358 = vmatprep.subr.bf16.mxu0 %v6893_v55  ;;  %2399 = vmatprep.subr.bf16.mxu1 %v6894_v61  ;;  %v6904_v55 = vld [vmem:[#allocation38_spill] sm:$0xff]  ;;  %v6905_v61 = vld [vmem:[#allocation39_spill] sm:$0xff] }
 0x5e2   :  { %2359 = vmatpush1.bf16.msra.mxu0 %v6895_v15  ;;  %2400 = vmatpush1.bf16.msra.mxu1 %v6896_v22  ;;  %v6906_v15 = vld [vmem:[#allocation40_spill] sm:$0xff]  ;;  %v6907_v22 = vld [vmem:[#allocation41_spill] sm:$0xff] }
 0x5e3   :  { %2360 = vmatprep.subr.bf16.mxu0 %v6897_v11  ;;  %2401 = vmatprep.subr.bf16.mxu1 %v6898_v1  ;;  %v6908_v11 = vld [vmem:[#allocation42_spill] sm:$0xff]  ;;  %v6909_v1 = vld [vmem:[#allocation43_spill] sm:$0xff] }
 0x5e6   :  { %2361 = vmatpush1.bf16.msra.mxu0 %v6899_v28  ;;  %2402 = vmatpush1.bf16.msra.mxu1 %v6900_v8  ;;  %v6910_v28 = vld [vmem:[#allocation44_spill] sm:$0xff]  ;;  %v6911_v8 = vld [vmem:[#allocation45_spill] sm:$0xff] }
 0x5e7   :  { %2362 = vmatprep.subr.bf16.mxu0 %v6901_v29  ;;  %2403 = vmatprep.subr.bf16.mxu1 %v6902_v36  ;;  %v6912_v29 = vld [vmem:[#allocation46_spill] sm:$0xff]  ;;  %v6913_v36 = vld [vmem:[#allocation47_spill] sm:$0xff] }
 0x5ea   :  { %2363 = vmatpush1.bf16.msra.mxu0 %v6903_v26  ;;  %2404 = vmatpush1.bf16.msra.mxu1 %v6904_v55  ;;  %v6914_v26 = vld [vmem:[#allocation48_spill] sm:$0xff] }
 0x5eb   :  { %2364 = vmatprep.subr.bf16.mxu0 %v6905_v61  ;;  %2405 = vmatprep.subr.bf16.mxu1 %v6906_v15 }
 0x5ee   :  { %2365 = vmatpush1.bf16.msra.mxu0 %v6907_v22  ;;  %2406 = vmatpush1.bf16.msra.mxu1 %v6908_v11 }
 0x5ef   :  { %2366 = vmatprep.subr.bf16.mxu0 %v6909_v1  ;;  %2407 = vmatprep.subr.bf16.mxu1 %v6910_v28 }
 0x5f2   :  { %2367 = vmatpush1.bf16.msra.mxu0 %v6911_v8  ;;  %2408 = vmatpush1.bf16.msra.mxu1 %v6912_v29 }
 0x5f3   :  { %2434 = vmatprep.subr.bf16.mxu0 %v6913_v36  ;;  %2475 = vmatprep.subr.bf16.mxu1 %v6914_v26 }
 0x668   :  { %v2086_v55 = vpop.f32.mrb[44].mxu0  ;;  %v2127_v61 = vpop.f32.mrb[44].mxu1 }
 0x669   :  { %v2088_v13 = vpop.f32.mrb[45].mxu0  ;;  %v2129_v15 = vpop.f32.mrb[45].mxu1 }
 0x66a   :  { %v2090_v45 = vpop.f32.mrb[46].mxu0  ;;  %v2131_v22 = vpop.f32.mrb[46].mxu1 }
 0x66b   :  { %v2091_v21 = vpop.f32.mrb[47].mxu0  ;;  %v2132_v11 = vpop.f32.mrb[47].mxu1 }
 0x688   :  { %v2168_v43 = vpop.f32.mrb[48].mxu0  ;;  %v2209_v1 = vpop.f32.mrb[48].mxu1 }
 0x689   :  { %v2169_v14 = vadd.f32 %v2168_v43, %v2086_v55  ;;  %v2210_v28 = vadd.f32 %v2209_v1, %v2127_v61  ;;  %v2170_v16 = vpop.f32.mrb[49].mxu0  ;;  %v2211_v8 = vpop.f32.mrb[49].mxu1 }
 0x68a   :  { %v2171_v41 = vadd.f32 %v2170_v16, %v2088_v13  ;;  %v2212_v29 = vadd.f32 %v2211_v8, %v2129_v15  ;;  %v2172_v32 = vpop.f32.mrb[50].mxu0  ;;  %v2213_v36 = vpop.f32.mrb[50].mxu1 }
 0x68b   :  { %v2216_v26 = vadd.f32 %v2169_v14, %v5225_v23  ;;  %v2173_v19 = vpop.f32.mrb[51].mxu0  ;;  %v2214_v12 = vpop.f32.mrb[51].mxu1  ;;  %v2218_v16 = vadd.f32 %v2210_v28, %v5238_v20 }
 0x68c   :  { %v2217_v45 = vadd.f32 %v2171_v41, %v6827_v3  ;;  %v2219_v43 = vadd.f32 %v2212_v29, %v6828_v62 }
 0x68d   :  { %v2220_v17 = vmul.f32 0.5, %v2216_v26 }
 0x68e   :  { %v2224_v21 = vmul.f32 0.5, %v2217_v45 }
 0x68f   :  { %4249 = vtanh.f32 %v2220_v17 }
 0x690   :  { %4251 = vtanh.f32 %v2224_v21 }
 0x699   :  { %v4250_v11 = vpop.eup %4249 }
 0x69a   :  { %v2222_v22 = vmul.f32 0.5, %v4250_v11  ;;  %v4252_v15 = vpop.eup %4251 }
 0x69b   :  { %v2226_v12 = vmul.f32 0.5, %v4252_v15 }
 0x69c   :  { %v2223_v1 = vadd.f32 0.5, %v2222_v22 }
 0x69d   :  { %v2227_v21 = vadd.f32 0.5, %v2226_v12 }
 0x69e   :  { %v2228_v13 = vmul.f32 %v2223_v1, %v2219_v43 }
 0x6a0   :  { %v2229_v32 = vadd.f32 %v2228_v13, %v2218_v16 }
 0x6a2   :  { %4253 = vtanh.f32 %v2229_v32 }
 0x6a8   :  { %v2269_v14 = vpop.f32.mrb[52].mxu0  ;;  %v2310_v19 = vpop.f32.mrb[52].mxu1 }
 0x6a9   :  { %v2317_v8 = vrot.slane %v2269_v14, 4  ;;  %v2271_v17 = vpop.f32.mrb[53].mxu0  ;;  %v3921_v36 = vpop.f32.mrb[53].mxu1  ;;  %v2332_v16 = vadd.f32 %v5618_v60, %v2310_v19 }
 0x6aa   :  { %v2273_v41 = vpop.f32.mrb[54].mxu0  ;;  %v2313_v26 = vpop.f32.mrb[54].mxu1  ;;  %v2325_v1 = vrot.slane %v2271_v17, 4 }
 0x6ab   :  { %v2319_v55 = vadd.f32 %v2317_v8, %v6773_v18  ;;  %v2274_v61 = vpop.f32.mrb[55].mxu0  ;;  %v3922_v45 = vpop.f32.mrb[55].mxu1  ;;  %v2334_v8 = vrot.slane %v2332_v16, 4  ;;  %v6918_v16 = vld [vmem:[#allocation70_spill] sm:$0xff] }
 0x6ac   :  { %v4254_v29 = vpop.eup %4253  ;;  %v2327_v13 = vadd.f32 %v2325_v1, %v6775_v51  ;;  %v6917_v1 = vld [vmem:[#allocation51_spill] sm:$0xff] }
 0x6ad   :  { %v2320_v11 = vmul.f32 0.5, %v2319_v55  ;;  %v2231_v28 = vsub.f32 %v5613_v10, %v4254_v29 }
 0x6ae   :  { %v2328_v36 = vmul.f32 0.5, %v2327_v13  ;;  %v6919_v13 = vld [vmem:[#allocation71_spill] sm:$0xff] }
 0x6af   :  { %4255 = vtanh.f32 %v2320_v11  ;;  %v2232_v22 = vmul.f32 %v2231_v28, %v2227_v21 }
 0x6b0   :  { %4257 = vtanh.f32 %v2328_v36  ;;  %v6924_v36 = vld [vmem:[#allocation72_spill] sm:$0xff] }
 0x6b1   :  { %v5805_v43 = vadd.f32 %v4254_v29, %v2232_v22 }
 0x6b3   :  { %6915 = vst [vmem:[#allocation75_spill] sm:$0xff] %v5805_v43 }
 0x6b9   :  { %v4256_v32 = vpop.eup %4255 }
 0x6ba   :  { %v2322_v15 = vmul.f32 0.5, %v4256_v32  ;;  %v4258_v26 = vpop.eup %4257  ;;  %v6920_v32 = vld [vmem:[#allocation69_spill] sm:$0xff] }
 0x6bb   :  { %v2330_v61 = vmul.f32 0.5, %v4258_v26  ;;  %v2234_v26 = vpack.c.bf16 %v5805_v43, %v5805_v43 }
 0x6bc   :  { %v2323_v14 = vadd.f32 0.5, %v2322_v15  ;;  %v6921_v15 = vld [vmem:[#allocation53_spill] sm:$0xff] }
 0x6bd   :  { %v2331_v29 = vadd.f32 0.5, %v2330_v61  ;;  %v5857_v61 = vld [vmem:[#allocation7] ss:$12 sps:$4 sm:$0xff]  }
 0x6be   :  { %v2336_v41 = vmul.f32 %v2334_v8, %v2323_v14  ;;  %v6922_v14 = vld [vmem:[#allocation54_spill] sm:$0xff]  ;;  %v6923_v8 = vld [vmem:[#allocation55_spill] sm:$0xff] }
 0x6c0   :  { %v2337_v12 = vadd.f32 %v2336_v41, %v5042_v30  ;;  %v6925_v41 = vld [vmem:[#allocation73_spill] sm:$0xff] }
 0x6c2   :  { %4259 = vtanh.f32 %v2337_v12  ;;  %v6926_v12 = vld [vmem:[#allocation74_spill] sm:$0xff] }
 0x6cc   :  { %v4260_v55 = vpop.eup %4259 }
 0x6cd   :  { %v2340_v45 = vrot.slane %v4260_v55, 1 }
 0x6cf   :  { %v2342_v17 = vsub.f32 %v5624_v63, %v2340_v45  ;;  %v6916_v63 = vld [vmem:[#allocation50_spill] sm:$0xff]  ;;  %v5861_v45 = vld [vmem:[#allocation7 + $0x1c] ss:$12 sps:$4 sm:$0xff]  }
 0x6d0   :  { %6927 = vst [vmem:[#allocation50_spill] sm:$0xff] %v5857_v61  ;;  %6928 = vst [vmem:[#allocation51_spill] sm:$0xff] %v5861_v45 }
 0x6d1   :  { %v2344_v19 = vrot.slane %v2342_v17, 7  ;;  %v5868_v17 = vld [vmem:[#allocation7 + $0x18] ss:$12 sps:$4 sm:$0xff]  }
 0x6d2   :  { %6929 = vst [vmem:[#allocation70_spill] sm:$0xff] %v5868_v17 }
 0x6d3   :  { %v2346_v21 = vmul.f32 %v2344_v19, %v2331_v29  ;;  %v5872_v29 = vld [vmem:[#allocation7 + $0x34] ss:$12 sps:$4 sm:$0xff]  }
 0x6d4   :  { %6930 = vst [vmem:[#allocation71_spill] sm:$0xff] %v5872_v29  ;;  %v6942_v19 = vld [vmem:[#allocation68_spill] sm:$0xff] }
 0x6d5   :  { %v5811_v11 = vadd.f32 %v4260_v55, %v2346_v21  ;;  %v5853_v55 = vld [vmem:[#allocation7 + $0x4] ss:$12 sps:$4 sm:$0xff]   ;;  %v6943_v21 = vld [vmem:[#allocation19_spill] sm:$0xff] }
 0x6d7   :  { %v2348_v28 = vpack.c.bf16 %v5811_v11, %v5811_v11 }
 0x6d9   :  { %v5815_v22 = vrot.slane %v2348_v28, 2  ;;  %v6944_v28 = vld [vmem:[#allocation20_spill] sm:$0xff] }
 0x6db   :  { %2385 = vmatmul.mubr.bf16.vlgmr.msra.gmra.mrb[56].mxu0 %v5815_v22  ;;  %2426 = vmatmul.mubr.bf16.vlgmr.msra.gmra.mrb[56].mxu1 %v5815_v22 }
 0x6dc   :  { %2435 = vmatpush1.bf16.msra.mxu0 %v5632_v59  ;;  %2476 = vmatpush1.bf16.msra.mxu1 %v5635_v6 }
 0x6dd   :  { %2436 = vmatprep.subr.bf16.mxu0 %v5638_v50  ;;  %2477 = vmatprep.subr.bf16.mxu1 %v5641_v57 }
 0x6de   :  { %2466 = vmatprep.mubr.bf16.mxu0 %v6735_v35  ;;  %2507 = vmatprep.mubr.bf16.mxu1 %v6735_v35 }
 0x6e0   :  { %2437 = vmatpush1.bf16.msra.mxu0 %v5646_v49  ;;  %2478 = vmatpush1.bf16.msra.mxu1 %v5649_v4 }
 0x6e1   :  { %2438 = vmatprep.subr.bf16.mxu0 %v5652_v48  ;;  %2479 = vmatprep.subr.bf16.mxu1 %v5655_v58 }
 0x6e4   :  { %2439 = vmatpush1.bf16.msra.mxu0 %v5658_v46  ;;  %2480 = vmatpush1.bf16.msra.mxu1 %v5661_v2 }
 0x6e5   :  { %2440 = vmatprep.subr.bf16.mxu0 %v5664_v54  ;;  %2481 = vmatprep.subr.bf16.mxu1 %v5667_v0 }
 0x6e8   :  { %2441 = vmatpush1.bf16.msra.mxu0 %v5670_v56  ;;  %2482 = vmatpush1.bf16.msra.mxu1 %v5673_v37 }
 0x6e9   :  { %2442 = vmatprep.subr.bf16.mxu0 %v6916_v63  ;;  %2483 = vmatprep.subr.bf16.mxu1 %v6917_v1 }
 0x6ec   :  { %2443 = vmatpush1.bf16.msra.mxu0 %v6918_v16  ;;  %2484 = vmatpush1.bf16.msra.mxu1 %v6919_v13 }
 0x6ed   :  { %2444 = vmatprep.subr.bf16.mxu0 %v6920_v32  ;;  %2485 = vmatprep.subr.bf16.mxu1 %v6921_v15 }
 0x6f0   :  { %2445 = vmatpush1.bf16.msra.mxu0 %v6922_v14  ;;  %2486 = vmatpush1.bf16.msra.mxu1 %v6923_v8 }
 0x6f1   :  { %2446 = vmatprep.subr.bf16.mxu0 %v6924_v36  ;;  %2487 = vmatprep.subr.bf16.mxu1 %v6925_v41 }
 0x6f4   :  { %2447 = vmatpush1.bf16.msra.mxu0 %v6926_v12  ;;  %2488 = vmatpush1.bf16.msra.mxu1 %v5709_v47 }
 0x6f5   :  { %2448 = vmatprep.subr.bf16.mxu0 %v5712_v5  ;;  %2489 = vmatprep.subr.bf16.mxu1 %v5715_v53 }
 0x6f8   :  { %2449 = vmatpush1.bf16.msra.mxu0 %v5718_v7  ;;  %2490 = vmatpush1.bf16.msra.mxu1 %v5721_v52 }
 0x6f9   :  { %2535 = vmatprep.subr.bf16.mxu0 %v5853_v55  ;;  %3923 = vmatprep.subr.bf16.mxu1 %v6751_v40 }
 0x6fb   :  { %2467 = vmatmul.mubr.bf16.vlgmr.msra.gmra.mrb[60].mxu0 %v2234_v26  ;;  %2508 = vmatmul.mubr.bf16.vlgmr.msra.gmra.mrb[60].mxu1 %v2234_v26  ;;  %v6945_v26 = vld [vmem:[#allocation21_spill] sm:$0xff] }
 0x6fc   :  { %2536 = vmatpush1.bf16.msra.mxu0 %v5857_v61  ;;  %3924 = vmatpush3.bf16.msra.mxu1 %v5431_v31  ;;  %v6931_v31 = vld [vmem:[#allocation57_spill] sm:$0xff] }
 0x6fd   :  { %2537 = vmatprep.subr.bf16.mxu0 %v5861_v45  ;;  %3925 = vmatprep.subr.bf16.mxu1 %v6751_v40 }
 0x6fe   :  { %2567 = vmatprep.mubr.bf16.mxu0 %v6735_v35  ;;  %3939 = vmatprep.mubr.msk.bf16.mxu1 %vm4659_vm1, %v6751_v40 }
 0x700   :  { %2538 = vmatpush1.bf16.msra.mxu0 %v5868_v17  ;;  %3926 = vmatpush3.bf16.msra.mxu1 %v5440_v25  ;;  %v6932_v25 = vld [vmem:[#allocation58_spill] sm:$0xff] }
 0x701   :  { %2539 = vmatprep.subr.bf16.mxu0 %v5872_v29  ;;  %3927 = vmatprep.subr.bf16.mxu1 %v6751_v40 }
 0x704   :  { %2540 = vmatpush1.bf16.msra.mxu0 %v5445_v38  ;;  %3928 = vmatpush3.bf16.msra.mxu1 %v5448_v44  ;;  %v6933_v38 = vld [vmem:[#allocation59_spill] sm:$0xff]  ;;  %v6934_v44 = vld [vmem:[#allocation60_spill] sm:$0xff] }
 0x705   :  { %2541 = vmatprep.subr.bf16.mxu0 %v5451_v33  ;;  %3929 = vmatprep.subr.bf16.mxu1 %v6751_v40  ;;  %v6935_v33 = vld [vmem:[#allocation61_spill] sm:$0xff] }
 0x708   :  { %2542 = vmatpush1.bf16.msra.mxu0 %v5455_v27  ;;  %3930 = vmatpush3.bf16.msra.mxu1 %v5458_v42  ;;  %v6936_v27 = vld [vmem:[#allocation62_spill] sm:$0xff]  ;;  %v6937_v42 = vld [vmem:[#allocation63_spill] sm:$0xff] }
 0x709   :  { %2543 = vmatprep.subr.bf16.mxu0 %v5461_v34  ;;  %3931 = vmatprep.subr.bf16.mxu1 %v6751_v40  ;;  %v6938_v34 = vld [vmem:[#allocation64_spill] sm:$0xff] }
 0x70c   :  { %2544 = vmatpush1.bf16.msra.mxu0 %v5465_v39  ;;  %3932 = vmatpush3.bf16.msra.mxu1 %v5468_v9  ;;  %v6939_v39 = vld [vmem:[#allocation65_spill] sm:$0xff]  ;;  %v6940_v9 = vld [vmem:[#allocation66_spill] sm:$0xff] }
 0x70d   :  { %2545 = vmatprep.subr.bf16.mxu0 %v5471_v24  ;;  %3933 = vmatprep.subr.bf16.mxu1 %v6751_v40  ;;  %v6941_v24 = vld [vmem:[#allocation67_spill] sm:$0xff] }
 0x710   :  { %2546 = vmatpush1.bf16.msra.mxu0 %v6931_v31  ;;  %3934 = vmatpush3.bf16.msra.mxu1 %v6932_v25  ;;  %v6946_v31 = vld [vmem:[#allocation22_spill] sm:$0xff]  ;;  %v6947_v25 = vld [vmem:[#allocation23_spill] sm:$0xff] }
 0x711   :  { %2547 = vmatprep.subr.bf16.mxu0 %v6933_v38  ;;  %3935 = vmatprep.subr.bf16.mxu1 %v6751_v40  ;;  %v6948_v38 = vld [vmem:[#allocation24_spill] sm:$0xff] }
 0x714   :  { %2548 = vmatpush1.bf16.msra.mxu0 %v6934_v44  ;;  %3936 = vmatpush3.bf16.msra.mxu1 %v6935_v33  ;;  %v6950_v44 = vld [vmem:[#allocation26_spill] sm:$0xff]  ;;  %v6951_v33 = vld [vmem:[#allocation27_spill] sm:$0xff] }
 0x715   :  { %2549 = vmatprep.subr.bf16.mxu0 %v6936_v27  ;;  %3937 = vmatprep.subr.bf16.mxu1 %v6751_v40  ;;  %v6952_v27 = vld [vmem:[#allocation28_spill] sm:$0xff] }
 0x718   :  { %2550 = vmatpush1.bf16.msra.mxu0 %v6937_v42  ;;  %3938 = vmatpush3.bf16.msra.mxu1 %v6938_v34  ;;  %v6953_v42 = vld [vmem:[#allocation29_spill] sm:$0xff]  ;;  %v6954_v34 = vld [vmem:[#allocation30_spill] sm:$0xff] }
 0x719   :  { %2654 = vmatprep.subr.bf16.mxu0 %v6939_v39  ;;  %2695 = vmatprep.subr.bf16.mxu1 %v6940_v9  ;;  %v6955_v39 = vld [vmem:[#allocation31_spill] sm:$0xff]  ;;  %v6956_v9 = vld [vmem:[#allocation32_spill] sm:$0xff] }
 0x71b   :  { %2568 = vmatmul.mubr.bf16.vlgmr.msra.gmra.mrb[64].mxu0 %v5815_v22  ;;  %3940 = vmatmul.mubr.bf16.vlgmr.msra.gmra.mrb[64].mxu1 %v5815_v22  ;;  %v6949_v22 = vld [vmem:[#allocation25_spill] sm:$0xff] }
 0x71c   :  { %2655 = vmatpush1.bf16.msra.mxu0 %v6941_v24  ;;  %2696 = vmatpush1.bf16.msra.mxu1 %v6942_v19  ;;  %v6957_v24 = vld [vmem:[#allocation33_spill] sm:$0xff]  ;;  %v6958_v19 = vld [vmem:[#allocation34_spill] sm:$0xff] }
 0x71d   :  { %2656 = vmatprep.subr.bf16.mxu0 %v6943_v21  ;;  %2697 = vmatprep.subr.bf16.mxu1 %v6944_v28  ;;  %v6959_v21 = vld [vmem:[#allocation35_spill] sm:$0xff]  ;;  %v6960_v28 = vld [vmem:[#allocation36_spill] sm:$0xff] }
 0x71e   :  { %2686 = vmatprep.mubr.bf16.mxu0 %v6735_v35  ;;  %2727 = vmatprep.mubr.bf16.mxu1 %v6735_v35 }
 0x720   :  { %2657 = vmatpush1.bf16.msra.mxu0 %v6945_v26  ;;  %2698 = vmatpush1.bf16.msra.mxu1 %v6946_v31  ;;  %v6961_v26 = vld [vmem:[#allocation37_spill] sm:$0xff]  ;;  %v6962_v31 = vld [vmem:[#allocation38_spill] sm:$0xff] }
 0x721   :  { %2658 = vmatprep.subr.bf16.mxu0 %v6947_v25  ;;  %2699 = vmatprep.subr.bf16.mxu1 %v6948_v38  ;;  %v6963_v25 = vld [vmem:[#allocation39_spill] sm:$0xff]  ;;  %v6964_v38 = vld [vmem:[#allocation40_spill] sm:$0xff] }
 0x724   :  { %2659 = vmatpush1.bf16.msra.mxu0 %v6949_v22  ;;  %2700 = vmatpush1.bf16.msra.mxu1 %v6950_v44  ;;  %v6965_v22 = vld [vmem:[#allocation41_spill] sm:$0xff]  ;;  %v6966_v44 = vld [vmem:[#allocation42_spill] sm:$0xff] }
 0x725   :  { %2660 = vmatprep.subr.bf16.mxu0 %v6951_v33  ;;  %2701 = vmatprep.subr.bf16.mxu1 %v6952_v27  ;;  %v6967_v33 = vld [vmem:[#allocation43_spill] sm:$0xff]  ;;  %v6968_v27 = vld [vmem:[#allocation44_spill] sm:$0xff] }
 0x728   :  { %2661 = vmatpush1.bf16.msra.mxu0 %v6953_v42  ;;  %2702 = vmatpush1.bf16.msra.mxu1 %v6954_v34  ;;  %v6969_v42 = vld [vmem:[#allocation45_spill] sm:$0xff]  ;;  %v6970_v34 = vld [vmem:[#allocation46_spill] sm:$0xff] }
 0x729   :  { %2662 = vmatprep.subr.bf16.mxu0 %v6955_v39  ;;  %2703 = vmatprep.subr.bf16.mxu1 %v6956_v9  ;;  %v6971_v39 = vld [vmem:[#allocation47_spill] sm:$0xff]  ;;  %v6972_v9 = vld [vmem:[#allocation48_spill] sm:$0xff] }
 0x72c   :  { %2663 = vmatpush1.bf16.msra.mxu0 %v6957_v24  ;;  %2704 = vmatpush1.bf16.msra.mxu1 %v6958_v19 }
 0x72d   :  { %2664 = vmatprep.subr.bf16.mxu0 %v6959_v21  ;;  %2705 = vmatprep.subr.bf16.mxu1 %v6960_v28 }
 0x730   :  { %2665 = vmatpush1.bf16.msra.mxu0 %v6961_v26  ;;  %2706 = vmatpush1.bf16.msra.mxu1 %v6962_v31 }
 0x731   :  { %2666 = vmatprep.subr.bf16.mxu0 %v6963_v25  ;;  %2707 = vmatprep.subr.bf16.mxu1 %v6964_v38 }
 0x734   :  { %2667 = vmatpush1.bf16.msra.mxu0 %v6965_v22  ;;  %2708 = vmatpush1.bf16.msra.mxu1 %v6966_v44 }
 0x735   :  { %2668 = vmatprep.subr.bf16.mxu0 %v6967_v33  ;;  %2709 = vmatprep.subr.bf16.mxu1 %v6968_v27 }
 0x738   :  { %2669 = vmatpush1.bf16.msra.mxu0 %v6969_v42  ;;  %2710 = vmatpush1.bf16.msra.mxu1 %v6970_v34 }
 0x739   :  { %2736 = vmatprep.subr.bf16.mxu0 %v6971_v39  ;;  %2777 = vmatprep.subr.bf16.mxu1 %v6972_v9 }
 0x7ae   :  { %v2386_v24 = vpop.f32.mrb[56].mxu0  ;;  %v2427_v19 = vpop.f32.mrb[56].mxu1 }
 0x7af   :  { %v2388_v21 = vpop.f32.mrb[57].mxu0  ;;  %v2429_v28 = vpop.f32.mrb[57].mxu1 }
 0x7b0   :  { %v2390_v26 = vpop.f32.mrb[58].mxu0  ;;  %v2431_v31 = vpop.f32.mrb[58].mxu1 }
 0x7b1   :  { %v2391_v25 = vpop.f32.mrb[59].mxu0  ;;  %v2432_v38 = vpop.f32.mrb[59].mxu1 }
 0x7ce   :  { %v2468_v22 = vpop.f32.mrb[60].mxu0  ;;  %v2509_v44 = vpop.f32.mrb[60].mxu1 }
 0x7cf   :  { %v2469_v33 = vadd.f32 %v2468_v22, %v2386_v24  ;;  %v2510_v27 = vadd.f32 %v2509_v44, %v2427_v19  ;;  %v2470_v10 = vpop.f32.mrb[61].mxu0  ;;  %v2511_v42 = vpop.f32.mrb[61].mxu1 }
 0x7d0   :  { %v2471_v29 = vadd.f32 %v2470_v10, %v2388_v21  ;;  %v2512_v34 = vadd.f32 %v2511_v42, %v2429_v28  ;;  %v2472_v17 = vpop.f32.mrb[62].mxu0  ;;  %v2513_v39 = vpop.f32.mrb[62].mxu1 }
 0x7d1   :  { %v2516_v9 = vadd.f32 %v2469_v33, %v5225_v23  ;;  %v2473_v45 = vpop.f32.mrb[63].mxu0  ;;  %v2514_v61 = vpop.f32.mrb[63].mxu1  ;;  %v2518_v10 = vadd.f32 %v2510_v27, %v5238_v20 }
 0x7d2   :  { %v2517_v26 = vadd.f32 %v2471_v29, %v6827_v3  ;;  %v2519_v24 = vadd.f32 %v2512_v34, %v6828_v62 }
 0x7d3   :  { %v2520_v40 = vmul.f32 0.5, %v2516_v9 }
 0x7d4   :  { %v2524_v31 = vmul.f32 0.5, %v2517_v26 }
 0x7d5   :  { %4261 = vtanh.f32 %v2520_v40 }
 0x7d6   :  { %4263 = vtanh.f32 %v2524_v31 }
 0x7df   :  { %v4262_v25 = vpop.eup %4261 }
 0x7e0   :  { %v2522_v38 = vmul.f32 0.5, %v4262_v25  ;;  %v4264_v28 = vpop.eup %4263 }
 0x7e1   :  { %v2526_v61 = vmul.f32 0.5, %v4264_v28 }
 0x7e2   :  { %v2523_v19 = vadd.f32 0.5, %v2522_v38 }
 0x7e3   :  { %v2527_v31 = vadd.f32 0.5, %v2526_v61 }
 0x7e4   :  { %v2528_v21 = vmul.f32 %v2523_v19, %v2519_v24 }
 0x7e6   :  { %v2529_v17 = vadd.f32 %v2528_v21, %v2518_v10 }
 0x7e8   :  { %4265 = vtanh.f32 %v2529_v17 }
 0x7ee   :  { %v2569_v22 = vpop.f32.mrb[64].mxu0  ;;  %v2610_v45 = vpop.f32.mrb[64].mxu1 }
 0x7ef   :  { %v2617_v44 = vrot.slane %v2569_v22, 3  ;;  %v2571_v40 = vpop.f32.mrb[65].mxu0  ;;  %v3941_v33 = vpop.f32.mrb[65].mxu1  ;;  %v2632_v10 = vadd.f32 %v5618_v60, %v2610_v45 }
 0x7f0   :  { %v2573_v29 = vpop.f32.mrb[66].mxu0  ;;  %v2613_v42 = vpop.f32.mrb[66].mxu1  ;;  %v2625_v19 = vrot.slane %v2571_v40, 3 }
 0x7f1   :  { %v2619_v39 = vadd.f32 %v2617_v44, %v6773_v18  ;;  %v2574_v9 = vpop.f32.mrb[67].mxu0  ;;  %v3942_v26 = vpop.f32.mrb[67].mxu1  ;;  %v2634_v44 = vrot.slane %v2632_v10, 3  ;;  %v6088_v10 = vld [vmem:[#allocation8 + $0x28] ss:$16 sps:$4 sm:$0xff]  }
 0x7f2   :  { %v4266_v34 = vpop.eup %4265  ;;  %v2627_v21 = vadd.f32 %v2625_v19, %v6775_v51  ;;  %v6085_v19 = vld [vmem:[#allocation8 + $0x20] ss:$16 sps:$4 sm:$0xff]   ;;  %6979 = vst [vmem:[#allocation53_spill] sm:$0xff] %v6088_v10 }
 0x7f3   :  { %v2620_v25 = vmul.f32 0.5, %v2619_v39  ;;  %v2531_v27 = vsub.f32 %v5805_v43, %v4266_v34  ;;  %v6151_v43 = vld [vmem:[#allocation8 + $0xe4] ss:$16 sps:$4 sm:$0xff]  }
 0x7f4   :  { %v2628_v33 = vmul.f32 0.5, %v2627_v21  ;;  %v6091_v21 = vld [vmem:[#allocation8 + $0x44] ss:$16 sps:$4 sm:$0xff]   ;;  %7000 = vst [vmem:[#allocation22_spill] sm:$0xff] %v6151_v43 }
 0x7f5   :  { %4267 = vtanh.f32 %v2620_v25  ;;  %v2532_v38 = vmul.f32 %v2531_v27, %v2527_v31  ;;  %6980 = vst [vmem:[#allocation54_spill] sm:$0xff] %v6091_v21 }
 0x7f6   :  { %4269 = vtanh.f32 %v2628_v33  ;;  %v6106_v33 = vld [vmem:[#allocation8 + $0x6c] ss:$16 sps:$4 sm:$0xff]  }
 0x7f7   :  { %v5942_v24 = vadd.f32 %v4266_v34, %v2532_v38  ;;  %6985 = vst [vmem:[#allocation57_spill] sm:$0xff] %v6106_v33 }
 0x7f9   :  { %6973 = vst [vmem:[#allocation69_spill] sm:$0xff] %v5942_v24 }
 0x7ff   :  { %v4268_v17 = vpop.eup %4267 }
 0x800   :  { %v2622_v28 = vmul.f32 0.5, %v4268_v17  ;;  %v4270_v42 = vpop.eup %4269  ;;  %v6094_v17 = vld [vmem:[#allocation8 + $0x4c] ss:$16 sps:$4 sm:$0xff]  }
 0x801   :  { %v2630_v9 = vmul.f32 0.5, %v4270_v42  ;;  %6981 = vst [vmem:[#allocation55_spill] sm:$0xff] %v6094_v17  ;;  %v6115_v42 = vld [vmem:[#allocation8 + $0x84] ss:$16 sps:$4 sm:$0xff]  }
 0x802   :  { %v2623_v22 = vadd.f32 0.5, %v2622_v28  ;;  %v6097_v28 = vld [vmem:[#allocation8 + $0x40] ss:$16 sps:$4 sm:$0xff]   ;;  %6988 = vst [vmem:[#allocation60_spill] sm:$0xff] %v6115_v42 }
 0x803   :  { %v2631_v34 = vadd.f32 0.5, %v2630_v9  ;;  %6982 = vst [vmem:[#allocation72_spill] sm:$0xff] %v6097_v28  ;;  %v6121_v9 = vld [vmem:[#allocation8 + $0x80] ss:$16 sps:$4 sm:$0xff]  }
 0x804   :  { %v2636_v29 = vmul.f32 %v2634_v44, %v2623_v22  ;;  %v6100_v22 = vld [vmem:[#allocation8 + $0x48] ss:$16 sps:$4 sm:$0xff]   ;;  %v6103_v44 = vld [vmem:[#allocation8 + $0x64] ss:$16 sps:$4 sm:$0xff]   ;;  %6990 = vst [vmem:[#allocation62_spill] sm:$0xff] %v6121_v9 }
 0x805   :  { %6983 = vst [vmem:[#allocation73_spill] sm:$0xff] %v6100_v22  ;;  %6984 = vst [vmem:[#allocation74_spill] sm:$0xff] %v6103_v44 }
 0x806   :  { %v2637_v61 = vadd.f32 %v2636_v29, %v5042_v30  ;;  %v6109_v29 = vld [vmem:[#allocation8 + $0x60] ss:$16 sps:$4 sm:$0xff]  }
 0x807   :  { %6986 = vst [vmem:[#allocation58_spill] sm:$0xff] %v6109_v29 }
 0x808   :  { %4271 = vtanh.f32 %v2637_v61  ;;  %v6112_v61 = vld [vmem:[#allocation8 + $0x68] ss:$16 sps:$4 sm:$0xff]  }
 0x809   :  { %6987 = vst [vmem:[#allocation59_spill] sm:$0xff] %v6112_v61 }
 0x812   :  { %v4272_v39 = vpop.eup %4271 }
 0x813   :  { %v2640_v26 = vrot.slane %v4272_v39, 1 }
 0x815   :  { %v2642_v40 = vsub.f32 %v5811_v11, %v2640_v26  ;;  %v6043_v11 = vld [vmem:[#allocation7 + $0x94] ss:$12 sps:$4 sm:$0xff]   ;;  %v6124_v26 = vld [vmem:[#allocation8 + $0x88] ss:$16 sps:$4 sm:$0xff]  }
 0x816   :  { %6991 = vst [vmem:[#allocation63_spill] sm:$0xff] %v6124_v26 }
 0x817   :  { %v2644_v60 = vrot.slane %v2642_v40, 7  ;;  %v6127_v40 = vld [vmem:[#allocation8 + $0xa4] ss:$16 sps:$4 sm:$0xff]  }
 0x818   :  { %6992 = vst [vmem:[#allocation64_spill] sm:$0xff] %v6127_v40 }
 0x819   :  { %v2646_v45 = vmul.f32 %v2644_v60, %v2631_v34  ;;  %v6130_v34 = vld [vmem:[#allocation8 + $0xac] ss:$16 sps:$4 sm:$0xff]   ;;  %v6133_v60 = vld [vmem:[#allocation8 + $0xa0] ss:$16 sps:$4 sm:$0xff]  }
 0x81a   :  { %6993 = vst [vmem:[#allocation65_spill] sm:$0xff] %v6130_v34  ;;  %6994 = vst [vmem:[#allocation66_spill] sm:$0xff] %v6133_v60 }
 0x81b   :  { %v5948_v31 = vadd.f32 %v4272_v39, %v2646_v45  ;;  %v6118_v39 = vld [vmem:[#allocation8 + $0x8c] ss:$16 sps:$4 sm:$0xff]   ;;  %v6136_v45 = vld [vmem:[#allocation8 + $0xa8] ss:$16 sps:$4 sm:$0xff]  }
 0x81c   :  { %6989 = vst [vmem:[#allocation61_spill] sm:$0xff] %v6118_v39  ;;  %6995 = vst [vmem:[#allocation67_spill] sm:$0xff] %v6136_v45 }
 0x81d   :  { %v2648_v25 = vpack.c.bf16 %v5948_v31, %v5948_v31 }
 0x81f   :  { %v2650_v27 = vshrl.u32 %v2648_v25, 16  ;;  %v6139_v25 = vld [vmem:[#allocation8 + $0xc4] ss:$16 sps:$4 sm:$0xff]  }
 0x820   :  { %6996 = vst [vmem:[#allocation68_spill] sm:$0xff] %v6139_v25 }
 0x821   :  { %v5952_v38 = vrot.slane %v2650_v27, 2  ;;  %v6142_v27 = vld [vmem:[#allocation8 + $0xcc] ss:$16 sps:$4 sm:$0xff]  }
 0x822   :  { %6997 = vst [vmem:[#allocation19_spill] sm:$0xff] %v6142_v27 }
 0x823   :  { %2687 = vmatmul.mubr.bf16.vlgmr.msra.gmra.mrb[68].mxu0 %v5952_v38  ;;  %2728 = vmatmul.mubr.bf16.vlgmr.msra.gmra.mrb[68].mxu1 %v5952_v38 }
 0x824   :  { %2737 = vmatpush1.bf16.msra.mxu0 %v5632_v59  ;;  %2778 = vmatpush1.bf16.msra.mxu1 %v5635_v6  ;;  %v2534_v59 = vpack.c.bf16 %v5942_v24, %v5942_v24  ;;  %v6974_v6 = vmov 0.0  }
 0x825   :  { %2738 = vmatprep.subr.bf16.mxu0 %v5638_v50  ;;  %2779 = vmatprep.subr.bf16.mxu1 %v5641_v57  ;;  %v6975_v50 = vld [vmem:[#allocation50_spill] sm:$0xff]  ;;  %v6976_v57 = vld [vmem:[#allocation51_spill] sm:$0xff] }
 0x826   :  { %2768 = vmatprep.mubr.bf16.mxu0 %v6735_v35  ;;  %2809 = vmatprep.mubr.bf16.mxu1 %v6735_v35 }
 0x828   :  { %2739 = vmatpush1.bf16.msra.mxu0 %v5646_v49  ;;  %2780 = vmatpush1.bf16.msra.mxu1 %v5649_v4  ;;  %v6977_v49 = vld [vmem:[#allocation70_spill] sm:$0xff] }
 0x829   :  { %2740 = vmatprep.subr.bf16.mxu0 %v5652_v48  ;;  %2781 = vmatprep.subr.bf16.mxu1 %v5655_v58  ;;  %v6002_v4 = vld [vmem:[#allocation7 + $0x20] ss:$12 sps:$4 sm:$0xff]   ;;  %v6007_v58 = vld [vmem:[#allocation7 + $0x30] ss:$12 sps:$4 sm:$0xff]  }
 0x82a   :  { %v6978_v48 = vld [vmem:[#allocation71_spill] sm:$0xff] }
 0x82c   :  { %2741 = vmatpush1.bf16.msra.mxu0 %v5658_v46  ;;  %2782 = vmatpush1.bf16.msra.mxu1 %v5661_v2  ;;  %v6010_v46 = vld [vmem:[#allocation7 + $0x38] ss:$12 sps:$4 sm:$0xff]  }
 0x82d   :  { %2742 = vmatprep.subr.bf16.mxu0 %v5664_v54  ;;  %2783 = vmatprep.subr.bf16.mxu1 %v5667_v0  ;;  %v6013_v2 = vld [vmem:[#allocation7 + $0x4c] ss:$12 sps:$4 sm:$0xff]   ;;  %v6017_v54 = vld [vmem:[#allocation7 + $0x48] ss:$12 sps:$4 sm:$0xff]   ;;  %v6020_v0 = vld [vmem:[#allocation7 + $0x50] ss:$12 sps:$4 sm:$0xff]  }
 0x830   :  { %2743 = vmatpush1.bf16.msra.mxu0 %v5670_v56  ;;  %2784 = vmatpush1.bf16.msra.mxu1 %v5673_v37  ;;  %v6023_v56 = vld [vmem:[#allocation7 + $0x64] ss:$12 sps:$4 sm:$0xff]   ;;  %v6027_v37 = vld [vmem:[#allocation7 + $0x60] ss:$12 sps:$4 sm:$0xff]  }
 0x831   :  { %2744 = vmatprep.subr.bf16.mxu0 %v6916_v63  ;;  %2785 = vmatprep.subr.bf16.mxu1 %v6917_v1  ;;  %v6047_v63 = vld [vmem:[#allocation7 + $0x90] ss:$12 sps:$4 sm:$0xff]   ;;  %v6050_v1 = vld [vmem:[#allocation7 + $0x98] ss:$12 sps:$4 sm:$0xff]  }
 0x834   :  { %2745 = vmatpush1.bf16.msra.mxu0 %v6918_v16  ;;  %2786 = vmatpush1.bf16.msra.mxu1 %v6919_v13  ;;  %v6053_v16 = vld [vmem:[#allocation7 + $0xac] ss:$12 sps:$4 sm:$0xff]   ;;  %v6057_v13 = vld [vmem:[#allocation7 + $0xa8] ss:$12 sps:$4 sm:$0xff]  }
 0x835   :  { %2746 = vmatprep.subr.bf16.mxu0 %v6920_v32  ;;  %2787 = vmatprep.subr.bf16.mxu1 %v6921_v15  ;;  %v6060_v32 = vld [vmem:[#allocation7 + $0xb0] ss:$12 sps:$4 sm:$0xff]   ;;  %v6063_v15 = vld [vmem:[#allocation8 + $0x4] ss:$16 sps:$4 sm:$0xff]  }
 0x838   :  { %2747 = vmatpush1.bf16.msra.mxu0 %v6922_v14  ;;  %2788 = vmatpush1.bf16.msra.mxu1 %v6923_v8  ;;  %v6066_v14 = vld [vmem:[#allocation8 + $0xc] ss:$16 sps:$4 sm:$0xff]   ;;  %v6071_v8 = vld [vmem:[#allocation8] ss:$16 sps:$4 sm:$0xff]  }
 0x839   :  { %2748 = vmatprep.subr.bf16.mxu0 %v6924_v36  ;;  %2789 = vmatprep.subr.bf16.mxu1 %v6925_v41  ;;  %v6074_v36 = vld [vmem:[#allocation8 + $0x8] ss:$16 sps:$4 sm:$0xff]   ;;  %v6077_v41 = vld [vmem:[#allocation8 + $0x24] ss:$16 sps:$4 sm:$0xff]  }
 0x83c   :  { %2749 = vmatpush1.bf16.msra.mxu0 %v6926_v12  ;;  %2790 = vmatpush1.bf16.msra.mxu1 %v5709_v47  ;;  %v5993_v47 = vld [vmem:[#allocation7 + $0x8] ss:$12 sps:$4 sm:$0xff]   ;;  %v6080_v12 = vld [vmem:[#allocation8 + $0x2c] ss:$16 sps:$4 sm:$0xff]  }
 0x83d   :  { %2750 = vmatprep.subr.bf16.mxu0 %v5712_v5  ;;  %2791 = vmatprep.subr.bf16.mxu1 %v5715_v53  ;;  %v6030_v5 = vld [vmem:[#allocation7 + $0x68] ss:$12 sps:$4 sm:$0xff]  }
 0x83e   :  { %v6033_v53 = vld [vmem:[#allocation7 + $0x7c] ss:$12 sps:$4 sm:$0xff]  }
 0x840   :  { %2751 = vmatpush1.bf16.msra.mxu0 %v5718_v7  ;;  %2792 = vmatpush1.bf16.msra.mxu1 %v5721_v52  ;;  %v6037_v7 = vld [vmem:[#allocation7 + $0x78] ss:$12 sps:$4 sm:$0xff]   ;;  %v6040_v52 = vld [vmem:[#allocation7 + $0x80] ss:$12 sps:$4 sm:$0xff]  }
 0x841   :  { %2837 = vmatprep.subr.bf16.mxu0 %v5853_v55  ;;  %3943 = vmatprep.subr.bf16.mxu1 %v6974_v6 }
 0x843   :  { %2769 = vmatmul.mubr.bf16.vlgmr.msra.gmra.mrb[72].mxu0 %v2534_v59  ;;  %2810 = vmatmul.mubr.bf16.vlgmr.msra.gmra.mrb[72].mxu1 %v2534_v59  ;;  %v6148_v59 = vld [vmem:[#allocation8 + $0xc8] ss:$16 sps:$4 sm:$0xff]  }
 0x844   :  { %2838 = vmatpush1.bf16.msra.mxu0 %v6975_v50  ;;  %3944 = vmatpush3.bf16.msra.mxu1 %v5993_v47  ;;  %6999 = vst [vmem:[#allocation21_spill] sm:$0xff] %v6148_v59 }
 0x845   :  { %2839 = vmatprep.subr.bf16.mxu0 %v6976_v57  ;;  %3945 = vmatprep.subr.bf16.mxu1 %v6974_v6 }
 0x846   :  { %2869 = vmatprep.mubr.bf16.mxu0 %v6735_v35  ;;  %3959 = vmatprep.mubr.msk.bf16.mxu1 %vm4659_vm1, %v6974_v6 }
 0x848   :  { %2840 = vmatpush1.bf16.msra.mxu0 %v6977_v49  ;;  %3946 = vmatpush3.bf16.msra.mxu1 %v6002_v4 }
 0x849   :  { %2841 = vmatprep.subr.bf16.mxu0 %v6978_v48  ;;  %3947 = vmatprep.subr.bf16.mxu1 %v6974_v6 }
 0x84c   :  { %2842 = vmatpush1.bf16.msra.mxu0 %v6007_v58  ;;  %3948 = vmatpush3.bf16.msra.mxu1 %v6010_v46 }
 0x84d   :  { %2843 = vmatprep.subr.bf16.mxu0 %v6013_v2  ;;  %3949 = vmatprep.subr.bf16.mxu1 %v6974_v6 }
 0x850   :  { %2844 = vmatpush1.bf16.msra.mxu0 %v6017_v54  ;;  %3950 = vmatpush3.bf16.msra.mxu1 %v6020_v0 }
 0x851   :  { %2845 = vmatprep.subr.bf16.mxu0 %v6023_v56  ;;  %3951 = vmatprep.subr.bf16.mxu1 %v6974_v6 }
 0x854   :  { %2846 = vmatpush1.bf16.msra.mxu0 %v6027_v37  ;;  %3952 = vmatpush3.bf16.msra.mxu1 %v6030_v5 }
 0x855   :  { %2847 = vmatprep.subr.bf16.mxu0 %v6033_v53  ;;  %3953 = vmatprep.subr.bf16.mxu1 %v6974_v6 }
 0x858   :  { %2848 = vmatpush1.bf16.msra.mxu0 %v6037_v7  ;;  %3954 = vmatpush3.bf16.msra.mxu1 %v6040_v52 }
 0x859   :  { %2849 = vmatprep.subr.bf16.mxu0 %v6043_v11  ;;  %3955 = vmatprep.subr.bf16.mxu1 %v6974_v6 }
 0x85c   :  { %2850 = vmatpush1.bf16.msra.mxu0 %v6047_v63  ;;  %3956 = vmatpush3.bf16.msra.mxu1 %v6050_v1 }
 0x85d   :  { %2851 = vmatprep.subr.bf16.mxu0 %v6053_v16  ;;  %3957 = vmatprep.subr.bf16.mxu1 %v6974_v6 }
 0x860   :  { %2852 = vmatpush1.bf16.msra.mxu0 %v6057_v13  ;;  %3958 = vmatpush3.bf16.msra.mxu1 %v6060_v32 }
 0x861   :  { %2954 = vmatprep.subr.bf16.mxu0 %v6063_v15  ;;  %2995 = vmatprep.subr.bf16.mxu1 %v6066_v14 }
 0x863   :  { %2870 = vmatmul.mubr.bf16.vlgmr.msra.gmra.mrb[76].mxu0 %v5952_v38  ;;  %3960 = vmatmul.mubr.bf16.vlgmr.msra.gmra.mrb[76].mxu1 %v5952_v38  ;;  %v6145_v38 = vld [vmem:[#allocation8 + $0xc0] ss:$16 sps:$4 sm:$0xff]  }
 0x864   :  { %2955 = vmatpush1.bf16.msra.mxu0 %v6071_v8  ;;  %2996 = vmatpush1.bf16.msra.mxu1 %v6074_v36  ;;  %6998 = vst [vmem:[#allocation20_spill] sm:$0xff] %v6145_v38 }
 0x865   :  { %2956 = vmatprep.subr.bf16.mxu0 %v6077_v41  ;;  %2997 = vmatprep.subr.bf16.mxu1 %v6080_v12 }
 0x866   :  { %2986 = vmatprep.mubr.bf16.mxu0 %v6735_v35  ;;  %3027 = vmatprep.mubr.bf16.mxu1 %v6735_v35 }
 0x868   :  { %2957 = vmatpush1.bf16.msra.mxu0 %v6085_v19  ;;  %2998 = vmatpush1.bf16.msra.mxu1 %v6088_v10 }
 0x869   :  { %2958 = vmatprep.subr.bf16.mxu0 %v6091_v21  ;;  %2999 = vmatprep.subr.bf16.mxu1 %v6094_v17 }
 0x86c   :  { %2959 = vmatpush1.bf16.msra.mxu0 %v6097_v28  ;;  %3000 = vmatpush1.bf16.msra.mxu1 %v6100_v22 }
 0x86d   :  { %2960 = vmatprep.subr.bf16.mxu0 %v6103_v44  ;;  %3001 = vmatprep.subr.bf16.mxu1 %v6106_v33 }
 0x870   :  { %2961 = vmatpush1.bf16.msra.mxu0 %v6109_v29  ;;  %3002 = vmatpush1.bf16.msra.mxu1 %v6112_v61 }
 0x871   :  { %2962 = vmatprep.subr.bf16.mxu0 %v6115_v42  ;;  %3003 = vmatprep.subr.bf16.mxu1 %v6118_v39 }
 0x874   :  { %2963 = vmatpush1.bf16.msra.mxu0 %v6121_v9  ;;  %3004 = vmatpush1.bf16.msra.mxu1 %v6124_v26 }
 0x875   :  { %2964 = vmatprep.subr.bf16.mxu0 %v6127_v40  ;;  %3005 = vmatprep.subr.bf16.mxu1 %v6130_v34 }
 0x878   :  { %2965 = vmatpush1.bf16.msra.mxu0 %v6133_v60  ;;  %3006 = vmatpush1.bf16.msra.mxu1 %v6136_v45  ;;  %v6154_v45 = vld [vmem:[#allocation8 + $0xec] ss:$16 sps:$4 sm:$0xff]  }
 0x879   :  { %2966 = vmatprep.subr.bf16.mxu0 %v6139_v25  ;;  %3007 = vmatprep.subr.bf16.mxu1 %v6142_v27  ;;  %7001 = vst [vmem:[#allocation23_spill] sm:$0xff] %v6154_v45  ;;  %v6157_v25 = vld [vmem:[#allocation8 + $0xe0] ss:$16 sps:$4 sm:$0xff]   ;;  %v6160_v27 = vld [vmem:[#allocation8 + $0xe8] ss:$16 sps:$4 sm:$0xff]  }
 0x87a   :  { %7002 = vst [vmem:[#allocation24_spill] sm:$0xff] %v6157_v25  ;;  %7003 = vst [vmem:[#allocation25_spill] sm:$0xff] %v6160_v27 }
 0x87c   :  { %2967 = vmatpush1.bf16.msra.mxu0 %v6145_v38  ;;  %3008 = vmatpush1.bf16.msra.mxu1 %v6148_v59  ;;  %v6163_v38 = vld [vmem:[#allocation10 + $0x4] ss:$16 sps:$4 sm:$0xff]   ;;  %v6166_v59 = vld [vmem:[#allocation10 + $0xc] ss:$16 sps:$4 sm:$0xff]  }
 0x87d   :  { %2968 = vmatprep.subr.bf16.mxu0 %v6151_v43  ;;  %3009 = vmatprep.subr.bf16.mxu1 %v6154_v45  ;;  %7004 = vst [vmem:[#allocation26_spill] sm:$0xff] %v6163_v38  ;;  %7005 = vst [vmem:[#allocation27_spill] sm:$0xff] %v6166_v59 }
 0x880   :  { %2969 = vmatpush1.bf16.msra.mxu0 %v6157_v25  ;;  %3010 = vmatpush1.bf16.msra.mxu1 %v6160_v27 }
 0x881   :  { %3036 = vmatprep.subr.bf16.mxu0 %v6163_v38  ;;  %3077 = vmatprep.subr.bf16.mxu1 %v6166_v59 }
 0x8f6   :  { %v2688_v43 = vpop.f32.mrb[68].mxu0  ;;  %v2729_v60 = vpop.f32.mrb[68].mxu1 }
 0x8f7   :  { %v2690_v34 = vpop.f32.mrb[69].mxu0  ;;  %v2731_v45 = vpop.f32.mrb[69].mxu1 }
 0x8f8   :  { %v2692_v40 = vpop.f32.mrb[70].mxu0  ;;  %v2733_v26 = vpop.f32.mrb[70].mxu1 }
 0x8f9   :  { %v2693_v9 = vpop.f32.mrb[71].mxu0  ;;  %v2734_v25 = vpop.f32.mrb[71].mxu1 }
 0x916   :  { %v2770_v39 = vpop.f32.mrb[72].mxu0  ;;  %v2811_v42 = vpop.f32.mrb[72].mxu1 }
 0x917   :  { %v2771_v61 = vadd.f32 %v2770_v39, %v2688_v43  ;;  %v2812_v27 = vadd.f32 %v2811_v42, %v2729_v60  ;;  %v2772_v29 = vpop.f32.mrb[73].mxu0  ;;  %v2813_v33 = vpop.f32.mrb[73].mxu1 }
 0x918   :  { %v2773_v44 = vadd.f32 %v2772_v29, %v2690_v34  ;;  %v2814_v38 = vadd.f32 %v2813_v33, %v2731_v45  ;;  %v2774_v22 = vpop.f32.mrb[74].mxu0  ;;  %v2815_v28 = vpop.f32.mrb[74].mxu1 }
 0x919   :  { %v2818_v59 = vadd.f32 %v2771_v61, %v5225_v23  ;;  %v2775_v17 = vpop.f32.mrb[75].mxu0  ;;  %v2816_v21 = vpop.f32.mrb[75].mxu1  ;;  %v2820_v29 = vadd.f32 %v2812_v27, %v5238_v20 }
 0x91a   :  { %v2819_v26 = vadd.f32 %v2773_v44, %v6827_v3  ;;  %v2821_v43 = vadd.f32 %v2814_v38, %v6828_v62 }
 0x91b   :  { %v2822_v10 = vmul.f32 0.5, %v2818_v59 }
 0x91c   :  { %v2826_v9 = vmul.f32 0.5, %v2819_v26 }
 0x91d   :  { %4273 = vtanh.f32 %v2822_v10 }
 0x91e   :  { %4275 = vtanh.f32 %v2826_v9 }
 0x927   :  { %v4274_v40 = vpop.eup %4273 }
 0x928   :  { %v2824_v25 = vmul.f32 0.5, %v4274_v40  ;;  %v4276_v28 = vpop.eup %4275 }
 0x929   :  { %v2828_v21 = vmul.f32 0.5, %v4276_v28 }
 0x92a   :  { %v2825_v42 = vadd.f32 0.5, %v2824_v25 }
 0x92b   :  { %v2829_v9 = vadd.f32 0.5, %v2828_v21 }
 0x92c   :  { %v2830_v33 = vmul.f32 %v2825_v42, %v2821_v43 }
 0x92e   :  { %v2831_v22 = vadd.f32 %v2830_v33, %v2820_v29  ;;  %v6180_v29 = vld [vmem:[%s6448_s4] sm:$0x1] }
 0x930   :  { %4277 = vtanh.f32 %v2831_v22 }
 0x936   :  { %v2871_v61 = vpop.f32.mrb[76].mxu0  ;;  %v2912_v17 = vpop.f32.mrb[76].mxu1 }
 0x937   :  { %v2919_v39 = vrot.slane %v2871_v61, 2  ;;  %v2873_v10 = vpop.f32.mrb[77].mxu0  ;;  %v3961_v34 = vpop.f32.mrb[77].mxu1  ;;  %v2934_v33 = vadd.f32 %v6180_v29, %v2912_v17 }
 0x938   :  { %v2875_v44 = vpop.f32.mrb[78].mxu0  ;;  %v2915_v60 = vpop.f32.mrb[78].mxu1  ;;  %v2927_v42 = vrot.slane %v2873_v10, 2 }
 0x939   :  { %v2921_v45 = vadd.f32 %v2919_v39, %v6773_v18  ;;  %v2876_v59 = vpop.f32.mrb[79].mxu0  ;;  %v3962_v26 = vpop.f32.mrb[79].mxu1  ;;  %v2936_v39 = vrot.slane %v2934_v33, 2  ;;  %v6194_v33 = vld [vmem:[#allocation10] ss:$16 sps:$4 sm:$0xff]  }
 0x93a   :  { %v4278_v38 = vpop.eup %4277  ;;  %v2929_v22 = vadd.f32 %v2927_v42, %v6775_v51 }
 0x93b   :  { %v2922_v40 = vmul.f32 0.5, %v2921_v45  ;;  %v2833_v27 = vsub.f32 %v5942_v24, %v4278_v38  ;;  %v6253_v24 = vld [vmem:[#allocation10 + $0xac] ss:$16 sps:$4 sm:$0xff]  }
 0x93c   :  { %v2930_v34 = vmul.f32 0.5, %v2929_v22  ;;  %v6197_v22 = vld [vmem:[#allocation10 + $0x8] ss:$16 sps:$4 sm:$0xff]   ;;  %7011 = vst [vmem:[#allocation33_spill] sm:$0xff] %v6253_v24 }
 0x93d   :  { %4279 = vtanh.f32 %v2922_v40  ;;  %v2834_v25 = vmul.f32 %v2833_v27, %v2829_v9 }
 0x93e   :  { %4281 = vtanh.f32 %v2930_v34  ;;  %v6217_v34 = vld [vmem:[#allocation10 + $0x4c] ss:$16 sps:$4 sm:$0xff]  }
 0x93f   :  { %v6175_v43 = vadd.f32 %v4278_v38, %v2834_v25 }
 0x947   :  { %v4280_v28 = vpop.eup %4279 }
 0x948   :  { %v2924_v61 = vmul.f32 0.5, %v4280_v28  ;;  %v4282_v10 = vpop.eup %4281  ;;  %v6203_v28 = vld [vmem:[#allocation10 + $0x2c] ss:$16 sps:$4 sm:$0xff]  }
 0x949   :  { %v2932_v59 = vmul.f32 0.5, %v4282_v10  ;;  %v6226_v10 = vld [vmem:[#allocation10 + $0x64] ss:$16 sps:$4 sm:$0xff]  }
 0x94a   :  { %v2925_v21 = vadd.f32 0.5, %v2924_v61  ;;  %v6208_v61 = vld [vmem:[#allocation10 + $0x20] ss:$16 sps:$4 sm:$0xff]  }
 0x94b   :  { %v2933_v9 = vadd.f32 0.5, %v2932_v59  ;;  %v6232_v59 = vld [vmem:[#allocation10 + $0x60] ss:$16 sps:$4 sm:$0xff]  }
 0x94c   :  { %v2938_v44 = vmul.f32 %v2936_v39, %v2925_v21  ;;  %v6211_v21 = vld [vmem:[#allocation10 + $0x28] ss:$16 sps:$4 sm:$0xff]   ;;  %v6214_v39 = vld [vmem:[#allocation10 + $0x44] ss:$16 sps:$4 sm:$0xff]  }
 0x94e   :  { %v2939_v60 = vadd.f32 %v2938_v44, %v5042_v30  ;;  %v6220_v44 = vld [vmem:[#allocation10 + $0x40] ss:$16 sps:$4 sm:$0xff]  }
 0x950   :  { %4283 = vtanh.f32 %v2939_v60  ;;  %v6223_v60 = vld [vmem:[#allocation10 + $0x48] ss:$16 sps:$4 sm:$0xff]  }
 0x95a   :  { %v4284_v45 = vpop.eup %4283 }
 0x95b   :  { %v2942_v26 = vrot.slane %v4284_v45, 1 }
 0x95d   :  { %v2944_v38 = vsub.f32 %v5948_v31, %v2942_v26  ;;  %v6200_v31 = vld [vmem:[#allocation10 + $0x24] ss:$16 sps:$4 sm:$0xff]   ;;  %v6235_v26 = vld [vmem:[#allocation10 + $0x68] ss:$16 sps:$4 sm:$0xff]  }
 0x95f   :  { %v2946_v17 = vrot.slane %v2944_v38, 7  ;;  %v6238_v38 = vld [vmem:[#allocation10 + $0x84] ss:$16 sps:$4 sm:$0xff]  }
 0x960   :  { %7006 = vst [vmem:[#allocation28_spill] sm:$0xff] %v6238_v38 }
 0x961   :  { %v2948_v40 = vmul.f32 %v2946_v17, %v2933_v9  ;;  %v6241_v9 = vld [vmem:[#allocation10 + $0x8c] ss:$16 sps:$4 sm:$0xff]   ;;  %v6244_v17 = vld [vmem:[#allocation10 + $0x80] ss:$16 sps:$4 sm:$0xff]  }
 0x962   :  { %7007 = vst [vmem:[#allocation29_spill] sm:$0xff] %v6241_v9  ;;  %7008 = vst [vmem:[#allocation30_spill] sm:$0xff] %v6244_v17 }
 0x963   :  { %v6186_v27 = vadd.f32 %v4284_v45, %v2948_v40  ;;  %v6229_v45 = vld [vmem:[#allocation10 + $0x6c] ss:$16 sps:$4 sm:$0xff]   ;;  %v6247_v40 = vld [vmem:[#allocation10 + $0x88] ss:$16 sps:$4 sm:$0xff]  }
 0x964   :  { %7009 = vst [vmem:[#allocation31_spill] sm:$0xff] %v6247_v40 }
 0x965   :  { %v2950_v25 = vpack.c.bf16 %v6186_v27, %v6186_v27 }
 0x967   :  { %v6190_v42 = vrot.slane %v2950_v25, 3  ;;  %v6250_v25 = vld [vmem:[#allocation10 + $0xa4] ss:$16 sps:$4 sm:$0xff]  }
 0x968   :  { %7010 = vst [vmem:[#allocation32_spill] sm:$0xff] %v6250_v25 }
 0x969   :  { %2987 = vmatmul.mubr.bf16.vlgmr.msra.gmra.mrb[80].mxu0 %v6190_v42  ;;  %3028 = vmatmul.mubr.bf16.vlgmr.msra.gmra.mrb[80].mxu1 %v6190_v42 }
 0x96a   :  { %3037 = vmatpush1.bf16.msra.mxu0 %v6194_v33  ;;  %3078 = vmatpush1.bf16.msra.mxu1 %v6197_v22 }
 0x96b   :  { %3038 = vmatprep.subr.bf16.mxu0 %v6200_v31  ;;  %3079 = vmatprep.subr.bf16.mxu1 %v6203_v28 }
 0x96c   :  { %3068 = vmatprep.mubr.bf16.mxu0 %v6735_v35  ;;  %3109 = vmatprep.mubr.bf16.mxu1 %v6735_v35 }
 0x96e   :  { %3039 = vmatpush1.bf16.msra.mxu0 %v6208_v61  ;;  %3080 = vmatpush1.bf16.msra.mxu1 %v6211_v21 }
 0x96f   :  { %3040 = vmatprep.subr.bf16.mxu0 %v6214_v39  ;;  %3081 = vmatprep.subr.bf16.mxu1 %v6217_v34 }
 0x972   :  { %3041 = vmatpush1.bf16.msra.mxu0 %v6220_v44  ;;  %3082 = vmatpush1.bf16.msra.mxu1 %v6223_v60 }
 0x973   :  { %3042 = vmatprep.subr.bf16.mxu0 %v6226_v10  ;;  %3083 = vmatprep.subr.bf16.mxu1 %v6229_v45 }
 0x976   :  { %3043 = vmatpush1.bf16.msra.mxu0 %v6232_v59  ;;  %3084 = vmatpush1.bf16.msra.mxu1 %v6235_v26 }
 0x977   :  { %3044 = vmatprep.subr.bf16.mxu0 %v6238_v38  ;;  %3085 = vmatprep.subr.bf16.mxu1 %v6241_v9  ;;  %v6256_v38 = vld [vmem:[#allocation10 + $0xa0] ss:$16 sps:$4 sm:$0xff]   ;;  %v6259_v9 = vld [vmem:[#allocation10 + $0xa8] ss:$16 sps:$4 sm:$0xff]  }
 0x978   :  { %7012 = vst [vmem:[#allocation34_spill] sm:$0xff] %v6256_v38  ;;  %7013 = vst [vmem:[#allocation35_spill] sm:$0xff] %v6259_v9 }
 0x97a   :  { %3045 = vmatpush1.bf16.msra.mxu0 %v6244_v17  ;;  %3086 = vmatpush1.bf16.msra.mxu1 %v6247_v40  ;;  %v6262_v17 = vld [vmem:[#allocation10 + $0xc4] ss:$16 sps:$4 sm:$0xff]   ;;  %v6265_v40 = vld [vmem:[#allocation10 + $0xcc] ss:$16 sps:$4 sm:$0xff]  }
 0x97b   :  { %3046 = vmatprep.subr.bf16.mxu0 %v6250_v25  ;;  %3087 = vmatprep.subr.bf16.mxu1 %v6253_v24  ;;  %7014 = vst [vmem:[#allocation36_spill] sm:$0xff] %v6262_v17  ;;  %7015 = vst [vmem:[#allocation37_spill] sm:$0xff] %v6265_v40  ;;  %v6268_v25 = vld [vmem:[#allocation10 + $0xc0] ss:$16 sps:$4 sm:$0xff]   ;;  %v6271_v24 = vld [vmem:[#allocation10 + $0xc8] ss:$16 sps:$4 sm:$0xff]  }
 0x97c   :  { %7016 = vst [vmem:[#allocation38_spill] sm:$0xff] %v6268_v25 }
 0x97e   :  { %3047 = vmatpush1.bf16.msra.mxu0 %v6256_v38  ;;  %3088 = vmatpush1.bf16.msra.mxu1 %v6259_v9  ;;  %v6274_v38 = vld [vmem:[#allocation10 + $0xe4] ss:$16 sps:$4 sm:$0xff]   ;;  %v6277_v9 = vld [vmem:[#allocation10 + $0xec] ss:$16 sps:$4 sm:$0xff]  }
 0x97f   :  { %3048 = vmatprep.subr.bf16.mxu0 %v6262_v17  ;;  %3089 = vmatprep.subr.bf16.mxu1 %v6265_v40  ;;  %v6280_v17 = vld [vmem:[#allocation10 + $0xe0] ss:$16 sps:$4 sm:$0xff]   ;;  %v6283_v40 = vld [vmem:[#allocation10 + $0xe8] ss:$16 sps:$4 sm:$0xff]  }
 0x982   :  { %3049 = vmatpush1.bf16.msra.mxu0 %v6268_v25  ;;  %3090 = vmatpush1.bf16.msra.mxu1 %v6271_v24  ;;  %v2836_v25 = vpack.c.bf16 %v6175_v43, %v6175_v43 }
 0x983   :  { %3050 = vmatprep.subr.bf16.mxu0 %v6274_v38  ;;  %3091 = vmatprep.subr.bf16.mxu1 %v6277_v9 }
 0x986   :  { %3051 = vmatpush1.bf16.msra.mxu0 %v6280_v17  ;;  %3092 = vmatpush1.bf16.msra.mxu1 %v6283_v40 }
 0x987   :  { %3137 = vmatprep.subr.bf16.mxu0 %v5853_v55  ;;  %3963 = vmatprep.subr.bf16.mxu1 %v6974_v6  ;;  %v7017_v55 = vld [vmem:[#allocation53_spill] sm:$0xff] }
 0x989   :  { %3069 = vmatmul.mubr.bf16.vlgmr.msra.gmra.mrb[84].mxu0 %v2836_v25  ;;  %3110 = vmatmul.mubr.bf16.vlgmr.msra.gmra.mrb[84].mxu1 %v2836_v25 }
 0x98a   :  { %3138 = vmatpush1.bf16.msra.mxu0 %v6975_v50  ;;  %3964 = vmatpush3.bf16.msra.mxu1 %v5993_v47  ;;  %v7018_v50 = vld [vmem:[#allocation54_spill] sm:$0xff]  ;;  %v7019_v47 = vld [vmem:[#allocation55_spill] sm:$0xff] }
 0x98b   :  { %3139 = vmatprep.subr.bf16.mxu0 %v6976_v57  ;;  %3965 = vmatprep.subr.bf16.mxu1 %v6974_v6  ;;  %v7020_v57 = vld [vmem:[#allocation72_spill] sm:$0xff] }
 0x98c   :  { %3169 = vmatprep.mubr.bf16.mxu0 %v6735_v35  ;;  %3979 = vmatprep.mubr.msk.bf16.mxu1 %vm4659_vm1, %v6974_v6 }
 0x98e   :  { %3140 = vmatpush1.bf16.msra.mxu0 %v6977_v49  ;;  %3966 = vmatpush3.bf16.msra.mxu1 %v6002_v4  ;;  %v7021_v49 = vld [vmem:[#allocation73_spill] sm:$0xff]  ;;  %v7022_v4 = vld [vmem:[#allocation74_spill] sm:$0xff] }
 0x98f   :  { %3141 = vmatprep.subr.bf16.mxu0 %v6978_v48  ;;  %3967 = vmatprep.subr.bf16.mxu1 %v6974_v6  ;;  %v7023_v48 = vld [vmem:[#allocation57_spill] sm:$0xff] }
 0x992   :  { %3142 = vmatpush1.bf16.msra.mxu0 %v6007_v58  ;;  %3968 = vmatpush3.bf16.msra.mxu1 %v6010_v46  ;;  %v7024_v58 = vld [vmem:[#allocation58_spill] sm:$0xff]  ;;  %v7025_v46 = vld [vmem:[#allocation59_spill] sm:$0xff] }
 0x993   :  { %3143 = vmatprep.subr.bf16.mxu0 %v6013_v2  ;;  %3969 = vmatprep.subr.bf16.mxu1 %v6974_v6  ;;  %v7026_v2 = vld [vmem:[#allocation60_spill] sm:$0xff] }
 0x996   :  { %3144 = vmatpush1.bf16.msra.mxu0 %v6017_v54  ;;  %3970 = vmatpush3.bf16.msra.mxu1 %v6020_v0  ;;  %v7027_v54 = vld [vmem:[#allocation61_spill] sm:$0xff]  ;;  %v7028_v0 = vld [vmem:[#allocation62_spill] sm:$0xff] }
 0x997   :  { %3145 = vmatprep.subr.bf16.mxu0 %v6023_v56  ;;  %3971 = vmatprep.subr.bf16.mxu1 %v6974_v6  ;;  %v7029_v56 = vld [vmem:[#allocation63_spill] sm:$0xff] }
 0x99a   :  { %3146 = vmatpush1.bf16.msra.mxu0 %v6027_v37  ;;  %3972 = vmatpush3.bf16.msra.mxu1 %v6030_v5  ;;  %v7030_v37 = vld [vmem:[#allocation64_spill] sm:$0xff]  ;;  %v7031_v5 = vld [vmem:[#allocation65_spill] sm:$0xff] }
 0x99b   :  { %3147 = vmatprep.subr.bf16.mxu0 %v6033_v53  ;;  %3973 = vmatprep.subr.bf16.mxu1 %v6974_v6  ;;  %v7032_v53 = vld [vmem:[#allocation66_spill] sm:$0xff] }
 0x99e   :  { %3148 = vmatpush1.bf16.msra.mxu0 %v6037_v7  ;;  %3974 = vmatpush3.bf16.msra.mxu1 %v6040_v52  ;;  %v7033_v7 = vld [vmem:[#allocation67_spill] sm:$0xff]  ;;  %v7034_v52 = vld [vmem:[#allocation68_spill] sm:$0xff] }
 0x99f   :  { %3149 = vmatprep.subr.bf16.mxu0 %v6043_v11  ;;  %3975 = vmatprep.subr.bf16.mxu1 %v6974_v6  ;;  %v7035_v11 = vld [vmem:[#allocation19_spill] sm:$0xff] }
 0x9a2   :  { %3150 = vmatpush1.bf16.msra.mxu0 %v6047_v63  ;;  %3976 = vmatpush3.bf16.msra.mxu1 %v6050_v1  ;;  %v7036_v63 = vld [vmem:[#allocation20_spill] sm:$0xff]  ;;  %v7037_v1 = vld [vmem:[#allocation21_spill] sm:$0xff] }
 0x9a3   :  { %3151 = vmatprep.subr.bf16.mxu0 %v6053_v16  ;;  %3977 = vmatprep.subr.bf16.mxu1 %v6974_v6  ;;  %v7038_v16 = vld [vmem:[#allocation22_spill] sm:$0xff] }
 0x9a6   :  { %3152 = vmatpush1.bf16.msra.mxu0 %v6057_v13  ;;  %3978 = vmatpush3.bf16.msra.mxu1 %v6060_v32  ;;  %v7039_v13 = vld [vmem:[#allocation23_spill] sm:$0xff]  ;;  %v7040_v32 = vld [vmem:[#allocation24_spill] sm:$0xff] }
 0x9a7   :  { %3256 = vmatprep.subr.bf16.mxu0 %v6063_v15  ;;  %3297 = vmatprep.subr.bf16.mxu1 %v6066_v14  ;;  %v7041_v15 = vld [vmem:[#allocation25_spill] sm:$0xff]  ;;  %v7042_v14 = vld [vmem:[#allocation26_spill] sm:$0xff] }
 0x9a9   :  { %3170 = vmatmul.mubr.bf16.vlgmr.msra.gmra.mrb[88].mxu0 %v6190_v42  ;;  %3980 = vmatmul.mubr.bf16.vlgmr.msra.gmra.mrb[88].mxu1 %v6190_v42 }
 0x9aa   :  { %3257 = vmatpush1.bf16.msra.mxu0 %v6071_v8  ;;  %3298 = vmatpush1.bf16.msra.mxu1 %v6074_v36  ;;  %v7043_v8 = vld [vmem:[#allocation27_spill] sm:$0xff] }
 0x9ab   :  { %3258 = vmatprep.subr.bf16.mxu0 %v6077_v41  ;;  %3299 = vmatprep.subr.bf16.mxu1 %v6080_v12 }
 0x9ac   :  { %3288 = vmatprep.mubr.bf16.mxu0 %v6735_v35  ;;  %3329 = vmatprep.mubr.bf16.mxu1 %v6735_v35 }
 0x9ae   :  { %3259 = vmatpush1.bf16.msra.mxu0 %v6085_v19  ;;  %3300 = vmatpush1.bf16.msra.mxu1 %v7017_v55 }
 0x9af   :  { %3260 = vmatprep.subr.bf16.mxu0 %v7018_v50  ;;  %3301 = vmatprep.subr.bf16.mxu1 %v7019_v47 }
 0x9b2   :  { %3261 = vmatpush1.bf16.msra.mxu0 %v7020_v57  ;;  %3302 = vmatpush1.bf16.msra.mxu1 %v7021_v49 }
 0x9b3   :  { %3262 = vmatprep.subr.bf16.mxu0 %v7022_v4  ;;  %3303 = vmatprep.subr.bf16.mxu1 %v7023_v48 }
 0x9b6   :  { %3263 = vmatpush1.bf16.msra.mxu0 %v7024_v58  ;;  %3304 = vmatpush1.bf16.msra.mxu1 %v7025_v46 }
 0x9b7   :  { %3264 = vmatprep.subr.bf16.mxu0 %v7026_v2  ;;  %3305 = vmatprep.subr.bf16.mxu1 %v7027_v54 }
 0x9ba   :  { %3265 = vmatpush1.bf16.msra.mxu0 %v7028_v0  ;;  %3306 = vmatpush1.bf16.msra.mxu1 %v7029_v56 }
 0x9bb   :  { %3266 = vmatprep.subr.bf16.mxu0 %v7030_v37  ;;  %3307 = vmatprep.subr.bf16.mxu1 %v7031_v5 }
 0x9be   :  { %3267 = vmatpush1.bf16.msra.mxu0 %v7032_v53  ;;  %3308 = vmatpush1.bf16.msra.mxu1 %v7033_v7 }
 0x9bf   :  { %3268 = vmatprep.subr.bf16.mxu0 %v7034_v52  ;;  %3309 = vmatprep.subr.bf16.mxu1 %v7035_v11 }
 0x9c2   :  { %3269 = vmatpush1.bf16.msra.mxu0 %v7036_v63  ;;  %3310 = vmatpush1.bf16.msra.mxu1 %v7037_v1 }
 0x9c3   :  { %3270 = vmatprep.subr.bf16.mxu0 %v7038_v16  ;;  %3311 = vmatprep.subr.bf16.mxu1 %v7039_v13 }
 0x9c6   :  { %3271 = vmatpush1.bf16.msra.mxu0 %v7040_v32  ;;  %3312 = vmatpush1.bf16.msra.mxu1 %v7041_v15 }
 0x9c7   :  { %3338 = vmatprep.subr.bf16.mxu0 %v7042_v14  ;;  %3379 = vmatprep.subr.bf16.mxu1 %v7043_v8 }
 0xa3c   :  { %v2988_v36 = vpop.f32.mrb[80].mxu0  ;;  %v3029_v41 = vpop.f32.mrb[80].mxu1 }
 0xa3d   :  { %v2990_v12 = vpop.f32.mrb[81].mxu0  ;;  %v3031_v19 = vpop.f32.mrb[81].mxu1 }
 0xa3e   :  { %v2992_v42 = vpop.f32.mrb[82].mxu0  ;;  %v3033_v25 = vpop.f32.mrb[82].mxu1 }
 0xa3f   :  { %v2993_v55 = vpop.f32.mrb[83].mxu0  ;;  %v3034_v50 = vpop.f32.mrb[83].mxu1 }
 0xa5c   :  { %v3070_v47 = vpop.f32.mrb[84].mxu0  ;;  %v3111_v57 = vpop.f32.mrb[84].mxu1 }
 0xa5d   :  { %v3071_v49 = vadd.f32 %v3070_v47, %v2988_v36  ;;  %v3112_v4 = vadd.f32 %v3111_v57, %v3029_v41  ;;  %v3072_v48 = vpop.f32.mrb[85].mxu0  ;;  %v3113_v58 = vpop.f32.mrb[85].mxu1 }
 0xa5e   :  { %v3073_v46 = vadd.f32 %v3072_v48, %v2990_v12  ;;  %v3114_v2 = vadd.f32 %v3113_v58, %v3031_v19  ;;  %v3074_v54 = vpop.f32.mrb[86].mxu0  ;;  %v3115_v0 = vpop.f32.mrb[86].mxu1 }
 0xa5f   :  { %v3118_v56 = vadd.f32 %v3071_v49, %v5225_v23  ;;  %v3075_v37 = vpop.f32.mrb[87].mxu0  ;;  %v3116_v5 = vpop.f32.mrb[87].mxu1  ;;  %v3120_v13 = vadd.f32 %v3112_v4, %v5238_v20 }
 0xa60   :  { %v3119_v7 = vadd.f32 %v3073_v46, %v6827_v3  ;;  %v3121_v1 = vadd.f32 %v3114_v2, %v6828_v62 }
 0xa61   :  { %v3122_v53 = vmul.f32 0.5, %v3118_v56 }
 0xa62   :  { %v3126_v52 = vmul.f32 0.5, %v3119_v7 }
 0xa63   :  { %4285 = vtanh.f32 %v3122_v53 }
 0xa64   :  { %4287 = vtanh.f32 %v3126_v52 }
 0xa6d   :  { %v4286_v11 = vpop.eup %4285 }
 0xa6e   :  { %v3124_v63 = vmul.f32 0.5, %v4286_v11  ;;  %v4288_v14 = vpop.eup %4287 }
 0xa6f   :  { %v3128_v41 = vmul.f32 0.5, %v4288_v14 }
 0xa70   :  { %v3125_v16 = vadd.f32 0.5, %v3124_v63 }
 0xa71   :  { %v3129_v48 = vadd.f32 0.5, %v3128_v41 }
 0xa72   :  { %v3130_v32 = vmul.f32 %v3125_v16, %v3121_v1 }
 0xa74   :  { %v3131_v15 = vadd.f32 %v3130_v32, %v3120_v13 }
 0xa76   :  { %4289 = vtanh.f32 %v3131_v15 }
 0xa7c   :  { %v3171_v8 = vpop.f32.mrb[88].mxu0  ;;  %v3212_v36 = vpop.f32.mrb[88].mxu1 }
 0xa7d   :  { %v3219_v12 = vrot.slane %v3171_v8, 1  ;;  %v3173_v19 = vpop.f32.mrb[89].mxu0  ;;  %v3981_v42 = vpop.f32.mrb[89].mxu1  ;;  %v3234_v0 = vadd.f32 %v6180_v29, %v3212_v36 }
 0xa7e   :  { %v3175_v25 = vpop.f32.mrb[90].mxu0  ;;  %v3215_v55 = vpop.f32.mrb[90].mxu1  ;;  %v3227_v54 = vrot.slane %v3173_v19, 1 }
 0xa7f   :  { %v3221_v50 = vadd.f32 %v3219_v12, %v6773_v18  ;;  %v3176_v47 = vpop.f32.mrb[91].mxu0  ;;  %v3982_v57 = vpop.f32.mrb[91].mxu1  ;;  %v3236_v18 = vrot.slane %v3234_v0, 1 }
 0xa80   :  { %v4290_v49 = vpop.eup %4289  ;;  %v3229_v56 = vadd.f32 %v3227_v54, %v6775_v51 }
 0xa81   :  { %v3222_v58 = vmul.f32 0.5, %v3221_v50  ;;  %v3133_v4 = vsub.f32 %v6175_v43, %v4290_v49 }
 0xa82   :  { %v3230_v7 = vmul.f32 0.5, %v3229_v56 }
 0xa83   :  { %4291 = vtanh.f32 %v3222_v58  ;;  %v3134_v46 = vmul.f32 %v3133_v4, %v3129_v48 }
 0xa84   :  { %4293 = vtanh.f32 %v3230_v7 }
 0xa85   :  { %v6367_v2 = vadd.f32 %v4290_v49, %v3134_v46 }
 0xa8d   :  { %v4292_v37 = vpop.eup %4291 }
 0xa8e   :  { %v3224_v5 = vmul.f32 0.5, %v4292_v37  ;;  %v4294_v63 = vpop.eup %4293 }
 0xa8f   :  { %v3232_v16 = vmul.f32 0.5, %v4294_v63 }
 0xa90   :  { %v3225_v53 = vadd.f32 0.5, %v3224_v5 }
 0xa91   :  { %v3233_v15 = vadd.f32 0.5, %v3232_v16 }
 0xa92   :  { %v3238_v52 = vmul.f32 %v3236_v18, %v3225_v53 }
 0xa94   :  { %v3239_v11 = vadd.f32 %v3238_v52, %v5042_v30  ;;  %v7044_v30 = vld [vmem:[#allocation28_spill] sm:$0xff] }
 0xa96   :  { %4295 = vtanh.f32 %v3239_v11 }
 0xaa0   :  { %v4296_v1 = vpop.eup %4295 }
 0xaa1   :  { %v3242_v13 = vrot.slane %v4296_v1, 1 }
 0xaa3   :  { %v3244_v32 = vsub.f32 %v6186_v27, %v3242_v13  ;;  %v7046_v27 = vld [vmem:[#allocation30_spill] sm:$0xff] }
 0xaa5   :  { %v3246_v29 = vrot.slane %v3244_v32, 7 }
 0xaa7   :  { %v3248_v14 = vmul.f32 %v3246_v29, %v3233_v15  ;;  %v7055_v29 = vld [vmem:[#allocation56_spill] sm:$0xff] }
 0xaa9   :  { %v3249_v51 = vadd.f32 %v4296_v1, %v3248_v14  ;;  %v3439_v14 = vrot.slane %v7055_v29, 7 }
 0xaab   :  { %v3250_v8 = vpack.c.bf16 %v3249_v51, %v3249_v51 }
 0xaad   :  { %v3252_v36 = vshrl.u32 %v3250_v8, 16  ;;  %v7056_v8 = vld [vmem:[#allocation49_spill] sm:$0xff] }
 0xaaf   :  { %v3254_v41 = vrot.slane %v3252_v36, 3  ;;  %v7057_v36 = vld [vmem:[#allocation75_spill] sm:$0xff] }
 0xab1   :  { %3289 = vmatmul.mubr.bf16.vlgmr.msra.gmra.mrb[92].mxu0 %v3254_v41  ;;  %3330 = vmatmul.mubr.bf16.vlgmr.msra.gmra.mrb[92].mxu1 %v3254_v41  ;;  %v3445_v41 = vrot.slane %v7057_v36, 5 }
 0xab2   :  { %3339 = vmatpush1.bf16.msra.mxu0 %v6194_v33  ;;  %3380 = vmatpush1.bf16.msra.mxu1 %v6197_v22  ;;  %v7047_v33 = vld [vmem:[#allocation31_spill] sm:$0xff]  ;;  %v7048_v22 = vld [vmem:[#allocation32_spill] sm:$0xff] }
 0xab3   :  { %3340 = vmatprep.subr.bf16.mxu0 %v6200_v31  ;;  %3381 = vmatprep.subr.bf16.mxu1 %v6203_v28  ;;  %v7049_v31 = vld [vmem:[#allocation33_spill] sm:$0xff]  ;;  %v7050_v28 = vld [vmem:[#allocation34_spill] sm:$0xff] }
 0xab4   :  { %3370 = vmatprep.mubr.bf16.mxu0 %v6735_v35  ;;  %3411 = vmatprep.mubr.bf16.mxu1 %v6735_v35  ;;  %v7045_v35 = vld [vmem:[#allocation29_spill] sm:$0xff] }
 0xab6   :  { %3341 = vmatpush1.bf16.msra.mxu0 %v6208_v61  ;;  %3382 = vmatpush1.bf16.msra.mxu1 %v6211_v21  ;;  %v7051_v61 = vld [vmem:[#allocation35_spill] sm:$0xff]  ;;  %v7052_v21 = vld [vmem:[#allocation36_spill] sm:$0xff] }
 0xab7   :  { %3342 = vmatprep.subr.bf16.mxu0 %v6214_v39  ;;  %3383 = vmatprep.subr.bf16.mxu1 %v6217_v34  ;;  %v7053_v39 = vld [vmem:[#allocation37_spill] sm:$0xff]  ;;  %v7054_v34 = vld [vmem:[#allocation38_spill] sm:$0xff] }
 0xaba   :  { %3343 = vmatpush1.bf16.msra.mxu0 %v6220_v44  ;;  %3384 = vmatpush1.bf16.msra.mxu1 %v6223_v60  ;;  %v3136_v44 = vpack.c.bf16 %v6367_v2, %v6367_v2  ;;  %v4199_v60 = vld [vmem:[#allocation11] sm:$0xff]  }
 0xabb   :  { %3344 = vmatprep.subr.bf16.mxu0 %v6226_v10  ;;  %3385 = vmatprep.subr.bf16.mxu1 %v6229_v45  ;;  %v4201_v10 = vld [vmem:[#allocation11 + $0x10] sm:$0xff]   ;;  %v4202_v45 = vld [vmem:[#allocation11 + $0x18] sm:$0xff]  }
 0xabe   :  { %3345 = vmatpush1.bf16.msra.mxu0 %v6232_v59  ;;  %3386 = vmatpush1.bf16.msra.mxu1 %v6235_v26  ;;  %v4203_v59 = vld [vmem:[#allocation11 + $0x20] sm:$0xff]   ;;  %v4204_v26 = vld [vmem:[#allocation11 + $0x28] sm:$0xff]  }
 0xabf   :  { %3346 = vmatprep.subr.bf16.mxu0 %v7044_v30  ;;  %3387 = vmatprep.subr.bf16.mxu1 %v7045_v35 }
 0xac2   :  { %3347 = vmatpush1.bf16.msra.mxu0 %v7046_v27  ;;  %3388 = vmatpush1.bf16.msra.mxu1 %v7047_v33 }
 0xac3   :  { %3348 = vmatprep.subr.bf16.mxu0 %v7048_v22  ;;  %3389 = vmatprep.subr.bf16.mxu1 %v7049_v31  ;;  %v3451_v22 = vrot.slane %v6175_v43, 3  ;;  %v3733_v43 = vld [vmem:[%s6453_s9] ss:$0 sm:$0xff] }
 0xac6   :  { %3349 = vmatpush1.bf16.msra.mxu0 %v7050_v28  ;;  %3390 = vmatpush1.bf16.msra.mxu1 %v7051_v61  ;;  %v3454_v28 = vrot.slane %v6367_v2, 2 }
 0xac7   :  { %3350 = vmatprep.subr.bf16.mxu0 %v7052_v21  ;;  %3391 = vmatprep.subr.bf16.mxu1 %v7053_v39 }
 0xaca   :  { %3351 = vmatpush1.bf16.msra.mxu0 %v7054_v34  ;;  %3392 = vmatpush1.bf16.msra.mxu1 %v6271_v24  ;;  %v4200_v24 = vld [vmem:[#allocation11 + $0x8] sm:$0xff]  }
 0xacb   :  { %3352 = vmatprep.subr.bf16.mxu0 %v6274_v38  ;;  %3393 = vmatprep.subr.bf16.mxu1 %v6277_v9  ;;  %v4205_v38 = vld [vmem:[#allocation11 + $0x30] sm:$0xff]   ;;  %v4206_v9 = vld [vmem:[#allocation11 + $0x38] sm:$0xff]  }
 0xace   :  { %3353 = vmatpush1.bf16.msra.mxu0 %v6280_v17  ;;  %3394 = vmatpush1.bf16.msra.mxu1 %v6283_v40 }
 0xacf   :  { %3983 = vmatprep.subr.bf16.mxu0 %v6974_v6 }
 0xad1   :  { %3371 = vmatmul.mubr.bf16.vlgmr.msra.gmra.mrb[96].mxu0 %v3136_v44  ;;  %3412 = vmatmul.mubr.bf16.vlgmr.msra.gmra.mrb[96].mxu1 %v3136_v44 }
 0xad2   :  { %3999 = vmatprep.mubr.msk.bf16.mxu0 %vm4659_vm1, %v6974_v6  ;;  %3984 = vmatpush3.bf16.msra.mxu0 %v4199_v60 }
 0xad3   :  { %3985 = vmatprep.subr.bf16.mxu0 %v6974_v6 }
 0xad6   :  { %3986 = vmatpush3.bf16.msra.mxu0 %v4200_v24 }
 0xad7   :  { %3987 = vmatprep.subr.bf16.mxu0 %v6974_v6 }
 0xada   :  { %3988 = vmatpush3.bf16.msra.mxu0 %v4201_v10 }
 0xadb   :  { %3989 = vmatprep.subr.bf16.mxu0 %v6974_v6 }
 0xade   :  { %3990 = vmatpush3.bf16.msra.mxu0 %v4202_v45 }
 0xadf   :  { %3991 = vmatprep.subr.bf16.mxu0 %v6974_v6 }
 0xae2   :  { %3992 = vmatpush3.bf16.msra.mxu0 %v4203_v59 }
 0xae3   :  { %3993 = vmatprep.subr.bf16.mxu0 %v6974_v6 }
 0xae6   :  { %3994 = vmatpush3.bf16.msra.mxu0 %v4204_v26 }
 0xae7   :  { %3995 = vmatprep.subr.bf16.mxu0 %v6974_v6 }
 0xaea   :  { %3996 = vmatpush3.bf16.msra.mxu0 %v4205_v38 }
 0xaeb   :  { %3997 = vmatprep.subr.bf16.mxu0 %v6974_v6 }
 0xaee   :  { %3998 = vmatpush3.bf16.msra.mxu0 %v4206_v9 }
 0xb84   :  { %v3290_v17 = vpop.f32.mrb[92].mxu0  ;;  %v3331_v40 = vpop.f32.mrb[92].mxu1 }
 0xb85   :  { %v3292_v12 = vpop.f32.mrb[93].mxu0  ;;  %v3333_v19 = vpop.f32.mrb[93].mxu1 }
 0xb86   :  { %v3294_v42 = vpop.f32.mrb[94].mxu0  ;;  %v3335_v25 = vpop.f32.mrb[94].mxu1 }
 0xb87   :  { %v3295_v55 = vpop.f32.mrb[95].mxu0  ;;  %v3336_v50 = vpop.f32.mrb[95].mxu1 }
 0xba4   :  { %v3372_v47 = vpop.f32.mrb[96].mxu0  ;;  %v3413_v57 = vpop.f32.mrb[96].mxu1 }
 0xba5   :  { %v3373_v49 = vadd.f32 %v3372_v47, %v3290_v17  ;;  %v3414_v48 = vadd.f32 %v3413_v57, %v3331_v40  ;;  %v3374_v58 = vpop.f32.mrb[97].mxu0  ;;  %v3415_v4 = vpop.f32.mrb[97].mxu1 }
 0xba6   :  { %v3375_v46 = vadd.f32 %v3374_v58, %v3292_v12  ;;  %v3416_v54 = vadd.f32 %v3415_v4, %v3333_v19  ;;  %v3376_v0 = vpop.f32.mrb[98].mxu0  ;;  %v3417_v56 = vpop.f32.mrb[98].mxu1 }
 0xba7   :  { %v3420_v6 = vadd.f32 %v3373_v49, %v5225_v23  ;;  %v3377_v37 = vpop.f32.mrb[99].mxu0  ;;  %v3418_v5 = vpop.f32.mrb[99].mxu1  ;;  %v3422_v16 = vadd.f32 %v3414_v48, %v5238_v20  ;;  %v7059_v20 = vld [vmem:[#allocation52_spill] sm:$0xff] }
 0xba8   :  { %v3421_v18 = vadd.f32 %v3375_v46, %v6827_v3  ;;  %v3423_v63 = vadd.f32 %v3416_v54, %v6828_v62  ;;  %v3442_v3 = vrot.slane %v7056_v8, 6  ;;  %v7058_v62 = vld [vmem:[#allocation69_spill] sm:$0xff]  ;;  %v3460_v33 = vsel %vm3459_vm2, %v7059_v20, %v3439_v14 }
 0xba9   :  { %v3424_v53 = vmul.f32 0.5, %v3420_v6  ;;  %v3448_v27 = vrot.slane %v7058_v62, 4 }
 0xbaa   :  { %v3428_v7 = vmul.f32 0.5, %v3421_v18  ;;  %v3462_v61 = vsel %vm3461_vm3, %v3460_v33, %v3442_v3 }
 0xbab   :  { %4297 = vtanh.f32 %v3424_v53  ;;  %v3464_v39 = vsel %vm3463_vm4, %v3462_v61, %v3445_v41 }
 0xbac   :  { %4299 = vtanh.f32 %v3428_v7  ;;  %v3466_v34 = vsel %vm3465_vm5, %v3464_v39, %v3448_v27 }
 0xbad   :  { %v3468_v60 = vsel %vm3467_vm6, %v3466_v34, %v3451_v22 }
 0xbae   :  { %v3470_v24 = vsel %vm3469_vm7, %v3468_v60, %v3454_v28 }
 0xbb5   :  { %v4298_v52 = vpop.eup %4297 }
 0xbb6   :  { %v3426_v11 = vmul.f32 0.5, %v4298_v52  ;;  %v4300_v15 = vpop.eup %4299 }
 0xbb7   :  { %v3430_v23 = vmul.f32 0.5, %v4300_v15 }
 0xbb8   :  { %v3427_v1 = vadd.f32 0.5, %v3426_v11 }
 0xbb9   :  { %v3431_v30 = vadd.f32 0.5, %v3430_v23 }
 0xbba   :  { %v3432_v13 = vmul.f32 %v3427_v1, %v3423_v63 }
 0xbbc   :  { %v3433_v32 = vadd.f32 %v3432_v13, %v3422_v16 }
 0xbbe   :  { %4301 = vtanh.f32 %v3433_v32 }
 0xbc8   :  { %v4302_v51 = vpop.eup %4301 }
 0xbc9   :  { %v3435_v35 = vsub.f32 %v6367_v2, %v4302_v51 }
 0xbcb   :  { %v3436_v31 = vmul.f32 %v3435_v35, %v3431_v30 }
 0xbcd   :  { %v3437_v21 = vadd.f32 %v4302_v51, %v3436_v31 }
 0xbcf   :  { %v3457_v44 = vrot.slane %v3437_v21, 1 }
 0xbd1   :  { %v3472_v10 = vsel %vm3471_vm8, %v3470_v24, %v3457_v44 }
 0xbd2   :  { %v3473_v45 = vpack.c.bf16 %v3472_v10, %v3472_v10 }
 0xbd4   :  { %4000 = vmatmul.mubr.bf16.vlgmr.msra.gmra.mrb[100].mxu0 %v3473_v45 }
 0xca7   :  { %v3579_v2 = vpop.f32.mrb[100].mxu0 }
 0xca8   :  { %v3580_v59 = vadd.f32 %v3733_v43, %v3579_v2  ;;  %v4001_v26 = vpop.f32.mrb[101].mxu0 }
 0xca9   :  { %v3582_v38 = vpop.f32.mrb[102].mxu0 }
 0xcaa   :  { %3585 = vst [vmem:[#allocation13] sm:$0xff] %v3580_v59  ;;  %v4002_v9 = vpop.f32.mrb[103].mxu0 }
 0xcab   :  { %4624 = shalt.err (!%p4621_p10)
}
 0xcac   :  { %s4625_s9 = scalar_lea.hbm %s6454_s10, 128 }
 0xcad   :  { %p4626_p11 = scmp.ne.s32.totalorder %s6454_s10, %s4625_s9  ;;  %p4629_p12 = scmp.lt.u32.totalorder %s4625_s9, %s6454_s10 }
 0xcaf   :  { %p4631_p13 = pnand %p4629_p12, %p4626_p11 }
 0xcb1   :  { %4634 = shalt.err (!%p4631_p13)
}
 0xcb2   :  { %3595 = dma.vmem_to_hbm [thread:$0]  %s3593_s18, 128, %s6454_s10, [#allocation4]  }
 0xcb3   :  { %4643 = dma.done.wait [#allocation4], 128  }
 0xcb4   :  { %4644 = vsyncadd [#allocation4], 4294967168 }
 0xcb5   :  { %3599 = vsyncpa [#allocation3], 1 }
 0xcb6   :  { %3600 = vsyncpa [#allocation6], 1 }
 0xcb7   :  { %3601 = vsyncpa [#allocation9], 1 }
 0xcb8   :  { %3602 = vsyncpa [#allocation12], 1 }
 0xcb9   :  { %3603 = vsyncpa [#allocation4], 1 }

</bundles_post_ra>
